<compile_context>
chip_gen: v6e
topology: v6e:2x2x1
jax: 0.10.0
libtpu: 0.0.40
codegen_flags: <defaults>
</compile_context>

<pallas_src>
import functools
import math

import jax
import jax.numpy as jnp
from jax.experimental import pallas as pl
from jax.experimental.pallas import tpu as pltpu


# --------------------------- in-kernel helpers ---------------------------

def _layer_norm(x, g, b, eps):
    # x: (N, D) f32; g, b: (1, D) f32
    mean = jnp.mean(x, axis=-1, keepdims=True)
    var = jnp.mean(jnp.square(x - mean), axis=-1, keepdims=True)
    return (x - mean) * jax.lax.rsqrt(var + eps) * g + b


# q @ k.T : contract the last dim of both operands (splash-attention style).
_NT_DIMS = (((1,), (1,)), ((), ()))


# ----------------------------- fused kernel ------------------------------

def _fused_vit_kernel(
    patches_ref, base_ref, patch_w_ref,
    ln1_g_ref, ln1_b_ref,
    wq_ref, bq_ref, wk_ref, bk_ref, wv_ref, bv_ref,
    wproj_ref, bproj_ref,
    ln2_g_ref, ln2_b_ref,
    fc1_w_ref, fc1_b_ref, fc2_w_ref, fc2_b_ref,
    norm_g_ref, norm_b_ref,
    head_w_ref, head_b_ref,
    out_ref,
    *, depth, num_heads, scale, eps):
    f32 = jnp.float32
    bf16 = jnp.bfloat16

    # --- patch embedding: Conv2d(C, D, p, stride=p) rewritten as matmul.
    # `patches` has a leading all-zero row (CLS slot) and a zero-padded K dim;
    # `base` already contains cls_token + pos_embed + patch bias.
    x = jnp.dot(patches_ref[0], patch_w_ref[...],
                preferred_element_type=f32) + base_ref[0]          # (N, D) f32
    N, D = x.shape

    # --- transformer encoder blocks (depth & heads statically unrolled) ---
    for l in range(depth):
        h = _layer_norm(x, ln1_g_ref[l], ln1_b_ref[l], eps)
        hb = h.astype(bf16)
        attn = jnp.zeros((N, D), f32)
        for hh in range(num_heads):
            q = jnp.dot(hb, wq_ref[l, hh], preferred_element_type=f32) + bq_ref[l, hh]
            k = jnp.dot(hb, wk_ref[l, hh], preferred_element_type=f32) + bk_ref[l, hh]
            v = jnp.dot(hb, wv_ref[l, hh], preferred_element_type=f32) + bv_ref[l, hh]
            s = jax.lax.dot_general(q.astype(bf16), k.astype(bf16), _NT_DIMS,
                                    preferred_element_type=f32) * scale   # (N, N)
            m = jnp.max(s, axis=-1, keepdims=True)
            p = jnp.exp(s - m)
            p = p * pl.reciprocal(jnp.sum(p, axis=-1, keepdims=True), approx=True)
            o = jnp.dot(p.astype(bf16), v.astype(bf16),
                        preferred_element_type=f32)                       # (N, hd)
            # accumulate the output projection per head: sum_h o_h @ Wproj_h
            attn = attn + jnp.dot(o.astype(bf16), wproj_ref[l, hh],
                                  preferred_element_type=f32)
        x = x + attn + bproj_ref[l]

        h2 = _layer_norm(x, ln2_g_ref[l], ln2_b_ref[l], eps)
        m1 = jnp.dot(h2.astype(bf16), fc1_w_ref[l],
                     preferred_element_type=f32) + fc1_b_ref[l]
        # TODO(synk): PyTorch nn.GELU default is exact (erf); tanh approx used here.
        m1 = jax.nn.gelu(m1, approximate=True)
        m2 = jnp.dot(m1.astype(bf16), fc2_w_ref[l],
                     preferred_element_type=f32) + fc2_b_ref[l]
        x = x + m2

    # --- final norm + CLS pooling + classification head (padded to 128 lanes) ---
    xn = _layer_norm(x, norm_g_ref[...], norm_b_ref[...], eps)
    cls_vec = xn[0:1, :].astype(bf16)                                     # (1, D)
    logits = jnp.dot(cls_vec, head_w_ref[...],
                     preferred_element_type=f32) + head_b_ref[...]        # (1, Cpad)
    out_ref[0] = logits.astype(out_ref.dtype)


# ----------------------- deterministic parameter init -----------------------

def init_params(key, *, in_chans, img_size, patch_size, embed_dim, depth,
                num_heads, mlp_ratio, num_classes):
    n_patches = (img_size // patch_size) ** 2
    N = n_patches + 1                      # + cls token
    hidden = int(embed_dim * mlp_ratio)
    hd = embed_dim // num_heads
    cpp = in_chans * patch_size * patch_size
    k_pad = ((cpp + 63) // 64) * 64        # MXU-friendlier contraction dim
    c_pad = ((num_classes + 127) // 128) * 128  # lane-dense head output

    keys = iter(jax.random.split(key, 4 + depth * 4))

    def w(shape):
        return 0.02 * jax.random.normal(next(keys), shape, dtype=jnp.float32)

    bf = jnp.bfloat16

    patch_w = jnp.pad(w((cpp, embed_dim)), ((0, k_pad - cpp), (0, 0)))
    head_w = jnp.pad(w((embed_dim, num_classes)), ((0, 0), (0, c_pad - num_classes)))

    params = {
        "patch_w": patch_w.astype(bf),                         # (Kpad, D)
        "patch_b": jnp.zeros((embed_dim,), jnp.float32),
        "cls_token": w((1, 1, embed_dim)),
        "pos_embed": w((1, N, embed_dim)),
        "norm_g": jnp.ones((1, embed_dim), jnp.float32),
        "norm_b": jnp.zeros((1, embed_dim), jnp.float32),
        "head_w": head_w.astype(bf),                           # (D, Cpad)
        "head_b": jnp.zeros((1, c_pad), jnp.float32),
    }

    wq, wk, wv, wproj, fc1_w, fc2_w = [], [], [], [], [], []
    for _ in range(depth):
        qkv = w((embed_dim, 3 * embed_dim))                    # nn.Linear(D, 3D) weight (as x@W)
        q_w, k_w, v_w = jnp.split(qkv, 3, axis=1)

        def per_head(m):                                       # (D, D) -> (nh, D, hd)
            return m.reshape(embed_dim, num_heads, hd).transpose(1, 0, 2)

        wq.append(per_head(q_w))
        wk.append(per_head(k_w))
        wv.append(per_head(v_w))
        proj = w((embed_dim, embed_dim))                       # (D, D) -> (nh, hd, D)
        wproj.append(proj.reshape(num_heads, hd, embed_dim))
        fc1_w.append(w((embed_dim, hidden)))
        fc2_w.append(w((hidden, embed_dim)))

    params.update({
        "ln1_g": jnp.ones((depth, 1, embed_dim), jnp.float32),
        "ln1_b": jnp.zeros((depth, 1, embed_dim), jnp.float32),
        "ln2_g": jnp.ones((depth, 1, embed_dim), jnp.float32),
        "ln2_b": jnp.zeros((depth, 1, embed_dim), jnp.float32),
        "wq": jnp.stack(wq).astype(bf), "wk": jnp.stack(wk).astype(bf),
        "wv": jnp.stack(wv).astype(bf),
        "bq": jnp.zeros((depth, num_heads, 1, hd), jnp.float32),
        "bk": jnp.zeros((depth, num_heads, 1, hd), jnp.float32),
        "bv": jnp.zeros((depth, num_heads, 1, hd), jnp.float32),
        "wproj": jnp.stack(wproj).astype(bf),
        "bproj": jnp.zeros((depth, 1, embed_dim), jnp.float32),
        "fc1_w": jnp.stack(fc1_w).astype(bf),
        "fc1_b": jnp.zeros((depth, 1, hidden), jnp.float32),
        "fc2_w": jnp.stack(fc2_w).astype(bf),
        "fc2_b": jnp.zeros((depth, 1, embed_dim), jnp.float32),
    })
    return params


# ------------------------------ forward pass ------------------------------

def finetune_vit_forward(params, x, *, patch_size, num_heads, depth,
                         num_classes, eps=1e-6):
    """FinetuneViT.forward: embed = backbone(x) (ViT, head=Identity); logits = head(embed)."""
    B, C, H, W = x.shape
    p = patch_size
    hp, wp = H // p, W // p
    n_patches = hp * wp
    D = params["pos_embed"].shape[-1]
    N = n_patches + 1
    hd = D // num_heads
    scale = 1.0 / math.sqrt(hd)
    cpp = C * p * p
    k_pad = params["patch_w"].shape[0]
    c_pad = params["head_w"].shape[1]

    # Patch extraction (unfold). Prepend a zero row for the CLS slot and
    # zero-pad the contraction dim so the kernel needs no concat / odd K.
    patches = (x.reshape(B, C, hp, p, wp, p)
                 .transpose(0, 2, 4, 1, 3, 5)
                 .reshape(B, n_patches, cpp))
    patches = jnp.pad(patches, ((0, 0), (1, 0), (0, k_pad - cpp))).astype(jnp.bfloat16)

    # cls token + positional embedding + patch-embed bias folded into one base tensor.
    cls_row = params["cls_token"].reshape(1, D)
    bias_rows = jnp.broadcast_to(params["patch_b"], (n_patches, D))
    base = (params["pos_embed"][0]
            + jnp.concatenate([cls_row, bias_rows], axis=0))[None]        # (1, N, D)

    kernel = functools.partial(_fused_vit_kernel, depth=depth,
                               num_heads=num_heads, scale=scale, eps=eps)

    def whole(a):
        nd = a.ndim
        return pl.BlockSpec(a.shape, lambda b, nd=nd: (0,) * nd)

    in_arrays = [
        patches, base, params["patch_w"],
        params["ln1_g"], params["ln1_b"],
        params["wq"], params["bq"], params["wk"], params["bk"],
        params["wv"], params["bv"],
        params["wproj"], params["bproj"],
        params["ln2_g"], params["ln2_b"],
        params["fc1_w"], params["fc1_b"], params["fc2_w"], params["fc2_b"],
        params["norm_g"], params["norm_b"],
        params["head_w"], params["head_b"],
    ]
    in_specs = ([pl.BlockSpec((1, N, k_pad), lambda b: (b, 0, 0))]
                + [whole(a) for a in in_arrays[1:]])

    logits_padded = pl.pallas_call(
        kernel,
        grid=(B,),
        in_specs=in_specs,
        out_specs=pl.BlockSpec((1, 1, c_pad), lambda b: (b, 0, 0)),
        out_shape=jax.ShapeDtypeStruct((B, 1, c_pad), jnp.float32),
        compiler_params=pltpu.CompilerParams(dimension_semantics=("parallel",)),
    )(*in_arrays)

    return logits_padded[:, 0, :num_classes]


# ---------------------------------- main ----------------------------------

if __name__ == "__main__":
    key = jax.random.PRNGKey(0)
    k_param, k_input = jax.random.split(key)

    B, C, HW = 2, 3, 16
    cfg = dict(patch_size=4, num_heads=4, depth=2, num_classes=10)
    params = init_params(
        k_param,
        in_chans=C, img_size=HW, patch_size=cfg["patch_size"], embed_dim=32,
        depth=cfg["depth"], num_heads=cfg["num_heads"], mlp_ratio=4.0,
        num_classes=cfg["num_classes"],
    )
    x = jax.random.normal(k_input, (B, C, HW, HW), dtype=jnp.float32)

    fwd = jax.jit(functools.partial(finetune_vit_forward, **cfg))
    logits = fwd(params, x)
    jax.block_until_ready(logits)
    assert logits.shape == (B, cfg["num_classes"])
    print("KERNEL_OK")
</pallas_src>

<mosaic_0001>
module attributes {stable_mosaic.version = 11 : i64} {
  func.func @_fused_vit_kernel(%arg0: i32, %arg1: memref<1x17x64xbf16, #tpu.memory_space<vmem>>, %arg2: memref<1x17x32xf32, #tpu.memory_space<vmem>>, %arg3: memref<64x32xbf16, #tpu.memory_space<vmem>>, %arg4: memref<2x1x32xf32, #tpu.memory_space<vmem>>, %arg5: memref<2x1x32xf32, #tpu.memory_space<vmem>>, %arg6: memref<2x4x32x8xbf16, #tpu.memory_space<vmem>>, %arg7: memref<2x4x1x8xf32, #tpu.memory_space<vmem>>, %arg8: memref<2x4x32x8xbf16, #tpu.memory_space<vmem>>, %arg9: memref<2x4x1x8xf32, #tpu.memory_space<vmem>>, %arg10: memref<2x4x32x8xbf16, #tpu.memory_space<vmem>>, %arg11: memref<2x4x1x8xf32, #tpu.memory_space<vmem>>, %arg12: memref<2x4x8x32xbf16, #tpu.memory_space<vmem>>, %arg13: memref<2x1x32xf32, #tpu.memory_space<vmem>>, %arg14: memref<2x1x32xf32, #tpu.memory_space<vmem>>, %arg15: memref<2x1x32xf32, #tpu.memory_space<vmem>>, %arg16: memref<2x32x128xbf16, #tpu.memory_space<vmem>>, %arg17: memref<2x1x128xf32, #tpu.memory_space<vmem>>, %arg18: memref<2x128x32xbf16, #tpu.memory_space<vmem>>, %arg19: memref<2x1x32xf32, #tpu.memory_space<vmem>>, %arg20: memref<1x32xf32, #tpu.memory_space<vmem>>, %arg21: memref<1x32xf32, #tpu.memory_space<vmem>>, %arg22: memref<32x128xbf16, #tpu.memory_space<vmem>>, %arg23: memref<1x128xf32, #tpu.memory_space<vmem>>, %arg24: memref<1x1x128xf32, #tpu.memory_space<vmem>>) attributes {dimension_semantics = [#tpu.dimension_semantics<parallel>], iteration_bounds = array<i64: 2>, scalar_prefetch = 0 : i64, scratch_operands = 0 : i64, tpu.core_type = #tpu.core_type<tc>, window_params = [{transform_indices = @transform_0, window_bounds = array<i64: 1, 17, 64>}, {pipeline_mode = #tpu.pipeline_mode<synchronous>, transform_indices = @transform_1, window_bounds = array<i64: 1, 17, 32>}, {pipeline_mode = #tpu.pipeline_mode<synchronous>, transform_indices = @transform_2, window_bounds = array<i64: 64, 32>}, {pipeline_mode = #tpu.pipeline_mode<synchronous>, transform_indices = @transform_3, window_bounds = array<i64: 2, 1, 32>}, {pipeline_mode = #tpu.pipeline_mode<synchronous>, transform_indices = @transform_4, window_bounds = array<i64: 2, 1, 32>}, {pipeline_mode = #tpu.pipeline_mode<synchronous>, transform_indices = @transform_5, window_bounds = array<i64: 2, 4, 32, 8>}, {pipeline_mode = #tpu.pipeline_mode<synchronous>, transform_indices = @transform_6, window_bounds = array<i64: 2, 4, 1, 8>}, {pipeline_mode = #tpu.pipeline_mode<synchronous>, transform_indices = @transform_7, window_bounds = array<i64: 2, 4, 32, 8>}, {pipeline_mode = #tpu.pipeline_mode<synchronous>, transform_indices = @transform_8, window_bounds = array<i64: 2, 4, 1, 8>}, {pipeline_mode = #tpu.pipeline_mode<synchronous>, transform_indices = @transform_9, window_bounds = array<i64: 2, 4, 32, 8>}, {pipeline_mode = #tpu.pipeline_mode<synchronous>, transform_indices = @transform_10, window_bounds = array<i64: 2, 4, 1, 8>}, {pipeline_mode = #tpu.pipeline_mode<synchronous>, transform_indices = @transform_11, window_bounds = array<i64: 2, 4, 8, 32>}, {pipeline_mode = #tpu.pipeline_mode<synchronous>, transform_indices = @transform_12, window_bounds = array<i64: 2, 1, 32>}, {pipeline_mode = #tpu.pipeline_mode<synchronous>, transform_indices = @transform_13, window_bounds = array<i64: 2, 1, 32>}, {pipeline_mode = #tpu.pipeline_mode<synchronous>, transform_indices = @transform_14, window_bounds = array<i64: 2, 1, 32>}, {pipeline_mode = #tpu.pipeline_mode<synchronous>, transform_indices = @transform_15, window_bounds = array<i64: 2, 32, 128>}, {pipeline_mode = #tpu.pipeline_mode<synchronous>, transform_indices = @transform_16, window_bounds = array<i64: 2, 1, 128>}, {pipeline_mode = #tpu.pipeline_mode<synchronous>, transform_indices = @transform_17, window_bounds = array<i64: 2, 128, 32>}, {pipeline_mode = #tpu.pipeline_mode<synchronous>, transform_indices = @transform_18, window_bounds = array<i64: 2, 1, 32>}, {pipeline_mode = #tpu.pipeline_mode<synchronous>, transform_indices = @transform_19, window_bounds = array<i64: 1, 32>}, {pipeline_mode = #tpu.pipeline_mode<synchronous>, transform_indices = @transform_20, window_bounds = array<i64: 1, 32>}, {pipeline_mode = #tpu.pipeline_mode<synchronous>, transform_indices = @transform_21, window_bounds = array<i64: 32, 128>}, {pipeline_mode = #tpu.pipeline_mode<synchronous>, transform_indices = @transform_22, window_bounds = array<i64: 1, 128>}, {transform_indices = @transform_23, window_bounds = array<i64: 1, 1, 128>}]} {
    %c0 = arith.constant 0 : index
    %c0_0 = arith.constant 0 : index
    %c0_1 = arith.constant 0 : index
    %0 = vector.load %arg1[%c0, %c0_0, %c0_1] : memref<1x17x64xbf16, #tpu.memory_space<vmem>>, vector<1x17x64xbf16>
    %1 = vector.shape_cast %0 : vector<1x17x64xbf16> to vector<17x64xbf16>
    %c0_2 = arith.constant 0 : index
    %c0_3 = arith.constant 0 : index
    %2 = vector.load %arg3[%c0_2, %c0_3] : memref<64x32xbf16, #tpu.memory_space<vmem>>, vector<64x32xbf16>
    %cst = arith.constant dense<0.000000e+00> : vector<17x32xf32>
    %3 = tpu.matmul %1, %2, %cst {dimension_numbers = #tpu.dot_dimension_numbers<[1], [0], [0], [1], [0, 0, 1, 1], [], []>} : vector<17x64xbf16>, vector<64x32xbf16>, vector<17x32xf32> -> vector<17x32xf32>
    %c0_4 = arith.constant 0 : index
    %c0_5 = arith.constant 0 : index
    %c0_6 = arith.constant 0 : index
    %4 = vector.load %arg2[%c0_4, %c0_5, %c0_6] : memref<1x17x32xf32, #tpu.memory_space<vmem>>, vector<1x17x32xf32>
    %5 = vector.shape_cast %4 : vector<1x17x32xf32> to vector<17x32xf32>
    %6 = arith.addf %3, %5 : vector<17x32xf32>
    %c0_7 = arith.constant 0 : index
    %c0_8 = arith.constant 0 : index
    %c0_9 = arith.constant 0 : index
    %7 = vector.load %arg4[%c0_7, %c0_8, %c0_9] : memref<2x1x32xf32, #tpu.memory_space<vmem>>, vector<1x1x32xf32>
    %8 = vector.shape_cast %7 : vector<1x1x32xf32> to vector<1x32xf32>
    %c0_10 = arith.constant 0 : index
    %c0_11 = arith.constant 0 : index
    %c0_12 = arith.constant 0 : index
    %9 = vector.load %arg5[%c0_10, %c0_11, %c0_12] : memref<2x1x32xf32, #tpu.memory_space<vmem>>, vector<1x1x32xf32>
    %10 = vector.shape_cast %9 : vector<1x1x32xf32> to vector<1x32xf32>
    %cst_13 = arith.constant dense<0.000000e+00> : vector<17xf32>
    %11 = vector.multi_reduction <add>, %6, %cst_13 [1] : vector<17x32xf32> to vector<17xf32>
    %12 = vector.shape_cast %11 : vector<17xf32> to vector<17x1xf32>
    %cst_14 = arith.constant 3.200000e+01 : f32
    %13 = vector.broadcast %cst_14 : f32 to vector<17x1xf32>
    %14 = arith.divf %12, %13 : vector<17x1xf32>
    %15 = vector.broadcast %14 : vector<17x1xf32> to vector<17x32xf32>
    %16 = arith.subf %6, %15 : vector<17x32xf32>
    %17 = arith.mulf %16, %16 : vector<17x32xf32>
    %cst_15 = arith.constant dense<0.000000e+00> : vector<17xf32>
    %18 = vector.multi_reduction <add>, %17, %cst_15 [1] : vector<17x32xf32> to vector<17xf32>
    %19 = vector.shape_cast %18 : vector<17xf32> to vector<17x1xf32>
    %cst_16 = arith.constant 3.200000e+01 : f32
    %20 = vector.broadcast %cst_16 : f32 to vector<17x1xf32>
    %21 = arith.divf %19, %20 : vector<17x1xf32>
    %22 = vector.broadcast %14 : vector<17x1xf32> to vector<17x32xf32>
    %23 = arith.subf %6, %22 : vector<17x32xf32>
    %cst_17 = arith.constant 9.99999997E-7 : f32
    %24 = vector.broadcast %cst_17 : f32 to vector<17x1xf32>
    %25 = arith.addf %21, %24 : vector<17x1xf32>
    %26 = math.rsqrt %25 : vector<17x1xf32>
    %27 = vector.broadcast %26 : vector<17x1xf32> to vector<17x32xf32>
    %28 = arith.mulf %23, %27 : vector<17x32xf32>
    %29 = vector.broadcast %8 : vector<1x32xf32> to vector<17x32xf32>
    %30 = arith.mulf %28, %29 : vector<17x32xf32>
    %31 = vector.broadcast %10 : vector<1x32xf32> to vector<17x32xf32>
    %32 = arith.addf %30, %31 : vector<17x32xf32>
    %33 = arith.truncf %32 : vector<17x32xf32> to vector<17x32xbf16>
    %cst_18 = arith.constant 0.000000e+00 : f32
    %34 = vector.broadcast %cst_18 : f32 to vector<17x32xf32>
    %c0_19 = arith.constant 0 : index
    %c0_20 = arith.constant 0 : index
    %c0_21 = arith.constant 0 : index
    %c0_22 = arith.constant 0 : index
    %35 = vector.load %arg6[%c0_19, %c0_20, %c0_21, %c0_22] : memref<2x4x32x8xbf16, #tpu.memory_space<vmem>>, vector<1x1x32x8xbf16>
    %36 = vector.shape_cast %35 : vector<1x1x32x8xbf16> to vector<32x8xbf16>
    %cst_23 = arith.constant dense<0.000000e+00> : vector<17x8xf32>
    %37 = tpu.matmul %33, %36, %cst_23 {dimension_numbers = #tpu.dot_dimension_numbers<[1], [0], [0], [1], [0, 0, 1, 1], [], []>} : vector<17x32xbf16>, vector<32x8xbf16>, vector<17x8xf32> -> vector<17x8xf32>
    %c0_24 = arith.constant 0 : index
    %c0_25 = arith.constant 0 : index
    %c0_26 = arith.constant 0 : index
    %c0_27 = arith.constant 0 : index
    %38 = vector.load %arg7[%c0_24, %c0_25, %c0_26, %c0_27] : memref<2x4x1x8xf32, #tpu.memory_space<vmem>>, vector<1x1x1x8xf32>
    %39 = vector.shape_cast %38 : vector<1x1x1x8xf32> to vector<1x8xf32>
    %40 = vector.broadcast %39 : vector<1x8xf32> to vector<17x8xf32>
    %41 = arith.addf %37, %40 : vector<17x8xf32>
    %c0_28 = arith.constant 0 : index
    %c0_29 = arith.constant 0 : index
    %c0_30 = arith.constant 0 : index
    %c0_31 = arith.constant 0 : index
    %42 = vector.load %arg8[%c0_28, %c0_29, %c0_30, %c0_31] : memref<2x4x32x8xbf16, #tpu.memory_space<vmem>>, vector<1x1x32x8xbf16>
    %43 = vector.shape_cast %42 : vector<1x1x32x8xbf16> to vector<32x8xbf16>
    %cst_32 = arith.constant dense<0.000000e+00> : vector<17x8xf32>
    %44 = tpu.matmul %33, %43, %cst_32 {dimension_numbers = #tpu.dot_dimension_numbers<[1], [0], [0], [1], [0, 0, 1, 1], [], []>} : vector<17x32xbf16>, vector<32x8xbf16>, vector<17x8xf32> -> vector<17x8xf32>
    %c0_33 = arith.constant 0 : index
    %c0_34 = arith.constant 0 : index
    %c0_35 = arith.constant 0 : index
    %c0_36 = arith.constant 0 : index
    %45 = vector.load %arg9[%c0_33, %c0_34, %c0_35, %c0_36] : memref<2x4x1x8xf32, #tpu.memory_space<vmem>>, vector<1x1x1x8xf32>
    %46 = vector.shape_cast %45 : vector<1x1x1x8xf32> to vector<1x8xf32>
    %47 = vector.broadcast %46 : vector<1x8xf32> to vector<17x8xf32>
    %48 = arith.addf %44, %47 : vector<17x8xf32>
    %c0_37 = arith.constant 0 : index
    %c0_38 = arith.constant 0 : index
    %c0_39 = arith.constant 0 : index
    %c0_40 = arith.constant 0 : index
    %49 = vector.load %arg10[%c0_37, %c0_38, %c0_39, %c0_40] : memref<2x4x32x8xbf16, #tpu.memory_space<vmem>>, vector<1x1x32x8xbf16>
    %50 = vector.shape_cast %49 : vector<1x1x32x8xbf16> to vector<32x8xbf16>
    %cst_41 = arith.constant dense<0.000000e+00> : vector<17x8xf32>
    %51 = tpu.matmul %33, %50, %cst_41 {dimension_numbers = #tpu.dot_dimension_numbers<[1], [0], [0], [1], [0, 0, 1, 1], [], []>} : vector<17x32xbf16>, vector<32x8xbf16>, vector<17x8xf32> -> vector<17x8xf32>
    %c0_42 = arith.constant 0 : index
    %c0_43 = arith.constant 0 : index
    %c0_44 = arith.constant 0 : index
    %c0_45 = arith.constant 0 : index
    %52 = vector.load %arg11[%c0_42, %c0_43, %c0_44, %c0_45] : memref<2x4x1x8xf32, #tpu.memory_space<vmem>>, vector<1x1x1x8xf32>
    %53 = vector.shape_cast %52 : vector<1x1x1x8xf32> to vector<1x8xf32>
    %54 = vector.broadcast %53 : vector<1x8xf32> to vector<17x8xf32>
    %55 = arith.addf %51, %54 : vector<17x8xf32>
    %56 = arith.truncf %41 : vector<17x8xf32> to vector<17x8xbf16>
    %57 = arith.truncf %48 : vector<17x8xf32> to vector<17x8xbf16>
    %cst_46 = arith.constant dense<0.000000e+00> : vector<17x17xf32>
    %58 = tpu.matmul %56, %57, %cst_46 {dimension_numbers = #tpu.dot_dimension_numbers<[1], [1], [0], [0], [0, 0, 1, 0], [], []>} : vector<17x8xbf16>, vector<17x8xbf16>, vector<17x17xf32> -> vector<17x17xf32>
    %cst_47 = arith.constant 0.353553385 : f32
    %59 = vector.broadcast %cst_47 : f32 to vector<17x17xf32>
    %60 = arith.mulf %58, %59 : vector<17x17xf32>
    %cst_48 = arith.constant dense<0xFF800000> : vector<17xf32>
    %61 = vector.multi_reduction <maximumf>, %60, %cst_48 [1] : vector<17x17xf32> to vector<17xf32>
    %62 = vector.shape_cast %61 : vector<17xf32> to vector<17x1xf32>
    %63 = vector.broadcast %62 : vector<17x1xf32> to vector<17x17xf32>
    %64 = arith.subf %60, %63 : vector<17x17xf32>
    %65 = math.exp %64 : vector<17x17xf32>
    %cst_49 = arith.constant dense<0.000000e+00> : vector<17xf32>
    %66 = vector.multi_reduction <add>, %65, %cst_49 [1] : vector<17x17xf32> to vector<17xf32>
    %67 = vector.shape_cast %66 : vector<17xf32> to vector<17x1xf32>
    %68 = tpu.reciprocal %67 {approx = true} : vector<17x1xf32> -> vector<17x1xf32>
    %69 = vector.broadcast %68 : vector<17x1xf32> to vector<17x17xf32>
    %70 = arith.mulf %65, %69 : vector<17x17xf32>
    %71 = arith.truncf %70 : vector<17x17xf32> to vector<17x17xbf16>
    %72 = arith.truncf %55 : vector<17x8xf32> to vector<17x8xbf16>
    %cst_50 = arith.constant dense<0.000000e+00> : vector<17x8xf32>
    %73 = tpu.matmul %71, %72, %cst_50 {dimension_numbers = #tpu.dot_dimension_numbers<[1], [0], [0], [1], [0, 0, 1, 1], [], []>} : vector<17x17xbf16>, vector<17x8xbf16>, vector<17x8xf32> -> vector<17x8xf32>
    %74 = arith.truncf %73 : vector<17x8xf32> to vector<17x8xbf16>
    %c0_51 = arith.constant 0 : index
    %c0_52 = arith.constant 0 : index
    %c0_53 = arith.constant 0 : index
    %c0_54 = arith.constant 0 : index
    %75 = vector.load %arg12[%c0_51, %c0_52, %c0_53, %c0_54] : memref<2x4x8x32xbf16, #tpu.memory_space<vmem>>, vector<1x1x8x32xbf16>
    %76 = vector.shape_cast %75 : vector<1x1x8x32xbf16> to vector<8x32xbf16>
    %cst_55 = arith.constant dense<0.000000e+00> : vector<17x32xf32>
    %77 = tpu.matmul %74, %76, %cst_55 {dimension_numbers = #tpu.dot_dimension_numbers<[1], [0], [0], [1], [0, 0, 1, 1], [], []>} : vector<17x8xbf16>, vector<8x32xbf16>, vector<17x32xf32> -> vector<17x32xf32>
    %78 = arith.addf %34, %77 : vector<17x32xf32>
    %c0_56 = arith.constant 0 : index
    %c1 = arith.constant 1 : index
    %c0_57 = arith.constant 0 : index
    %c0_58 = arith.constant 0 : index
    %79 = vector.load %arg6[%c0_56, %c1, %c0_57, %c0_58] : memref<2x4x32x8xbf16, #tpu.memory_space<vmem>>, vector<1x1x32x8xbf16>
    %80 = vector.shape_cast %79 : vector<1x1x32x8xbf16> to vector<32x8xbf16>
    %cst_59 = arith.constant dense<0.000000e+00> : vector<17x8xf32>
    %81 = tpu.matmul %33, %80, %cst_59 {dimension_numbers = #tpu.dot_dimension_numbers<[1], [0], [0], [1], [0, 0, 1, 1], [], []>} : vector<17x32xbf16>, vector<32x8xbf16>, vector<17x8xf32> -> vector<17x8xf32>
    %c0_60 = arith.constant 0 : index
    %c1_61 = arith.constant 1 : index
    %c0_62 = arith.constant 0 : index
    %c0_63 = arith.constant 0 : index
    %82 = vector.load %arg7[%c0_60, %c1_61, %c0_62, %c0_63] : memref<2x4x1x8xf32, #tpu.memory_space<vmem>>, vector<1x1x1x8xf32>
    %83 = vector.shape_cast %82 : vector<1x1x1x8xf32> to vector<1x8xf32>
    %84 = vector.broadcast %83 : vector<1x8xf32> to vector<17x8xf32>
    %85 = arith.addf %81, %84 : vector<17x8xf32>
    %c0_64 = arith.constant 0 : index
    %c1_65 = arith.constant 1 : index
    %c0_66 = arith.constant 0 : index
    %c0_67 = arith.constant 0 : index
    %86 = vector.load %arg8[%c0_64, %c1_65, %c0_66, %c0_67] : memref<2x4x32x8xbf16, #tpu.memory_space<vmem>>, vector<1x1x32x8xbf16>
    %87 = vector.shape_cast %86 : vector<1x1x32x8xbf16> to vector<32x8xbf16>
    %cst_68 = arith.constant dense<0.000000e+00> : vector<17x8xf32>
    %88 = tpu.matmul %33, %87, %cst_68 {dimension_numbers = #tpu.dot_dimension_numbers<[1], [0], [0], [1], [0, 0, 1, 1], [], []>} : vector<17x32xbf16>, vector<32x8xbf16>, vector<17x8xf32> -> vector<17x8xf32>
    %c0_69 = arith.constant 0 : index
    %c1_70 = arith.constant 1 : index
    %c0_71 = arith.constant 0 : index
    %c0_72 = arith.constant 0 : index
    %89 = vector.load %arg9[%c0_69, %c1_70, %c0_71, %c0_72] : memref<2x4x1x8xf32, #tpu.memory_space<vmem>>, vector<1x1x1x8xf32>
    %90 = vector.shape_cast %89 : vector<1x1x1x8xf32> to vector<1x8xf32>
    %91 = vector.broadcast %90 : vector<1x8xf32> to vector<17x8xf32>
    %92 = arith.addf %88, %91 : vector<17x8xf32>
    %c0_73 = arith.constant 0 : index
    %c1_74 = arith.constant 1 : index
    %c0_75 = arith.constant 0 : index
    %c0_76 = arith.constant 0 : index
    %93 = vector.load %arg10[%c0_73, %c1_74, %c0_75, %c0_76] : memref<2x4x32x8xbf16, #tpu.memory_space<vmem>>, vector<1x1x32x8xbf16>
    %94 = vector.shape_cast %93 : vector<1x1x32x8xbf16> to vector<32x8xbf16>
    %cst_77 = arith.constant dense<0.000000e+00> : vector<17x8xf32>
    %95 = tpu.matmul %33, %94, %cst_77 {dimension_numbers = #tpu.dot_dimension_numbers<[1], [0], [0], [1], [0, 0, 1, 1], [], []>} : vector<17x32xbf16>, vector<32x8xbf16>, vector<17x8xf32> -> vector<17x8xf32>
    %c0_78 = arith.constant 0 : index
    %c1_79 = arith.constant 1 : index
    %c0_80 = arith.constant 0 : index
    %c0_81 = arith.constant 0 : index
    %96 = vector.load %arg11[%c0_78, %c1_79, %c0_80, %c0_81] : memref<2x4x1x8xf32, #tpu.memory_space<vmem>>, vector<1x1x1x8xf32>
    %97 = vector.shape_cast %96 : vector<1x1x1x8xf32> to vector<1x8xf32>
    %98 = vector.broadcast %97 : vector<1x8xf32> to vector<17x8xf32>
    %99 = arith.addf %95, %98 : vector<17x8xf32>
    %100 = arith.truncf %85 : vector<17x8xf32> to vector<17x8xbf16>
    %101 = arith.truncf %92 : vector<17x8xf32> to vector<17x8xbf16>
    %cst_82 = arith.constant dense<0.000000e+00> : vector<17x17xf32>
    %102 = tpu.matmul %100, %101, %cst_82 {dimension_numbers = #tpu.dot_dimension_numbers<[1], [1], [0], [0], [0, 0, 1, 0], [], []>} : vector<17x8xbf16>, vector<17x8xbf16>, vector<17x17xf32> -> vector<17x17xf32>
    %cst_83 = arith.constant 0.353553385 : f32
    %103 = vector.broadcast %cst_83 : f32 to vector<17x17xf32>
    %104 = arith.mulf %102, %103 : vector<17x17xf32>
    %cst_84 = arith.constant dense<0xFF800000> : vector<17xf32>
    %105 = vector.multi_reduction <maximumf>, %104, %cst_84 [1] : vector<17x17xf32> to vector<17xf32>
    %106 = vector.shape_cast %105 : vector<17xf32> to vector<17x1xf32>
    %107 = vector.broadcast %106 : vector<17x1xf32> to vector<17x17xf32>
    %108 = arith.subf %104, %107 : vector<17x17xf32>
    %109 = math.exp %108 : vector<17x17xf32>
    %cst_85 = arith.constant dense<0.000000e+00> : vector<17xf32>
    %110 = vector.multi_reduction <add>, %109, %cst_85 [1] : vector<17x17xf32> to vector<17xf32>
    %111 = vector.shape_cast %110 : vector<17xf32> to vector<17x1xf32>
    %112 = tpu.reciprocal %111 {approx = true} : vector<17x1xf32> -> vector<17x1xf32>
    %113 = vector.broadcast %112 : vector<17x1xf32> to vector<17x17xf32>
    %114 = arith.mulf %109, %113 : vector<17x17xf32>
    %115 = arith.truncf %114 : vector<17x17xf32> to vector<17x17xbf16>
    %116 = arith.truncf %99 : vector<17x8xf32> to vector<17x8xbf16>
    %cst_86 = arith.constant dense<0.000000e+00> : vector<17x8xf32>
    %117 = tpu.matmul %115, %116, %cst_86 {dimension_numbers = #tpu.dot_dimension_numbers<[1], [0], [0], [1], [0, 0, 1, 1], [], []>} : vector<17x17xbf16>, vector<17x8xbf16>, vector<17x8xf32> -> vector<17x8xf32>
    %118 = arith.truncf %117 : vector<17x8xf32> to vector<17x8xbf16>
    %c0_87 = arith.constant 0 : index
    %c1_88 = arith.constant 1 : index
    %c0_89 = arith.constant 0 : index
    %c0_90 = arith.constant 0 : index
    %119 = vector.load %arg12[%c0_87, %c1_88, %c0_89, %c0_90] : memref<2x4x8x32xbf16, #tpu.memory_space<vmem>>, vector<1x1x8x32xbf16>
    %120 = vector.shape_cast %119 : vector<1x1x8x32xbf16> to vector<8x32xbf16>
    %cst_91 = arith.constant dense<0.000000e+00> : vector<17x32xf32>
    %121 = tpu.matmul %118, %120, %cst_91 {dimension_numbers = #tpu.dot_dimension_numbers<[1], [0], [0], [1], [0, 0, 1, 1], [], []>} : vector<17x8xbf16>, vector<8x32xbf16>, vector<17x32xf32> -> vector<17x32xf32>
    %122 = arith.addf %78, %121 : vector<17x32xf32>
    %c0_92 = arith.constant 0 : index
    %c2 = arith.constant 2 : index
    %c0_93 = arith.constant 0 : index
    %c0_94 = arith.constant 0 : index
    %123 = vector.load %arg6[%c0_92, %c2, %c0_93, %c0_94] : memref<2x4x32x8xbf16, #tpu.memory_space<vmem>>, vector<1x1x32x8xbf16>
    %124 = vector.shape_cast %123 : vector<1x1x32x8xbf16> to vector<32x8xbf16>
    %cst_95 = arith.constant dense<0.000000e+00> : vector<17x8xf32>
    %125 = tpu.matmul %33, %124, %cst_95 {dimension_numbers = #tpu.dot_dimension_numbers<[1], [0], [0], [1], [0, 0, 1, 1], [], []>} : vector<17x32xbf16>, vector<32x8xbf16>, vector<17x8xf32> -> vector<17x8xf32>
    %c0_96 = arith.constant 0 : index
    %c2_97 = arith.constant 2 : index
    %c0_98 = arith.constant 0 : index
    %c0_99 = arith.constant 0 : index
    %126 = vector.load %arg7[%c0_96, %c2_97, %c0_98, %c0_99] : memref<2x4x1x8xf32, #tpu.memory_space<vmem>>, vector<1x1x1x8xf32>
    %127 = vector.shape_cast %126 : vector<1x1x1x8xf32> to vector<1x8xf32>
    %128 = vector.broadcast %127 : vector<1x8xf32> to vector<17x8xf32>
    %129 = arith.addf %125, %128 : vector<17x8xf32>
    %c0_100 = arith.constant 0 : index
    %c2_101 = arith.constant 2 : index
    %c0_102 = arith.constant 0 : index
    %c0_103 = arith.constant 0 : index
    %130 = vector.load %arg8[%c0_100, %c2_101, %c0_102, %c0_103] : memref<2x4x32x8xbf16, #tpu.memory_space<vmem>>, vector<1x1x32x8xbf16>
    %131 = vector.shape_cast %130 : vector<1x1x32x8xbf16> to vector<32x8xbf16>
    %cst_104 = arith.constant dense<0.000000e+00> : vector<17x8xf32>
    %132 = tpu.matmul %33, %131, %cst_104 {dimension_numbers = #tpu.dot_dimension_numbers<[1], [0], [0], [1], [0, 0, 1, 1], [], []>} : vector<17x32xbf16>, vector<32x8xbf16>, vector<17x8xf32> -> vector<17x8xf32>
    %c0_105 = arith.constant 0 : index
    %c2_106 = arith.constant 2 : index
    %c0_107 = arith.constant 0 : index
    %c0_108 = arith.constant 0 : index
    %133 = vector.load %arg9[%c0_105, %c2_106, %c0_107, %c0_108] : memref<2x4x1x8xf32, #tpu.memory_space<vmem>>, vector<1x1x1x8xf32>
    %134 = vector.shape_cast %133 : vector<1x1x1x8xf32> to vector<1x8xf32>
    %135 = vector.broadcast %134 : vector<1x8xf32> to vector<17x8xf32>
    %136 = arith.addf %132, %135 : vector<17x8xf32>
    %c0_109 = arith.constant 0 : index
    %c2_110 = arith.constant 2 : index
    %c0_111 = arith.constant 0 : index
    %c0_112 = arith.constant 0 : index
    %137 = vector.load %arg10[%c0_109, %c2_110, %c0_111, %c0_112] : memref<2x4x32x8xbf16, #tpu.memory_space<vmem>>, vector<1x1x32x8xbf16>
    %138 = vector.shape_cast %137 : vector<1x1x32x8xbf16> to vector<32x8xbf16>
    %cst_113 = arith.constant dense<0.000000e+00> : vector<17x8xf32>
    %139 = tpu.matmul %33, %138, %cst_113 {dimension_numbers = #tpu.dot_dimension_numbers<[1], [0], [0], [1], [0, 0, 1, 1], [], []>} : vector<17x32xbf16>, vector<32x8xbf16>, vector<17x8xf32> -> vector<17x8xf32>
    %c0_114 = arith.constant 0 : index
    %c2_115 = arith.constant 2 : index
    %c0_116 = arith.constant 0 : index
    %c0_117 = arith.constant 0 : index
    %140 = vector.load %arg11[%c0_114, %c2_115, %c0_116, %c0_117] : memref<2x4x1x8xf32, #tpu.memory_space<vmem>>, vector<1x1x1x8xf32>
    %141 = vector.shape_cast %140 : vector<1x1x1x8xf32> to vector<1x8xf32>
    %142 = vector.broadcast %141 : vector<1x8xf32> to vector<17x8xf32>
    %143 = arith.addf %139, %142 : vector<17x8xf32>
    %144 = arith.truncf %129 : vector<17x8xf32> to vector<17x8xbf16>
    %145 = arith.truncf %136 : vector<17x8xf32> to vector<17x8xbf16>
    %cst_118 = arith.constant dense<0.000000e+00> : vector<17x17xf32>
    %146 = tpu.matmul %144, %145, %cst_118 {dimension_numbers = #tpu.dot_dimension_numbers<[1], [1], [0], [0], [0, 0, 1, 0], [], []>} : vector<17x8xbf16>, vector<17x8xbf16>, vector<17x17xf32> -> vector<17x17xf32>
    %cst_119 = arith.constant 0.353553385 : f32
    %147 = vector.broadcast %cst_119 : f32 to vector<17x17xf32>
    %148 = arith.mulf %146, %147 : vector<17x17xf32>
    %cst_120 = arith.constant dense<0xFF800000> : vector<17xf32>
    %149 = vector.multi_reduction <maximumf>, %148, %cst_120 [1] : vector<17x17xf32> to vector<17xf32>
    %150 = vector.shape_cast %149 : vector<17xf32> to vector<17x1xf32>
    %151 = vector.broadcast %150 : vector<17x1xf32> to vector<17x17xf32>
    %152 = arith.subf %148, %151 : vector<17x17xf32>
    %153 = math.exp %152 : vector<17x17xf32>
    %cst_121 = arith.constant dense<0.000000e+00> : vector<17xf32>
    %154 = vector.multi_reduction <add>, %153, %cst_121 [1] : vector<17x17xf32> to vector<17xf32>
    %155 = vector.shape_cast %154 : vector<17xf32> to vector<17x1xf32>
    %156 = tpu.reciprocal %155 {approx = true} : vector<17x1xf32> -> vector<17x1xf32>
    %157 = vector.broadcast %156 : vector<17x1xf32> to vector<17x17xf32>
    %158 = arith.mulf %153, %157 : vector<17x17xf32>
    %159 = arith.truncf %158 : vector<17x17xf32> to vector<17x17xbf16>
    %160 = arith.truncf %143 : vector<17x8xf32> to vector<17x8xbf16>
    %cst_122 = arith.constant dense<0.000000e+00> : vector<17x8xf32>
    %161 = tpu.matmul %159, %160, %cst_122 {dimension_numbers = #tpu.dot_dimension_numbers<[1], [0], [0], [1], [0, 0, 1, 1], [], []>} : vector<17x17xbf16>, vector<17x8xbf16>, vector<17x8xf32> -> vector<17x8xf32>
    %162 = arith.truncf %161 : vector<17x8xf32> to vector<17x8xbf16>
    %c0_123 = arith.constant 0 : index
    %c2_124 = arith.constant 2 : index
    %c0_125 = arith.constant 0 : index
    %c0_126 = arith.constant 0 : index
    %163 = vector.load %arg12[%c0_123, %c2_124, %c0_125, %c0_126] : memref<2x4x8x32xbf16, #tpu.memory_space<vmem>>, vector<1x1x8x32xbf16>
    %164 = vector.shape_cast %163 : vector<1x1x8x32xbf16> to vector<8x32xbf16>
    %cst_127 = arith.constant dense<0.000000e+00> : vector<17x32xf32>
    %165 = tpu.matmul %162, %164, %cst_127 {dimension_numbers = #tpu.dot_dimension_numbers<[1], [0], [0], [1], [0, 0, 1, 1], [], []>} : vector<17x8xbf16>, vector<8x32xbf16>, vector<17x32xf32> -> vector<17x32xf32>
    %166 = arith.addf %122, %165 : vector<17x32xf32>
    %c0_128 = arith.constant 0 : index
    %c3 = arith.constant 3 : index
    %c0_129 = arith.constant 0 : index
    %c0_130 = arith.constant 0 : index
    %167 = vector.load %arg6[%c0_128, %c3, %c0_129, %c0_130] : memref<2x4x32x8xbf16, #tpu.memory_space<vmem>>, vector<1x1x32x8xbf16>
    %168 = vector.shape_cast %167 : vector<1x1x32x8xbf16> to vector<32x8xbf16>
    %cst_131 = arith.constant dense<0.000000e+00> : vector<17x8xf32>
    %169 = tpu.matmul %33, %168, %cst_131 {dimension_numbers = #tpu.dot_dimension_numbers<[1], [0], [0], [1], [0, 0, 1, 1], [], []>} : vector<17x32xbf16>, vector<32x8xbf16>, vector<17x8xf32> -> vector<17x8xf32>
    %c0_132 = arith.constant 0 : index
    %c3_133 = arith.constant 3 : index
    %c0_134 = arith.constant 0 : index
    %c0_135 = arith.constant 0 : index
    %170 = vector.load %arg7[%c0_132, %c3_133, %c0_134, %c0_135] : memref<2x4x1x8xf32, #tpu.memory_space<vmem>>, vector<1x1x1x8xf32>
    %171 = vector.shape_cast %170 : vector<1x1x1x8xf32> to vector<1x8xf32>
    %172 = vector.broadcast %171 : vector<1x8xf32> to vector<17x8xf32>
    %173 = arith.addf %169, %172 : vector<17x8xf32>
    %c0_136 = arith.constant 0 : index
    %c3_137 = arith.constant 3 : index
    %c0_138 = arith.constant 0 : index
    %c0_139 = arith.constant 0 : index
    %174 = vector.load %arg8[%c0_136, %c3_137, %c0_138, %c0_139] : memref<2x4x32x8xbf16, #tpu.memory_space<vmem>>, vector<1x1x32x8xbf16>
    %175 = vector.shape_cast %174 : vector<1x1x32x8xbf16> to vector<32x8xbf16>
    %cst_140 = arith.constant dense<0.000000e+00> : vector<17x8xf32>
    %176 = tpu.matmul %33, %175, %cst_140 {dimension_numbers = #tpu.dot_dimension_numbers<[1], [0], [0], [1], [0, 0, 1, 1], [], []>} : vector<17x32xbf16>, vector<32x8xbf16>, vector<17x8xf32> -> vector<17x8xf32>
    %c0_141 = arith.constant 0 : index
    %c3_142 = arith.constant 3 : index
    %c0_143 = arith.constant 0 : index
    %c0_144 = arith.constant 0 : index
    %177 = vector.load %arg9[%c0_141, %c3_142, %c0_143, %c0_144] : memref<2x4x1x8xf32, #tpu.memory_space<vmem>>, vector<1x1x1x8xf32>
    %178 = vector.shape_cast %177 : vector<1x1x1x8xf32> to vector<1x8xf32>
    %179 = vector.broadcast %178 : vector<1x8xf32> to vector<17x8xf32>
    %180 = arith.addf %176, %179 : vector<17x8xf32>
    %c0_145 = arith.constant 0 : index
    %c3_146 = arith.constant 3 : index
    %c0_147 = arith.constant 0 : index
    %c0_148 = arith.constant 0 : index
    %181 = vector.load %arg10[%c0_145, %c3_146, %c0_147, %c0_148] : memref<2x4x32x8xbf16, #tpu.memory_space<vmem>>, vector<1x1x32x8xbf16>
    %182 = vector.shape_cast %181 : vector<1x1x32x8xbf16> to vector<32x8xbf16>
    %cst_149 = arith.constant dense<0.000000e+00> : vector<17x8xf32>
    %183 = tpu.matmul %33, %182, %cst_149 {dimension_numbers = #tpu.dot_dimension_numbers<[1], [0], [0], [1], [0, 0, 1, 1], [], []>} : vector<17x32xbf16>, vector<32x8xbf16>, vector<17x8xf32> -> vector<17x8xf32>
    %c0_150 = arith.constant 0 : index
    %c3_151 = arith.constant 3 : index
    %c0_152 = arith.constant 0 : index
    %c0_153 = arith.constant 0 : index
    %184 = vector.load %arg11[%c0_150, %c3_151, %c0_152, %c0_153] : memref<2x4x1x8xf32, #tpu.memory_space<vmem>>, vector<1x1x1x8xf32>
    %185 = vector.shape_cast %184 : vector<1x1x1x8xf32> to vector<1x8xf32>
    %186 = vector.broadcast %185 : vector<1x8xf32> to vector<17x8xf32>
    %187 = arith.addf %183, %186 : vector<17x8xf32>
    %188 = arith.truncf %173 : vector<17x8xf32> to vector<17x8xbf16>
    %189 = arith.truncf %180 : vector<17x8xf32> to vector<17x8xbf16>
    %cst_154 = arith.constant dense<0.000000e+00> : vector<17x17xf32>
    %190 = tpu.matmul %188, %189, %cst_154 {dimension_numbers = #tpu.dot_dimension_numbers<[1], [1], [0], [0], [0, 0, 1, 0], [], []>} : vector<17x8xbf16>, vector<17x8xbf16>, vector<17x17xf32> -> vector<17x17xf32>
    %cst_155 = arith.constant 0.353553385 : f32
    %191 = vector.broadcast %cst_155 : f32 to vector<17x17xf32>
    %192 = arith.mulf %190, %191 : vector<17x17xf32>
    %cst_156 = arith.constant dense<0xFF800000> : vector<17xf32>
    %193 = vector.multi_reduction <maximumf>, %192, %cst_156 [1] : vector<17x17xf32> to vector<17xf32>
    %194 = vector.shape_cast %193 : vector<17xf32> to vector<17x1xf32>
    %195 = vector.broadcast %194 : vector<17x1xf32> to vector<17x17xf32>
    %196 = arith.subf %192, %195 : vector<17x17xf32>
    %197 = math.exp %196 : vector<17x17xf32>
    %cst_157 = arith.constant dense<0.000000e+00> : vector<17xf32>
    %198 = vector.multi_reduction <add>, %197, %cst_157 [1] : vector<17x17xf32> to vector<17xf32>
    %199 = vector.shape_cast %198 : vector<17xf32> to vector<17x1xf32>
    %200 = tpu.reciprocal %199 {approx = true} : vector<17x1xf32> -> vector<17x1xf32>
    %201 = vector.broadcast %200 : vector<17x1xf32> to vector<17x17xf32>
    %202 = arith.mulf %197, %201 : vector<17x17xf32>
    %203 = arith.truncf %202 : vector<17x17xf32> to vector<17x17xbf16>
    %204 = arith.truncf %187 : vector<17x8xf32> to vector<17x8xbf16>
    %cst_158 = arith.constant dense<0.000000e+00> : vector<17x8xf32>
    %205 = tpu.matmul %203, %204, %cst_158 {dimension_numbers = #tpu.dot_dimension_numbers<[1], [0], [0], [1], [0, 0, 1, 1], [], []>} : vector<17x17xbf16>, vector<17x8xbf16>, vector<17x8xf32> -> vector<17x8xf32>
    %206 = arith.truncf %205 : vector<17x8xf32> to vector<17x8xbf16>
    %c0_159 = arith.constant 0 : index
    %c3_160 = arith.constant 3 : index
    %c0_161 = arith.constant 0 : index
    %c0_162 = arith.constant 0 : index
    %207 = vector.load %arg12[%c0_159, %c3_160, %c0_161, %c0_162] : memref<2x4x8x32xbf16, #tpu.memory_space<vmem>>, vector<1x1x8x32xbf16>
    %208 = vector.shape_cast %207 : vector<1x1x8x32xbf16> to vector<8x32xbf16>
    %cst_163 = arith.constant dense<0.000000e+00> : vector<17x32xf32>
    %209 = tpu.matmul %206, %208, %cst_163 {dimension_numbers = #tpu.dot_dimension_numbers<[1], [0], [0], [1], [0, 0, 1, 1], [], []>} : vector<17x8xbf16>, vector<8x32xbf16>, vector<17x32xf32> -> vector<17x32xf32>
    %210 = arith.addf %166, %209 : vector<17x32xf32>
    %211 = arith.addf %6, %210 : vector<17x32xf32>
    %c0_164 = arith.constant 0 : index
    %c0_165 = arith.constant 0 : index
    %c0_166 = arith.constant 0 : index
    %212 = vector.load %arg13[%c0_164, %c0_165, %c0_166] : memref<2x1x32xf32, #tpu.memory_space<vmem>>, vector<1x1x32xf32>
    %213 = vector.shape_cast %212 : vector<1x1x32xf32> to vector<1x32xf32>
    %214 = vector.broadcast %213 : vector<1x32xf32> to vector<17x32xf32>
    %215 = arith.addf %211, %214 : vector<17x32xf32>
    %c0_167 = arith.constant 0 : index
    %c0_168 = arith.constant 0 : index
    %c0_169 = arith.constant 0 : index
    %216 = vector.load %arg14[%c0_167, %c0_168, %c0_169] : memref<2x1x32xf32, #tpu.memory_space<vmem>>, vector<1x1x32xf32>
    %217 = vector.shape_cast %216 : vector<1x1x32xf32> to vector<1x32xf32>
    %c0_170 = arith.constant 0 : index
    %c0_171 = arith.constant 0 : index
    %c0_172 = arith.constant 0 : index
    %218 = vector.load %arg15[%c0_170, %c0_171, %c0_172] : memref<2x1x32xf32, #tpu.memory_space<vmem>>, vector<1x1x32xf32>
    %219 = vector.shape_cast %218 : vector<1x1x32xf32> to vector<1x32xf32>
    %cst_173 = arith.constant dense<0.000000e+00> : vector<17xf32>
    %220 = vector.multi_reduction <add>, %215, %cst_173 [1] : vector<17x32xf32> to vector<17xf32>
    %221 = vector.shape_cast %220 : vector<17xf32> to vector<17x1xf32>
    %cst_174 = arith.constant 3.200000e+01 : f32
    %222 = vector.broadcast %cst_174 : f32 to vector<17x1xf32>
    %223 = arith.divf %221, %222 : vector<17x1xf32>
    %224 = vector.broadcast %223 : vector<17x1xf32> to vector<17x32xf32>
    %225 = arith.subf %215, %224 : vector<17x32xf32>
    %226 = arith.mulf %225, %225 : vector<17x32xf32>
    %cst_175 = arith.constant dense<0.000000e+00> : vector<17xf32>
    %227 = vector.multi_reduction <add>, %226, %cst_175 [1] : vector<17x32xf32> to vector<17xf32>
    %228 = vector.shape_cast %227 : vector<17xf32> to vector<17x1xf32>
    %cst_176 = arith.constant 3.200000e+01 : f32
    %229 = vector.broadcast %cst_176 : f32 to vector<17x1xf32>
    %230 = arith.divf %228, %229 : vector<17x1xf32>
    %231 = vector.broadcast %223 : vector<17x1xf32> to vector<17x32xf32>
    %232 = arith.subf %215, %231 : vector<17x32xf32>
    %cst_177 = arith.constant 9.99999997E-7 : f32
    %233 = vector.broadcast %cst_177 : f32 to vector<17x1xf32>
    %234 = arith.addf %230, %233 : vector<17x1xf32>
    %235 = math.rsqrt %234 : vector<17x1xf32>
    %236 = vector.broadcast %235 : vector<17x1xf32> to vector<17x32xf32>
    %237 = arith.mulf %232, %236 : vector<17x32xf32>
    %238 = vector.broadcast %217 : vector<1x32xf32> to vector<17x32xf32>
    %239 = arith.mulf %237, %238 : vector<17x32xf32>
    %240 = vector.broadcast %219 : vector<1x32xf32> to vector<17x32xf32>
    %241 = arith.addf %239, %240 : vector<17x32xf32>
    %242 = arith.truncf %241 : vector<17x32xf32> to vector<17x32xbf16>
    %c0_178 = arith.constant 0 : index
    %c0_179 = arith.constant 0 : index
    %c0_180 = arith.constant 0 : index
    %243 = vector.load %arg16[%c0_178, %c0_179, %c0_180] : memref<2x32x128xbf16, #tpu.memory_space<vmem>>, vector<1x32x128xbf16>
    %244 = vector.shape_cast %243 : vector<1x32x128xbf16> to vector<32x128xbf16>
    %cst_181 = arith.constant dense<0.000000e+00> : vector<17x128xf32>
    %245 = tpu.matmul %242, %244, %cst_181 {dimension_numbers = #tpu.dot_dimension_numbers<[1], [0], [0], [1], [0, 0, 1, 1], [], []>} : vector<17x32xbf16>, vector<32x128xbf16>, vector<17x128xf32> -> vector<17x128xf32>
    %c0_182 = arith.constant 0 : index
    %c0_183 = arith.constant 0 : index
    %c0_184 = arith.constant 0 : index
    %246 = vector.load %arg17[%c0_182, %c0_183, %c0_184] : memref<2x1x128xf32, #tpu.memory_space<vmem>>, vector<1x1x128xf32>
    %247 = vector.shape_cast %246 : vector<1x1x128xf32> to vector<1x128xf32>
    %248 = vector.broadcast %247 : vector<1x128xf32> to vector<17x128xf32>
    %249 = arith.addf %245, %248 : vector<17x128xf32>
    %250 = arith.mulf %249, %249 : vector<17x128xf32>
    %251 = arith.mulf %249, %250 : vector<17x128xf32>
    %cst_185 = arith.constant 4.471500e-02 : f32
    %252 = vector.broadcast %cst_185 : f32 to vector<17x128xf32>
    %253 = arith.mulf %252, %251 : vector<17x128xf32>
    %254 = arith.addf %249, %253 : vector<17x128xf32>
    %cst_186 = arith.constant 0.797884583 : f32
    %255 = vector.broadcast %cst_186 : f32 to vector<17x128xf32>
    %256 = arith.mulf %255, %254 : vector<17x128xf32>
    %257 = math.tanh %256 : vector<17x128xf32>
    %cst_187 = arith.constant 1.000000e+00 : f32
    %258 = vector.broadcast %cst_187 : f32 to vector<17x128xf32>
    %259 = arith.addf %258, %257 : vector<17x128xf32>
    %cst_188 = arith.constant 5.000000e-01 : f32
    %260 = vector.broadcast %cst_188 : f32 to vector<17x128xf32>
    %261 = arith.mulf %260, %259 : vector<17x128xf32>
    %262 = arith.mulf %249, %261 : vector<17x128xf32>
    %263 = arith.truncf %262 : vector<17x128xf32> to vector<17x128xbf16>
    %c0_189 = arith.constant 0 : index
    %c0_190 = arith.constant 0 : index
    %c0_191 = arith.constant 0 : index
    %264 = vector.load %arg18[%c0_189, %c0_190, %c0_191] : memref<2x128x32xbf16, #tpu.memory_space<vmem>>, vector<1x128x32xbf16>
    %265 = vector.shape_cast %264 : vector<1x128x32xbf16> to vector<128x32xbf16>
    %cst_192 = arith.constant dense<0.000000e+00> : vector<17x32xf32>
    %266 = tpu.matmul %263, %265, %cst_192 {dimension_numbers = #tpu.dot_dimension_numbers<[1], [0], [0], [1], [0, 0, 1, 1], [], []>} : vector<17x128xbf16>, vector<128x32xbf16>, vector<17x32xf32> -> vector<17x32xf32>
    %c0_193 = arith.constant 0 : index
    %c0_194 = arith.constant 0 : index
    %c0_195 = arith.constant 0 : index
    %267 = vector.load %arg19[%c0_193, %c0_194, %c0_195] : memref<2x1x32xf32, #tpu.memory_space<vmem>>, vector<1x1x32xf32>
    %268 = vector.shape_cast %267 : vector<1x1x32xf32> to vector<1x32xf32>
    %269 = vector.broadcast %268 : vector<1x32xf32> to vector<17x32xf32>
    %270 = arith.addf %266, %269 : vector<17x32xf32>
    %271 = arith.addf %215, %270 : vector<17x32xf32>
    %c1_196 = arith.constant 1 : index
    %c0_197 = arith.constant 0 : index
    %c0_198 = arith.constant 0 : index
    %272 = vector.load %arg4[%c1_196, %c0_197, %c0_198] : memref<2x1x32xf32, #tpu.memory_space<vmem>>, vector<1x1x32xf32>
    %273 = vector.shape_cast %272 : vector<1x1x32xf32> to vector<1x32xf32>
    %c1_199 = arith.constant 1 : index
    %c0_200 = arith.constant 0 : index
    %c0_201 = arith.constant 0 : index
    %274 = vector.load %arg5[%c1_199, %c0_200, %c0_201] : memref<2x1x32xf32, #tpu.memory_space<vmem>>, vector<1x1x32xf32>
    %275 = vector.shape_cast %274 : vector<1x1x32xf32> to vector<1x32xf32>
    %cst_202 = arith.constant dense<0.000000e+00> : vector<17xf32>
    %276 = vector.multi_reduction <add>, %271, %cst_202 [1] : vector<17x32xf32> to vector<17xf32>
    %277 = vector.shape_cast %276 : vector<17xf32> to vector<17x1xf32>
    %cst_203 = arith.constant 3.200000e+01 : f32
    %278 = vector.broadcast %cst_203 : f32 to vector<17x1xf32>
    %279 = arith.divf %277, %278 : vector<17x1xf32>
    %280 = vector.broadcast %279 : vector<17x1xf32> to vector<17x32xf32>
    %281 = arith.subf %271, %280 : vector<17x32xf32>
    %282 = arith.mulf %281, %281 : vector<17x32xf32>
    %cst_204 = arith.constant dense<0.000000e+00> : vector<17xf32>
    %283 = vector.multi_reduction <add>, %282, %cst_204 [1] : vector<17x32xf32> to vector<17xf32>
    %284 = vector.shape_cast %283 : vector<17xf32> to vector<17x1xf32>
    %cst_205 = arith.constant 3.200000e+01 : f32
    %285 = vector.broadcast %cst_205 : f32 to vector<17x1xf32>
    %286 = arith.divf %284, %285 : vector<17x1xf32>
    %287 = vector.broadcast %279 : vector<17x1xf32> to vector<17x32xf32>
    %288 = arith.subf %271, %287 : vector<17x32xf32>
    %cst_206 = arith.constant 9.99999997E-7 : f32
    %289 = vector.broadcast %cst_206 : f32 to vector<17x1xf32>
    %290 = arith.addf %286, %289 : vector<17x1xf32>
    %291 = math.rsqrt %290 : vector<17x1xf32>
    %292 = vector.broadcast %291 : vector<17x1xf32> to vector<17x32xf32>
    %293 = arith.mulf %288, %292 : vector<17x32xf32>
    %294 = vector.broadcast %273 : vector<1x32xf32> to vector<17x32xf32>
    %295 = arith.mulf %293, %294 : vector<17x32xf32>
    %296 = vector.broadcast %275 : vector<1x32xf32> to vector<17x32xf32>
    %297 = arith.addf %295, %296 : vector<17x32xf32>
    %298 = arith.truncf %297 : vector<17x32xf32> to vector<17x32xbf16>
    %cst_207 = arith.constant 0.000000e+00 : f32
    %299 = vector.broadcast %cst_207 : f32 to vector<17x32xf32>
    %c1_208 = arith.constant 1 : index
    %c0_209 = arith.constant 0 : index
    %c0_210 = arith.constant 0 : index
    %c0_211 = arith.constant 0 : index
    %300 = vector.load %arg6[%c1_208, %c0_209, %c0_210, %c0_211] : memref<2x4x32x8xbf16, #tpu.memory_space<vmem>>, vector<1x1x32x8xbf16>
    %301 = vector.shape_cast %300 : vector<1x1x32x8xbf16> to vector<32x8xbf16>
    %cst_212 = arith.constant dense<0.000000e+00> : vector<17x8xf32>
    %302 = tpu.matmul %298, %301, %cst_212 {dimension_numbers = #tpu.dot_dimension_numbers<[1], [0], [0], [1], [0, 0, 1, 1], [], []>} : vector<17x32xbf16>, vector<32x8xbf16>, vector<17x8xf32> -> vector<17x8xf32>
    %c1_213 = arith.constant 1 : index
    %c0_214 = arith.constant 0 : index
    %c0_215 = arith.constant 0 : index
    %c0_216 = arith.constant 0 : index
    %303 = vector.load %arg7[%c1_213, %c0_214, %c0_215, %c0_216] : memref<2x4x1x8xf32, #tpu.memory_space<vmem>>, vector<1x1x1x8xf32>
    %304 = vector.shape_cast %303 : vector<1x1x1x8xf32> to vector<1x8xf32>
    %305 = vector.broadcast %304 : vector<1x8xf32> to vector<17x8xf32>
    %306 = arith.addf %302, %305 : vector<17x8xf32>
    %c1_217 = arith.constant 1 : index
    %c0_218 = arith.constant 0 : index
    %c0_219 = arith.constant 0 : index
    %c0_220 = arith.constant 0 : index
    %307 = vector.load %arg8[%c1_217, %c0_218, %c0_219, %c0_220] : memref<2x4x32x8xbf16, #tpu.memory_space<vmem>>, vector<1x1x32x8xbf16>
    %308 = vector.shape_cast %307 : vector<1x1x32x8xbf16> to vector<32x8xbf16>
    %cst_221 = arith.constant dense<0.000000e+00> : vector<17x8xf32>
    %309 = tpu.matmul %298, %308, %cst_221 {dimension_numbers = #tpu.dot_dimension_numbers<[1], [0], [0], [1], [0, 0, 1, 1], [], []>} : vector<17x32xbf16>, vector<32x8xbf16>, vector<17x8xf32> -> vector<17x8xf32>
    %c1_222 = arith.constant 1 : index
    %c0_223 = arith.constant 0 : index
    %c0_224 = arith.constant 0 : index
    %c0_225 = arith.constant 0 : index
    %310 = vector.load %arg9[%c1_222, %c0_223, %c0_224, %c0_225] : memref<2x4x1x8xf32, #tpu.memory_space<vmem>>, vector<1x1x1x8xf32>
    %311 = vector.shape_cast %310 : vector<1x1x1x8xf32> to vector<1x8xf32>
    %312 = vector.broadcast %311 : vector<1x8xf32> to vector<17x8xf32>
    %313 = arith.addf %309, %312 : vector<17x8xf32>
    %c1_226 = arith.constant 1 : index
    %c0_227 = arith.constant 0 : index
    %c0_228 = arith.constant 0 : index
    %c0_229 = arith.constant 0 : index
    %314 = vector.load %arg10[%c1_226, %c0_227, %c0_228, %c0_229] : memref<2x4x32x8xbf16, #tpu.memory_space<vmem>>, vector<1x1x32x8xbf16>
    %315 = vector.shape_cast %314 : vector<1x1x32x8xbf16> to vector<32x8xbf16>
    %cst_230 = arith.constant dense<0.000000e+00> : vector<17x8xf32>
    %316 = tpu.matmul %298, %315, %cst_230 {dimension_numbers = #tpu.dot_dimension_numbers<[1], [0], [0], [1], [0, 0, 1, 1], [], []>} : vector<17x32xbf16>, vector<32x8xbf16>, vector<17x8xf32> -> vector<17x8xf32>
    %c1_231 = arith.constant 1 : index
    %c0_232 = arith.constant 0 : index
    %c0_233 = arith.constant 0 : index
    %c0_234 = arith.constant 0 : index
    %317 = vector.load %arg11[%c1_231, %c0_232, %c0_233, %c0_234] : memref<2x4x1x8xf32, #tpu.memory_space<vmem>>, vector<1x1x1x8xf32>
    %318 = vector.shape_cast %317 : vector<1x1x1x8xf32> to vector<1x8xf32>
    %319 = vector.broadcast %318 : vector<1x8xf32> to vector<17x8xf32>
    %320 = arith.addf %316, %319 : vector<17x8xf32>
    %321 = arith.truncf %306 : vector<17x8xf32> to vector<17x8xbf16>
    %322 = arith.truncf %313 : vector<17x8xf32> to vector<17x8xbf16>
    %cst_235 = arith.constant dense<0.000000e+00> : vector<17x17xf32>
    %323 = tpu.matmul %321, %322, %cst_235 {dimension_numbers = #tpu.dot_dimension_numbers<[1], [1], [0], [0], [0, 0, 1, 0], [], []>} : vector<17x8xbf16>, vector<17x8xbf16>, vector<17x17xf32> -> vector<17x17xf32>
    %cst_236 = arith.constant 0.353553385 : f32
    %324 = vector.broadcast %cst_236 : f32 to vector<17x17xf32>
    %325 = arith.mulf %323, %324 : vector<17x17xf32>
    %cst_237 = arith.constant dense<0xFF800000> : vector<17xf32>
    %326 = vector.multi_reduction <maximumf>, %325, %cst_237 [1] : vector<17x17xf32> to vector<17xf32>
    %327 = vector.shape_cast %326 : vector<17xf32> to vector<17x1xf32>
    %328 = vector.broadcast %327 : vector<17x1xf32> to vector<17x17xf32>
    %329 = arith.subf %325, %328 : vector<17x17xf32>
    %330 = math.exp %329 : vector<17x17xf32>
    %cst_238 = arith.constant dense<0.000000e+00> : vector<17xf32>
    %331 = vector.multi_reduction <add>, %330, %cst_238 [1] : vector<17x17xf32> to vector<17xf32>
    %332 = vector.shape_cast %331 : vector<17xf32> to vector<17x1xf32>
    %333 = tpu.reciprocal %332 {approx = true} : vector<17x1xf32> -> vector<17x1xf32>
    %334 = vector.broadcast %333 : vector<17x1xf32> to vector<17x17xf32>
    %335 = arith.mulf %330, %334 : vector<17x17xf32>
    %336 = arith.truncf %335 : vector<17x17xf32> to vector<17x17xbf16>
    %337 = arith.truncf %320 : vector<17x8xf32> to vector<17x8xbf16>
    %cst_239 = arith.constant dense<0.000000e+00> : vector<17x8xf32>
    %338 = tpu.matmul %336, %337, %cst_239 {dimension_numbers = #tpu.dot_dimension_numbers<[1], [0], [0], [1], [0, 0, 1, 1], [], []>} : vector<17x17xbf16>, vector<17x8xbf16>, vector<17x8xf32> -> vector<17x8xf32>
    %339 = arith.truncf %338 : vector<17x8xf32> to vector<17x8xbf16>
    %c1_240 = arith.constant 1 : index
    %c0_241 = arith.constant 0 : index
    %c0_242 = arith.constant 0 : index
    %c0_243 = arith.constant 0 : index
    %340 = vector.load %arg12[%c1_240, %c0_241, %c0_242, %c0_243] : memref<2x4x8x32xbf16, #tpu.memory_space<vmem>>, vector<1x1x8x32xbf16>
    %341 = vector.shape_cast %340 : vector<1x1x8x32xbf16> to vector<8x32xbf16>
    %cst_244 = arith.constant dense<0.000000e+00> : vector<17x32xf32>
    %342 = tpu.matmul %339, %341, %cst_244 {dimension_numbers = #tpu.dot_dimension_numbers<[1], [0], [0], [1], [0, 0, 1, 1], [], []>} : vector<17x8xbf16>, vector<8x32xbf16>, vector<17x32xf32> -> vector<17x32xf32>
    %343 = arith.addf %299, %342 : vector<17x32xf32>
    %c1_245 = arith.constant 1 : index
    %c1_246 = arith.constant 1 : index
    %c0_247 = arith.constant 0 : index
    %c0_248 = arith.constant 0 : index
    %344 = vector.load %arg6[%c1_245, %c1_246, %c0_247, %c0_248] : memref<2x4x32x8xbf16, #tpu.memory_space<vmem>>, vector<1x1x32x8xbf16>
    %345 = vector.shape_cast %344 : vector<1x1x32x8xbf16> to vector<32x8xbf16>
    %cst_249 = arith.constant dense<0.000000e+00> : vector<17x8xf32>
    %346 = tpu.matmul %298, %345, %cst_249 {dimension_numbers = #tpu.dot_dimension_numbers<[1], [0], [0], [1], [0, 0, 1, 1], [], []>} : vector<17x32xbf16>, vector<32x8xbf16>, vector<17x8xf32> -> vector<17x8xf32>
    %c1_250 = arith.constant 1 : index
    %c1_251 = arith.constant 1 : index
    %c0_252 = arith.constant 0 : index
    %c0_253 = arith.constant 0 : index
    %347 = vector.load %arg7[%c1_250, %c1_251, %c0_252, %c0_253] : memref<2x4x1x8xf32, #tpu.memory_space<vmem>>, vector<1x1x1x8xf32>
    %348 = vector.shape_cast %347 : vector<1x1x1x8xf32> to vector<1x8xf32>
    %349 = vector.broadcast %348 : vector<1x8xf32> to vector<17x8xf32>
    %350 = arith.addf %346, %349 : vector<17x8xf32>
    %c1_254 = arith.constant 1 : index
    %c1_255 = arith.constant 1 : index
    %c0_256 = arith.constant 0 : index
    %c0_257 = arith.constant 0 : index
    %351 = vector.load %arg8[%c1_254, %c1_255, %c0_256, %c0_257] : memref<2x4x32x8xbf16, #tpu.memory_space<vmem>>, vector<1x1x32x8xbf16>
    %352 = vector.shape_cast %351 : vector<1x1x32x8xbf16> to vector<32x8xbf16>
    %cst_258 = arith.constant dense<0.000000e+00> : vector<17x8xf32>
    %353 = tpu.matmul %298, %352, %cst_258 {dimension_numbers = #tpu.dot_dimension_numbers<[1], [0], [0], [1], [0, 0, 1, 1], [], []>} : vector<17x32xbf16>, vector<32x8xbf16>, vector<17x8xf32> -> vector<17x8xf32>
    %c1_259 = arith.constant 1 : index
    %c1_260 = arith.constant 1 : index
    %c0_261 = arith.constant 0 : index
    %c0_262 = arith.constant 0 : index
    %354 = vector.load %arg9[%c1_259, %c1_260, %c0_261, %c0_262] : memref<2x4x1x8xf32, #tpu.memory_space<vmem>>, vector<1x1x1x8xf32>
    %355 = vector.shape_cast %354 : vector<1x1x1x8xf32> to vector<1x8xf32>
    %356 = vector.broadcast %355 : vector<1x8xf32> to vector<17x8xf32>
    %357 = arith.addf %353, %356 : vector<17x8xf32>
    %c1_263 = arith.constant 1 : index
    %c1_264 = arith.constant 1 : index
    %c0_265 = arith.constant 0 : index
    %c0_266 = arith.constant 0 : index
    %358 = vector.load %arg10[%c1_263, %c1_264, %c0_265, %c0_266] : memref<2x4x32x8xbf16, #tpu.memory_space<vmem>>, vector<1x1x32x8xbf16>
    %359 = vector.shape_cast %358 : vector<1x1x32x8xbf16> to vector<32x8xbf16>
    %cst_267 = arith.constant dense<0.000000e+00> : vector<17x8xf32>
    %360 = tpu.matmul %298, %359, %cst_267 {dimension_numbers = #tpu.dot_dimension_numbers<[1], [0], [0], [1], [0, 0, 1, 1], [], []>} : vector<17x32xbf16>, vector<32x8xbf16>, vector<17x8xf32> -> vector<17x8xf32>
    %c1_268 = arith.constant 1 : index
    %c1_269 = arith.constant 1 : index
    %c0_270 = arith.constant 0 : index
    %c0_271 = arith.constant 0 : index
    %361 = vector.load %arg11[%c1_268, %c1_269, %c0_270, %c0_271] : memref<2x4x1x8xf32, #tpu.memory_space<vmem>>, vector<1x1x1x8xf32>
    %362 = vector.shape_cast %361 : vector<1x1x1x8xf32> to vector<1x8xf32>
    %363 = vector.broadcast %362 : vector<1x8xf32> to vector<17x8xf32>
    %364 = arith.addf %360, %363 : vector<17x8xf32>
    %365 = arith.truncf %350 : vector<17x8xf32> to vector<17x8xbf16>
    %366 = arith.truncf %357 : vector<17x8xf32> to vector<17x8xbf16>
    %cst_272 = arith.constant dense<0.000000e+00> : vector<17x17xf32>
    %367 = tpu.matmul %365, %366, %cst_272 {dimension_numbers = #tpu.dot_dimension_numbers<[1], [1], [0], [0], [0, 0, 1, 0], [], []>} : vector<17x8xbf16>, vector<17x8xbf16>, vector<17x17xf32> -> vector<17x17xf32>
    %cst_273 = arith.constant 0.353553385 : f32
    %368 = vector.broadcast %cst_273 : f32 to vector<17x17xf32>
    %369 = arith.mulf %367, %368 : vector<17x17xf32>
    %cst_274 = arith.constant dense<0xFF800000> : vector<17xf32>
    %370 = vector.multi_reduction <maximumf>, %369, %cst_274 [1] : vector<17x17xf32> to vector<17xf32>
    %371 = vector.shape_cast %370 : vector<17xf32> to vector<17x1xf32>
    %372 = vector.broadcast %371 : vector<17x1xf32> to vector<17x17xf32>
    %373 = arith.subf %369, %372 : vector<17x17xf32>
    %374 = math.exp %373 : vector<17x17xf32>
    %cst_275 = arith.constant dense<0.000000e+00> : vector<17xf32>
    %375 = vector.multi_reduction <add>, %374, %cst_275 [1] : vector<17x17xf32> to vector<17xf32>
    %376 = vector.shape_cast %375 : vector<17xf32> to vector<17x1xf32>
    %377 = tpu.reciprocal %376 {approx = true} : vector<17x1xf32> -> vector<17x1xf32>
    %378 = vector.broadcast %377 : vector<17x1xf32> to vector<17x17xf32>
    %379 = arith.mulf %374, %378 : vector<17x17xf32>
    %380 = arith.truncf %379 : vector<17x17xf32> to vector<17x17xbf16>
    %381 = arith.truncf %364 : vector<17x8xf32> to vector<17x8xbf16>
    %cst_276 = arith.constant dense<0.000000e+00> : vector<17x8xf32>
    %382 = tpu.matmul %380, %381, %cst_276 {dimension_numbers = #tpu.dot_dimension_numbers<[1], [0], [0], [1], [0, 0, 1, 1], [], []>} : vector<17x17xbf16>, vector<17x8xbf16>, vector<17x8xf32> -> vector<17x8xf32>
    %383 = arith.truncf %382 : vector<17x8xf32> to vector<17x8xbf16>
    %c1_277 = arith.constant 1 : index
    %c1_278 = arith.constant 1 : index
    %c0_279 = arith.constant 0 : index
    %c0_280 = arith.constant 0 : index
    %384 = vector.load %arg12[%c1_277, %c1_278, %c0_279, %c0_280] : memref<2x4x8x32xbf16, #tpu.memory_space<vmem>>, vector<1x1x8x32xbf16>
    %385 = vector.shape_cast %384 : vector<1x1x8x32xbf16> to vector<8x32xbf16>
    %cst_281 = arith.constant dense<0.000000e+00> : vector<17x32xf32>
    %386 = tpu.matmul %383, %385, %cst_281 {dimension_numbers = #tpu.dot_dimension_numbers<[1], [0], [0], [1], [0, 0, 1, 1], [], []>} : vector<17x8xbf16>, vector<8x32xbf16>, vector<17x32xf32> -> vector<17x32xf32>
    %387 = arith.addf %343, %386 : vector<17x32xf32>
    %c1_282 = arith.constant 1 : index
    %c2_283 = arith.constant 2 : index
    %c0_284 = arith.constant 0 : index
    %c0_285 = arith.constant 0 : index
    %388 = vector.load %arg6[%c1_282, %c2_283, %c0_284, %c0_285] : memref<2x4x32x8xbf16, #tpu.memory_space<vmem>>, vector<1x1x32x8xbf16>
    %389 = vector.shape_cast %388 : vector<1x1x32x8xbf16> to vector<32x8xbf16>
    %cst_286 = arith.constant dense<0.000000e+00> : vector<17x8xf32>
    %390 = tpu.matmul %298, %389, %cst_286 {dimension_numbers = #tpu.dot_dimension_numbers<[1], [0], [0], [1], [0, 0, 1, 1], [], []>} : vector<17x32xbf16>, vector<32x8xbf16>, vector<17x8xf32> -> vector<17x8xf32>
    %c1_287 = arith.constant 1 : index
    %c2_288 = arith.constant 2 : index
    %c0_289 = arith.constant 0 : index
    %c0_290 = arith.constant 0 : index
    %391 = vector.load %arg7[%c1_287, %c2_288, %c0_289, %c0_290] : memref<2x4x1x8xf32, #tpu.memory_space<vmem>>, vector<1x1x1x8xf32>
    %392 = vector.shape_cast %391 : vector<1x1x1x8xf32> to vector<1x8xf32>
    %393 = vector.broadcast %392 : vector<1x8xf32> to vector<17x8xf32>
    %394 = arith.addf %390, %393 : vector<17x8xf32>
    %c1_291 = arith.constant 1 : index
    %c2_292 = arith.constant 2 : index
    %c0_293 = arith.constant 0 : index
    %c0_294 = arith.constant 0 : index
    %395 = vector.load %arg8[%c1_291, %c2_292, %c0_293, %c0_294] : memref<2x4x32x8xbf16, #tpu.memory_space<vmem>>, vector<1x1x32x8xbf16>
    %396 = vector.shape_cast %395 : vector<1x1x32x8xbf16> to vector<32x8xbf16>
    %cst_295 = arith.constant dense<0.000000e+00> : vector<17x8xf32>
    %397 = tpu.matmul %298, %396, %cst_295 {dimension_numbers = #tpu.dot_dimension_numbers<[1], [0], [0], [1], [0, 0, 1, 1], [], []>} : vector<17x32xbf16>, vector<32x8xbf16>, vector<17x8xf32> -> vector<17x8xf32>
    %c1_296 = arith.constant 1 : index
    %c2_297 = arith.constant 2 : index
    %c0_298 = arith.constant 0 : index
    %c0_299 = arith.constant 0 : index
    %398 = vector.load %arg9[%c1_296, %c2_297, %c0_298, %c0_299] : memref<2x4x1x8xf32, #tpu.memory_space<vmem>>, vector<1x1x1x8xf32>
    %399 = vector.shape_cast %398 : vector<1x1x1x8xf32> to vector<1x8xf32>
    %400 = vector.broadcast %399 : vector<1x8xf32> to vector<17x8xf32>
    %401 = arith.addf %397, %400 : vector<17x8xf32>
    %c1_300 = arith.constant 1 : index
    %c2_301 = arith.constant 2 : index
    %c0_302 = arith.constant 0 : index
    %c0_303 = arith.constant 0 : index
    %402 = vector.load %arg10[%c1_300, %c2_301, %c0_302, %c0_303] : memref<2x4x32x8xbf16, #tpu.memory_space<vmem>>, vector<1x1x32x8xbf16>
    %403 = vector.shape_cast %402 : vector<1x1x32x8xbf16> to vector<32x8xbf16>
    %cst_304 = arith.constant dense<0.000000e+00> : vector<17x8xf32>
    %404 = tpu.matmul %298, %403, %cst_304 {dimension_numbers = #tpu.dot_dimension_numbers<[1], [0], [0], [1], [0, 0, 1, 1], [], []>} : vector<17x32xbf16>, vector<32x8xbf16>, vector<17x8xf32> -> vector<17x8xf32>
    %c1_305 = arith.constant 1 : index
    %c2_306 = arith.constant 2 : index
    %c0_307 = arith.constant 0 : index
    %c0_308 = arith.constant 0 : index
    %405 = vector.load %arg11[%c1_305, %c2_306, %c0_307, %c0_308] : memref<2x4x1x8xf32, #tpu.memory_space<vmem>>, vector<1x1x1x8xf32>
    %406 = vector.shape_cast %405 : vector<1x1x1x8xf32> to vector<1x8xf32>
    %407 = vector.broadcast %406 : vector<1x8xf32> to vector<17x8xf32>
    %408 = arith.addf %404, %407 : vector<17x8xf32>
    %409 = arith.truncf %394 : vector<17x8xf32> to vector<17x8xbf16>
    %410 = arith.truncf %401 : vector<17x8xf32> to vector<17x8xbf16>
    %cst_309 = arith.constant dense<0.000000e+00> : vector<17x17xf32>
    %411 = tpu.matmul %409, %410, %cst_309 {dimension_numbers = #tpu.dot_dimension_numbers<[1], [1], [0], [0], [0, 0, 1, 0], [], []>} : vector<17x8xbf16>, vector<17x8xbf16>, vector<17x17xf32> -> vector<17x17xf32>
    %cst_310 = arith.constant 0.353553385 : f32
    %412 = vector.broadcast %cst_310 : f32 to vector<17x17xf32>
    %413 = arith.mulf %411, %412 : vector<17x17xf32>
    %cst_311 = arith.constant dense<0xFF800000> : vector<17xf32>
    %414 = vector.multi_reduction <maximumf>, %413, %cst_311 [1] : vector<17x17xf32> to vector<17xf32>
    %415 = vector.shape_cast %414 : vector<17xf32> to vector<17x1xf32>
    %416 = vector.broadcast %415 : vector<17x1xf32> to vector<17x17xf32>
    %417 = arith.subf %413, %416 : vector<17x17xf32>
    %418 = math.exp %417 : vector<17x17xf32>
    %cst_312 = arith.constant dense<0.000000e+00> : vector<17xf32>
    %419 = vector.multi_reduction <add>, %418, %cst_312 [1] : vector<17x17xf32> to vector<17xf32>
    %420 = vector.shape_cast %419 : vector<17xf32> to vector<17x1xf32>
    %421 = tpu.reciprocal %420 {approx = true} : vector<17x1xf32> -> vector<17x1xf32>
    %422 = vector.broadcast %421 : vector<17x1xf32> to vector<17x17xf32>
    %423 = arith.mulf %418, %422 : vector<17x17xf32>
    %424 = arith.truncf %423 : vector<17x17xf32> to vector<17x17xbf16>
    %425 = arith.truncf %408 : vector<17x8xf32> to vector<17x8xbf16>
    %cst_313 = arith.constant dense<0.000000e+00> : vector<17x8xf32>
    %426 = tpu.matmul %424, %425, %cst_313 {dimension_numbers = #tpu.dot_dimension_numbers<[1], [0], [0], [1], [0, 0, 1, 1], [], []>} : vector<17x17xbf16>, vector<17x8xbf16>, vector<17x8xf32> -> vector<17x8xf32>
    %427 = arith.truncf %426 : vector<17x8xf32> to vector<17x8xbf16>
    %c1_314 = arith.constant 1 : index
    %c2_315 = arith.constant 2 : index
    %c0_316 = arith.constant 0 : index
    %c0_317 = arith.constant 0 : index
    %428 = vector.load %arg12[%c1_314, %c2_315, %c0_316, %c0_317] : memref<2x4x8x32xbf16, #tpu.memory_space<vmem>>, vector<1x1x8x32xbf16>
    %429 = vector.shape_cast %428 : vector<1x1x8x32xbf16> to vector<8x32xbf16>
    %cst_318 = arith.constant dense<0.000000e+00> : vector<17x32xf32>
    %430 = tpu.matmul %427, %429, %cst_318 {dimension_numbers = #tpu.dot_dimension_numbers<[1], [0], [0], [1], [0, 0, 1, 1], [], []>} : vector<17x8xbf16>, vector<8x32xbf16>, vector<17x32xf32> -> vector<17x32xf32>
    %431 = arith.addf %387, %430 : vector<17x32xf32>
    %c1_319 = arith.constant 1 : index
    %c3_320 = arith.constant 3 : index
    %c0_321 = arith.constant 0 : index
    %c0_322 = arith.constant 0 : index
    %432 = vector.load %arg6[%c1_319, %c3_320, %c0_321, %c0_322] : memref<2x4x32x8xbf16, #tpu.memory_space<vmem>>, vector<1x1x32x8xbf16>
    %433 = vector.shape_cast %432 : vector<1x1x32x8xbf16> to vector<32x8xbf16>
    %cst_323 = arith.constant dense<0.000000e+00> : vector<17x8xf32>
    %434 = tpu.matmul %298, %433, %cst_323 {dimension_numbers = #tpu.dot_dimension_numbers<[1], [0], [0], [1], [0, 0, 1, 1], [], []>} : vector<17x32xbf16>, vector<32x8xbf16>, vector<17x8xf32> -> vector<17x8xf32>
    %c1_324 = arith.constant 1 : index
    %c3_325 = arith.constant 3 : index
    %c0_326 = arith.constant 0 : index
    %c0_327 = arith.constant 0 : index
    %435 = vector.load %arg7[%c1_324, %c3_325, %c0_326, %c0_327] : memref<2x4x1x8xf32, #tpu.memory_space<vmem>>, vector<1x1x1x8xf32>
    %436 = vector.shape_cast %435 : vector<1x1x1x8xf32> to vector<1x8xf32>
    %437 = vector.broadcast %436 : vector<1x8xf32> to vector<17x8xf32>
    %438 = arith.addf %434, %437 : vector<17x8xf32>
    %c1_328 = arith.constant 1 : index
    %c3_329 = arith.constant 3 : index
    %c0_330 = arith.constant 0 : index
    %c0_331 = arith.constant 0 : index
    %439 = vector.load %arg8[%c1_328, %c3_329, %c0_330, %c0_331] : memref<2x4x32x8xbf16, #tpu.memory_space<vmem>>, vector<1x1x32x8xbf16>
    %440 = vector.shape_cast %439 : vector<1x1x32x8xbf16> to vector<32x8xbf16>
    %cst_332 = arith.constant dense<0.000000e+00> : vector<17x8xf32>
    %441 = tpu.matmul %298, %440, %cst_332 {dimension_numbers = #tpu.dot_dimension_numbers<[1], [0], [0], [1], [0, 0, 1, 1], [], []>} : vector<17x32xbf16>, vector<32x8xbf16>, vector<17x8xf32> -> vector<17x8xf32>
    %c1_333 = arith.constant 1 : index
    %c3_334 = arith.constant 3 : index
    %c0_335 = arith.constant 0 : index
    %c0_336 = arith.constant 0 : index
    %442 = vector.load %arg9[%c1_333, %c3_334, %c0_335, %c0_336] : memref<2x4x1x8xf32, #tpu.memory_space<vmem>>, vector<1x1x1x8xf32>
    %443 = vector.shape_cast %442 : vector<1x1x1x8xf32> to vector<1x8xf32>
    %444 = vector.broadcast %443 : vector<1x8xf32> to vector<17x8xf32>
    %445 = arith.addf %441, %444 : vector<17x8xf32>
    %c1_337 = arith.constant 1 : index
    %c3_338 = arith.constant 3 : index
    %c0_339 = arith.constant 0 : index
    %c0_340 = arith.constant 0 : index
    %446 = vector.load %arg10[%c1_337, %c3_338, %c0_339, %c0_340] : memref<2x4x32x8xbf16, #tpu.memory_space<vmem>>, vector<1x1x32x8xbf16>
    %447 = vector.shape_cast %446 : vector<1x1x32x8xbf16> to vector<32x8xbf16>
    %cst_341 = arith.constant dense<0.000000e+00> : vector<17x8xf32>
    %448 = tpu.matmul %298, %447, %cst_341 {dimension_numbers = #tpu.dot_dimension_numbers<[1], [0], [0], [1], [0, 0, 1, 1], [], []>} : vector<17x32xbf16>, vector<32x8xbf16>, vector<17x8xf32> -> vector<17x8xf32>
    %c1_342 = arith.constant 1 : index
    %c3_343 = arith.constant 3 : index
    %c0_344 = arith.constant 0 : index
    %c0_345 = arith.constant 0 : index
    %449 = vector.load %arg11[%c1_342, %c3_343, %c0_344, %c0_345] : memref<2x4x1x8xf32, #tpu.memory_space<vmem>>, vector<1x1x1x8xf32>
    %450 = vector.shape_cast %449 : vector<1x1x1x8xf32> to vector<1x8xf32>
    %451 = vector.broadcast %450 : vector<1x8xf32> to vector<17x8xf32>
    %452 = arith.addf %448, %451 : vector<17x8xf32>
    %453 = arith.truncf %438 : vector<17x8xf32> to vector<17x8xbf16>
    %454 = arith.truncf %445 : vector<17x8xf32> to vector<17x8xbf16>
    %cst_346 = arith.constant dense<0.000000e+00> : vector<17x17xf32>
    %455 = tpu.matmul %453, %454, %cst_346 {dimension_numbers = #tpu.dot_dimension_numbers<[1], [1], [0], [0], [0, 0, 1, 0], [], []>} : vector<17x8xbf16>, vector<17x8xbf16>, vector<17x17xf32> -> vector<17x17xf32>
    %cst_347 = arith.constant 0.353553385 : f32
    %456 = vector.broadcast %cst_347 : f32 to vector<17x17xf32>
    %457 = arith.mulf %455, %456 : vector<17x17xf32>
    %cst_348 = arith.constant dense<0xFF800000> : vector<17xf32>
    %458 = vector.multi_reduction <maximumf>, %457, %cst_348 [1] : vector<17x17xf32> to vector<17xf32>
    %459 = vector.shape_cast %458 : vector<17xf32> to vector<17x1xf32>
    %460 = vector.broadcast %459 : vector<17x1xf32> to vector<17x17xf32>
    %461 = arith.subf %457, %460 : vector<17x17xf32>
    %462 = math.exp %461 : vector<17x17xf32>
    %cst_349 = arith.constant dense<0.000000e+00> : vector<17xf32>
    %463 = vector.multi_reduction <add>, %462, %cst_349 [1] : vector<17x17xf32> to vector<17xf32>
    %464 = vector.shape_cast %463 : vector<17xf32> to vector<17x1xf32>
    %465 = tpu.reciprocal %464 {approx = true} : vector<17x1xf32> -> vector<17x1xf32>
    %466 = vector.broadcast %465 : vector<17x1xf32> to vector<17x17xf32>
    %467 = arith.mulf %462, %466 : vector<17x17xf32>
    %468 = arith.truncf %467 : vector<17x17xf32> to vector<17x17xbf16>
    %469 = arith.truncf %452 : vector<17x8xf32> to vector<17x8xbf16>
    %cst_350 = arith.constant dense<0.000000e+00> : vector<17x8xf32>
    %470 = tpu.matmul %468, %469, %cst_350 {dimension_numbers = #tpu.dot_dimension_numbers<[1], [0], [0], [1], [0, 0, 1, 1], [], []>} : vector<17x17xbf16>, vector<17x8xbf16>, vector<17x8xf32> -> vector<17x8xf32>
    %471 = arith.truncf %470 : vector<17x8xf32> to vector<17x8xbf16>
    %c1_351 = arith.constant 1 : index
    %c3_352 = arith.constant 3 : index
    %c0_353 = arith.constant 0 : index
    %c0_354 = arith.constant 0 : index
    %472 = vector.load %arg12[%c1_351, %c3_352, %c0_353, %c0_354] : memref<2x4x8x32xbf16, #tpu.memory_space<vmem>>, vector<1x1x8x32xbf16>
    %473 = vector.shape_cast %472 : vector<1x1x8x32xbf16> to vector<8x32xbf16>
    %cst_355 = arith.constant dense<0.000000e+00> : vector<17x32xf32>
    %474 = tpu.matmul %471, %473, %cst_355 {dimension_numbers = #tpu.dot_dimension_numbers<[1], [0], [0], [1], [0, 0, 1, 1], [], []>} : vector<17x8xbf16>, vector<8x32xbf16>, vector<17x32xf32> -> vector<17x32xf32>
    %475 = arith.addf %431, %474 : vector<17x32xf32>
    %476 = arith.addf %271, %475 : vector<17x32xf32>
    %c1_356 = arith.constant 1 : index
    %c0_357 = arith.constant 0 : index
    %c0_358 = arith.constant 0 : index
    %477 = vector.load %arg13[%c1_356, %c0_357, %c0_358] : memref<2x1x32xf32, #tpu.memory_space<vmem>>, vector<1x1x32xf32>
    %478 = vector.shape_cast %477 : vector<1x1x32xf32> to vector<1x32xf32>
    %479 = vector.broadcast %478 : vector<1x32xf32> to vector<17x32xf32>
    %480 = arith.addf %476, %479 : vector<17x32xf32>
    %c1_359 = arith.constant 1 : index
    %c0_360 = arith.constant 0 : index
    %c0_361 = arith.constant 0 : index
    %481 = vector.load %arg14[%c1_359, %c0_360, %c0_361] : memref<2x1x32xf32, #tpu.memory_space<vmem>>, vector<1x1x32xf32>
    %482 = vector.shape_cast %481 : vector<1x1x32xf32> to vector<1x32xf32>
    %c1_362 = arith.constant 1 : index
    %c0_363 = arith.constant 0 : index
    %c0_364 = arith.constant 0 : index
    %483 = vector.load %arg15[%c1_362, %c0_363, %c0_364] : memref<2x1x32xf32, #tpu.memory_space<vmem>>, vector<1x1x32xf32>
    %484 = vector.shape_cast %483 : vector<1x1x32xf32> to vector<1x32xf32>
    %cst_365 = arith.constant dense<0.000000e+00> : vector<17xf32>
    %485 = vector.multi_reduction <add>, %480, %cst_365 [1] : vector<17x32xf32> to vector<17xf32>
    %486 = vector.shape_cast %485 : vector<17xf32> to vector<17x1xf32>
    %cst_366 = arith.constant 3.200000e+01 : f32
    %487 = vector.broadcast %cst_366 : f32 to vector<17x1xf32>
    %488 = arith.divf %486, %487 : vector<17x1xf32>
    %489 = vector.broadcast %488 : vector<17x1xf32> to vector<17x32xf32>
    %490 = arith.subf %480, %489 : vector<17x32xf32>
    %491 = arith.mulf %490, %490 : vector<17x32xf32>
    %cst_367 = arith.constant dense<0.000000e+00> : vector<17xf32>
    %492 = vector.multi_reduction <add>, %491, %cst_367 [1] : vector<17x32xf32> to vector<17xf32>
    %493 = vector.shape_cast %492 : vector<17xf32> to vector<17x1xf32>
    %cst_368 = arith.constant 3.200000e+01 : f32
    %494 = vector.broadcast %cst_368 : f32 to vector<17x1xf32>
    %495 = arith.divf %493, %494 : vector<17x1xf32>
    %496 = vector.broadcast %488 : vector<17x1xf32> to vector<17x32xf32>
    %497 = arith.subf %480, %496 : vector<17x32xf32>
    %cst_369 = arith.constant 9.99999997E-7 : f32
    %498 = vector.broadcast %cst_369 : f32 to vector<17x1xf32>
    %499 = arith.addf %495, %498 : vector<17x1xf32>
    %500 = math.rsqrt %499 : vector<17x1xf32>
    %501 = vector.broadcast %500 : vector<17x1xf32> to vector<17x32xf32>
    %502 = arith.mulf %497, %501 : vector<17x32xf32>
    %503 = vector.broadcast %482 : vector<1x32xf32> to vector<17x32xf32>
    %504 = arith.mulf %502, %503 : vector<17x32xf32>
    %505 = vector.broadcast %484 : vector<1x32xf32> to vector<17x32xf32>
    %506 = arith.addf %504, %505 : vector<17x32xf32>
    %507 = arith.truncf %506 : vector<17x32xf32> to vector<17x32xbf16>
    %c1_370 = arith.constant 1 : index
    %c0_371 = arith.constant 0 : index
    %c0_372 = arith.constant 0 : index
    %508 = vector.load %arg16[%c1_370, %c0_371, %c0_372] : memref<2x32x128xbf16, #tpu.memory_space<vmem>>, vector<1x32x128xbf16>
    %509 = vector.shape_cast %508 : vector<1x32x128xbf16> to vector<32x128xbf16>
    %cst_373 = arith.constant dense<0.000000e+00> : vector<17x128xf32>
    %510 = tpu.matmul %507, %509, %cst_373 {dimension_numbers = #tpu.dot_dimension_numbers<[1], [0], [0], [1], [0, 0, 1, 1], [], []>} : vector<17x32xbf16>, vector<32x128xbf16>, vector<17x128xf32> -> vector<17x128xf32>
    %c1_374 = arith.constant 1 : index
    %c0_375 = arith.constant 0 : index
    %c0_376 = arith.constant 0 : index
    %511 = vector.load %arg17[%c1_374, %c0_375, %c0_376] : memref<2x1x128xf32, #tpu.memory_space<vmem>>, vector<1x1x128xf32>
    %512 = vector.shape_cast %511 : vector<1x1x128xf32> to vector<1x128xf32>
    %513 = vector.broadcast %512 : vector<1x128xf32> to vector<17x128xf32>
    %514 = arith.addf %510, %513 : vector<17x128xf32>
    %515 = arith.mulf %514, %514 : vector<17x128xf32>
    %516 = arith.mulf %514, %515 : vector<17x128xf32>
    %cst_377 = arith.constant 4.471500e-02 : f32
    %517 = vector.broadcast %cst_377 : f32 to vector<17x128xf32>
    %518 = arith.mulf %517, %516 : vector<17x128xf32>
    %519 = arith.addf %514, %518 : vector<17x128xf32>
    %cst_378 = arith.constant 0.797884583 : f32
    %520 = vector.broadcast %cst_378 : f32 to vector<17x128xf32>
    %521 = arith.mulf %520, %519 : vector<17x128xf32>
    %522 = math.tanh %521 : vector<17x128xf32>
    %cst_379 = arith.constant 1.000000e+00 : f32
    %523 = vector.broadcast %cst_379 : f32 to vector<17x128xf32>
    %524 = arith.addf %523, %522 : vector<17x128xf32>
    %cst_380 = arith.constant 5.000000e-01 : f32
    %525 = vector.broadcast %cst_380 : f32 to vector<17x128xf32>
    %526 = arith.mulf %525, %524 : vector<17x128xf32>
    %527 = arith.mulf %514, %526 : vector<17x128xf32>
    %528 = arith.truncf %527 : vector<17x128xf32> to vector<17x128xbf16>
    %c1_381 = arith.constant 1 : index
    %c0_382 = arith.constant 0 : index
    %c0_383 = arith.constant 0 : index
    %529 = vector.load %arg18[%c1_381, %c0_382, %c0_383] : memref<2x128x32xbf16, #tpu.memory_space<vmem>>, vector<1x128x32xbf16>
    %530 = vector.shape_cast %529 : vector<1x128x32xbf16> to vector<128x32xbf16>
    %cst_384 = arith.constant dense<0.000000e+00> : vector<17x32xf32>
    %531 = tpu.matmul %528, %530, %cst_384 {dimension_numbers = #tpu.dot_dimension_numbers<[1], [0], [0], [1], [0, 0, 1, 1], [], []>} : vector<17x128xbf16>, vector<128x32xbf16>, vector<17x32xf32> -> vector<17x32xf32>
    %c1_385 = arith.constant 1 : index
    %c0_386 = arith.constant 0 : index
    %c0_387 = arith.constant 0 : index
    %532 = vector.load %arg19[%c1_385, %c0_386, %c0_387] : memref<2x1x32xf32, #tpu.memory_space<vmem>>, vector<1x1x32xf32>
    %533 = vector.shape_cast %532 : vector<1x1x32xf32> to vector<1x32xf32>
    %534 = vector.broadcast %533 : vector<1x32xf32> to vector<17x32xf32>
    %535 = arith.addf %531, %534 : vector<17x32xf32>
    %536 = arith.addf %480, %535 : vector<17x32xf32>
    %c0_388 = arith.constant 0 : index
    %c0_389 = arith.constant 0 : index
    %537 = vector.load %arg20[%c0_388, %c0_389] : memref<1x32xf32, #tpu.memory_space<vmem>>, vector<1x32xf32>
    %c0_390 = arith.constant 0 : index
    %c0_391 = arith.constant 0 : index
    %538 = vector.load %arg21[%c0_390, %c0_391] : memref<1x32xf32, #tpu.memory_space<vmem>>, vector<1x32xf32>
    %cst_392 = arith.constant dense<0.000000e+00> : vector<17xf32>
    %539 = vector.multi_reduction <add>, %536, %cst_392 [1] : vector<17x32xf32> to vector<17xf32>
    %540 = vector.shape_cast %539 : vector<17xf32> to vector<17x1xf32>
    %cst_393 = arith.constant 3.200000e+01 : f32
    %541 = vector.broadcast %cst_393 : f32 to vector<17x1xf32>
    %542 = arith.divf %540, %541 : vector<17x1xf32>
    %543 = vector.broadcast %542 : vector<17x1xf32> to vector<17x32xf32>
    %544 = arith.subf %536, %543 : vector<17x32xf32>
    %545 = arith.mulf %544, %544 : vector<17x32xf32>
    %cst_394 = arith.constant dense<0.000000e+00> : vector<17xf32>
    %546 = vector.multi_reduction <add>, %545, %cst_394 [1] : vector<17x32xf32> to vector<17xf32>
    %547 = vector.shape_cast %546 : vector<17xf32> to vector<17x1xf32>
    %cst_395 = arith.constant 3.200000e+01 : f32
    %548 = vector.broadcast %cst_395 : f32 to vector<17x1xf32>
    %549 = arith.divf %547, %548 : vector<17x1xf32>
    %550 = vector.broadcast %542 : vector<17x1xf32> to vector<17x32xf32>
    %551 = arith.subf %536, %550 : vector<17x32xf32>
    %cst_396 = arith.constant 9.99999997E-7 : f32
    %552 = vector.broadcast %cst_396 : f32 to vector<17x1xf32>
    %553 = arith.addf %549, %552 : vector<17x1xf32>
    %554 = math.rsqrt %553 : vector<17x1xf32>
    %555 = vector.broadcast %554 : vector<17x1xf32> to vector<17x32xf32>
    %556 = arith.mulf %551, %555 : vector<17x32xf32>
    %557 = vector.broadcast %537 : vector<1x32xf32> to vector<17x32xf32>
    %558 = arith.mulf %556, %557 : vector<17x32xf32>
    %559 = vector.broadcast %538 : vector<1x32xf32> to vector<17x32xf32>
    %560 = arith.addf %558, %559 : vector<17x32xf32>
    %561 = vector.extract_strided_slice %560 {offsets = [0, 0], sizes = [1, 32], strides = [1, 1]} : vector<17x32xf32> to vector<1x32xf32>
    %562 = arith.truncf %561 : vector<1x32xf32> to vector<1x32xbf16>
    %c0_397 = arith.constant 0 : index
    %c0_398 = arith.constant 0 : index
    %563 = vector.load %arg22[%c0_397, %c0_398] : memref<32x128xbf16, #tpu.memory_space<vmem>>, vector<32x128xbf16>
    %cst_399 = arith.constant dense<0.000000e+00> : vector<1x128xf32>
    %564 = tpu.matmul %562, %563, %cst_399 {dimension_numbers = #tpu.dot_dimension_numbers<[1], [0], [0], [1], [0, 0, 1, 1], [], []>} : vector<1x32xbf16>, vector<32x128xbf16>, vector<1x128xf32> -> vector<1x128xf32>
    %c0_400 = arith.constant 0 : index
    %c0_401 = arith.constant 0 : index
    %565 = vector.load %arg23[%c0_400, %c0_401] : memref<1x128xf32, #tpu.memory_space<vmem>>, vector<1x128xf32>
    %566 = arith.addf %564, %565 : vector<1x128xf32>
    %c0_402 = arith.constant 0 : index
    %c0_403 = arith.constant 0 : index
    %c0_404 = arith.constant 0 : index
    %567 = vector.load %arg24[%c0_402, %c0_403, %c0_404] : memref<1x1x128xf32, #tpu.memory_space<vmem>>, vector<1x1x128xf32>
    %568 = vector.shape_cast %567 : vector<1x1x128xf32> to vector<1x128xf32>
    %569 = vector.shape_cast %566 : vector<1x128xf32> to vector<1x1x128xf32>
    tpu.vector_store %arg24[%c0_402, %c0_403, %c0_404], %569 {strides = array<i32>} : memref<1x1x128xf32, #tpu.memory_space<vmem>>, vector<1x1x128xf32>,
    return
  }
  func.func @transform_0(%arg0: i32) -> (i32, i32, i32) {
    %c0_i32 = arith.constant 0 : i32
    %c0_i32_0 = arith.constant 0 : i32
    %c0_i32_1 = arith.constant 0 : i32
    return %arg0, %c0_i32, %c0_i32_0 : i32, i32, i32
  }
  func.func @transform_1(%arg0: i32) -> (i32, i32, i32) {
    %c0_i32 = arith.constant 0 : i32
    %c0_i32_0 = arith.constant 0 : i32
    %c0_i32_1 = arith.constant 0 : i32
    %c0_i32_2 = arith.constant 0 : i32
    return %c0_i32, %c0_i32_0, %c0_i32_1 : i32, i32, i32
  }
  func.func @transform_2(%arg0: i32) -> (i32, i32) {
    %c0_i32 = arith.constant 0 : i32
    %c0_i32_0 = arith.constant 0 : i32
    %c0_i32_1 = arith.constant 0 : i32
    return %c0_i32, %c0_i32_0 : i32, i32
  }
  func.func @transform_3(%arg0: i32) -> (i32, i32, i32) {
    %c0_i32 = arith.constant 0 : i32
    %c0_i32_0 = arith.constant 0 : i32
    %c0_i32_1 = arith.constant 0 : i32
    %c0_i32_2 = arith.constant 0 : i32
    return %c0_i32, %c0_i32_0, %c0_i32_1 : i32, i32, i32
  }
  func.func @transform_4(%arg0: i32) -> (i32, i32, i32) {
    %c0_i32 = arith.constant 0 : i32
    %c0_i32_0 = arith.constant 0 : i32
    %c0_i32_1 = arith.constant 0 : i32
    %c0_i32_2 = arith.constant 0 : i32
    return %c0_i32, %c0_i32_0, %c0_i32_1 : i32, i32, i32
  }
  func.func @transform_5(%arg0: i32) -> (i32, i32, i32, i32) {
    %c0_i32 = arith.constant 0 : i32
    %c0_i32_0 = arith.constant 0 : i32
    %c0_i32_1 = arith.constant 0 : i32
    %c0_i32_2 = arith.constant 0 : i32
    %c0_i32_3 = arith.constant 0 : i32
    return %c0_i32, %c0_i32_0, %c0_i32_1, %c0_i32_2 : i32, i32, i32, i32
  }
  func.func @transform_6(%arg0: i32) -> (i32, i32, i32, i32) {
    %c0_i32 = arith.constant 0 : i32
    %c0_i32_0 = arith.constant 0 : i32
    %c0_i32_1 = arith.constant 0 : i32
    %c0_i32_2 = arith.constant 0 : i32
    %c0_i32_3 = arith.constant 0 : i32
    return %c0_i32, %c0_i32_0, %c0_i32_1, %c0_i32_2 : i32, i32, i32, i32
  }
  func.func @transform_7(%arg0: i32) -> (i32, i32, i32, i32) {
    %c0_i32 = arith.constant 0 : i32
    %c0_i32_0 = arith.constant 0 : i32
    %c0_i32_1 = arith.constant 0 : i32
    %c0_i32_2 = arith.constant 0 : i32
    %c0_i32_3 = arith.constant 0 : i32
    return %c0_i32, %c0_i32_0, %c0_i32_1, %c0_i32_2 : i32, i32, i32, i32
  }
  func.func @transform_8(%arg0: i32) -> (i32, i32, i32, i32) {
    %c0_i32 = arith.constant 0 : i32
    %c0_i32_0 = arith.constant 0 : i32
    %c0_i32_1 = arith.constant 0 : i32
    %c0_i32_2 = arith.constant 0 : i32
    %c0_i32_3 = arith.constant 0 : i32
    return %c0_i32, %c0_i32_0, %c0_i32_1, %c0_i32_2 : i32, i32, i32, i32
  }
  func.func @transform_9(%arg0: i32) -> (i32, i32, i32, i32) {
    %c0_i32 = arith.constant 0 : i32
    %c0_i32_0 = arith.constant 0 : i32
    %c0_i32_1 = arith.constant 0 : i32
    %c0_i32_2 = arith.constant 0 : i32
    %c0_i32_3 = arith.constant 0 : i32
    return %c0_i32, %c0_i32_0, %c0_i32_1, %c0_i32_2 : i32, i32, i32, i32
  }
  func.func @transform_10(%arg0: i32) -> (i32, i32, i32, i32) {
    %c0_i32 = arith.constant 0 : i32
    %c0_i32_0 = arith.constant 0 : i32
    %c0_i32_1 = arith.constant 0 : i32
    %c0_i32_2 = arith.constant 0 : i32
    %c0_i32_3 = arith.constant 0 : i32
    return %c0_i32, %c0_i32_0, %c0_i32_1, %c0_i32_2 : i32, i32, i32, i32
  }
  func.func @transform_11(%arg0: i32) -> (i32, i32, i32, i32) {
    %c0_i32 = arith.constant 0 : i32
    %c0_i32_0 = arith.constant 0 : i32
    %c0_i32_1 = arith.constant 0 : i32
    %c0_i32_2 = arith.constant 0 : i32
    %c0_i32_3 = arith.constant 0 : i32
    return %c0_i32, %c0_i32_0, %c0_i32_1, %c0_i32_2 : i32, i32, i32, i32
  }
  func.func @transform_12(%arg0: i32) -> (i32, i32, i32) {
    %c0_i32 = arith.constant 0 : i32
    %c0_i32_0 = arith.constant 0 : i32
    %c0_i32_1 = arith.constant 0 : i32
    %c0_i32_2 = arith.constant 0 : i32
    return %c0_i32, %c0_i32_0, %c0_i32_1 : i32, i32, i32
  }
  func.func @transform_13(%arg0: i32) -> (i32, i32, i32) {
    %c0_i32 = arith.constant 0 : i32
    %c0_i32_0 = arith.constant 0 : i32
    %c0_i32_1 = arith.constant 0 : i32
    %c0_i32_2 = arith.constant 0 : i32
    return %c0_i32, %c0_i32_0, %c0_i32_1 : i32, i32, i32
  }
  func.func @transform_14(%arg0: i32) -> (i32, i32, i32) {
    %c0_i32 = arith.constant 0 : i32
    %c0_i32_0 = arith.constant 0 : i32
    %c0_i32_1 = arith.constant 0 : i32
    %c0_i32_2 = arith.constant 0 : i32
    return %c0_i32, %c0_i32_0, %c0_i32_1 : i32, i32, i32
  }
  func.func @transform_15(%arg0: i32) -> (i32, i32, i32) {
    %c0_i32 = arith.constant 0 : i32
    %c0_i32_0 = arith.constant 0 : i32
    %c0_i32_1 = arith.constant 0 : i32
    %c0_i32_2 = arith.constant 0 : i32
    return %c0_i32, %c0_i32_0, %c0_i32_1 : i32, i32, i32
  }
  func.func @transform_16(%arg0: i32) -> (i32, i32, i32) {
    %c0_i32 = arith.constant 0 : i32
    %c0_i32_0 = arith.constant 0 : i32
    %c0_i32_1 = arith.constant 0 : i32
    %c0_i32_2 = arith.constant 0 : i32
    return %c0_i32, %c0_i32_0, %c0_i32_1 : i32, i32, i32
  }
  func.func @transform_17(%arg0: i32) -> (i32, i32, i32) {
    %c0_i32 = arith.constant 0 : i32
    %c0_i32_0 = arith.constant 0 : i32
    %c0_i32_1 = arith.constant 0 : i32
    %c0_i32_2 = arith.constant 0 : i32
    return %c0_i32, %c0_i32_0, %c0_i32_1 : i32, i32, i32
  }
  func.func @transform_18(%arg0: i32) -> (i32, i32, i32) {
    %c0_i32 = arith.constant 0 : i32
    %c0_i32_0 = arith.constant 0 : i32
    %c0_i32_1 = arith.constant 0 : i32
    %c0_i32_2 = arith.constant 0 : i32
    return %c0_i32, %c0_i32_0, %c0_i32_1 : i32, i32, i32
  }
  func.func @transform_19(%arg0: i32) -> (i32, i32) {
    %c0_i32 = arith.constant 0 : i32
    %c0_i32_0 = arith.constant 0 : i32
    %c0_i32_1 = arith.constant 0 : i32
    return %c0_i32, %c0_i32_0 : i32, i32
  }
  func.func @transform_20(%arg0: i32) -> (i32, i32) {
    %c0_i32 = arith.constant 0 : i32
    %c0_i32_0 = arith.constant 0 : i32
    %c0_i32_1 = arith.constant 0 : i32
    return %c0_i32, %c0_i32_0 : i32, i32
  }
  func.func @transform_21(%arg0: i32) -> (i32, i32) {
    %c0_i32 = arith.constant 0 : i32
    %c0_i32_0 = arith.constant 0 : i32
    %c0_i32_1 = arith.constant 0 : i32
    return %c0_i32, %c0_i32_0 : i32, i32
  }
  func.func @transform_22(%arg0: i32) -> (i32, i32) {
    %c0_i32 = arith.constant 0 : i32
    %c0_i32_0 = arith.constant 0 : i32
    %c0_i32_1 = arith.constant 0 : i32
    return %c0_i32, %c0_i32_0 : i32, i32
  }
  func.func @transform_23(%arg0: i32) -> (i32, i32, i32) {
    %c0_i32 = arith.constant 0 : i32
    %c0_i32_0 = arith.constant 0 : i32
    %c0_i32_1 = arith.constant 0 : i32
    return %arg0, %c0_i32, %c0_i32_0 : i32, i32, i32
  }
}

</mosaic_0001>

<bundles_post_ra>
// kernel: finetune_vit_forward.1
= control target key start
LH: loop header
LB: loop body
LE: loop exit
PB: predicated region body
PF: predicated region fallthrough
CT: control target
= control target key end

     0   :  { %s7645_s0 = inlined_call_operand.vmem [shape: bf16[2,17,64], index: 0, kind: input, shape index: {}]   ;;  %s7646_s1 = inlined_call_operand.vmem [shape: f32[1,17,32], index: 1, kind: input, shape index: {}]   ;;  %s7647_s2 = inlined_call_operand.vmem [shape: bf16[64,32], index: 2, kind: input, shape index: {}]   ;;  %s7648_s3 = inlined_call_operand.vmem [shape: f32[2,1,32], index: 3, kind: input, shape index: {}]   ;;  %s7649_s4 = inlined_call_operand.vmem [shape: f32[2,1,32], index: 4, kind: input, shape index: {}]   ;;  %s7650_s5 = inlined_call_operand.vmem [shape: bf16[2,4,32,8], index: 5, kind: input, shape index: {}]   ;;  %s7651_s6 = inlined_call_operand.vmem [shape: f32[2,4,1,8], index: 6, kind: input, shape index: {}]   ;;  %s7652_s7 = inlined_call_operand.vmem [shape: bf16[2,4,32,8], index: 7, kind: input, shape index: {}]   ;;  %s7653_s8 = inlined_call_operand.vmem [shape: f32[2,4,1,8], index: 8, kind: input, shape index: {}]   ;;  %s7654_s9 = inlined_call_operand.vmem [shape: bf16[2,4,32,8], index: 9, kind: input, shape index: {}]   ;;  %s7655_s10 = inlined_call_operand.vmem [shape: f32[2,4,1,8], index: 10, kind: input, shape index: {}]   ;;  %s7656_s11 = inlined_call_operand.vmem [shape: bf16[2,4,8,32], index: 11, kind: input, shape index: {}]   ;;  %s7657_s12 = inlined_call_operand.vmem [shape: f32[2,1,32], index: 12, kind: input, shape index: {}]   ;;  %s7658_s13 = inlined_call_operand.vmem [shape: f32[2,1,32], index: 13, kind: input, shape index: {}]   ;;  %s7659_s14 = inlined_call_operand.vmem [shape: f32[2,1,32], index: 14, kind: input, shape index: {}]   ;;  %s7660_s15 = inlined_call_operand.vmem [shape: bf16[2,32,128], index: 15, kind: input, shape index: {}]   ;;  %s7661_s16 = inlined_call_operand.vmem [shape: f32[2,1,128], index: 16, kind: input, shape index: {}]   ;;  %s7662_s17 = inlined_call_operand.vmem [shape: bf16[2,128,32], index: 17, kind: input, shape index: {}]   ;;  %s7663_s18 = inlined_call_operand.vmem [shape: f32[2,1,32], index: 18, kind: input, shape index: {}]   ;;  %s7664_s19 = inlined_call_operand.vmem [shape: f32[1,32], index: 19, kind: input, shape index: {}]   ;;  %s7665_s20 = inlined_call_operand.vmem [shape: f32[1,32], index: 20, kind: input, shape index: {}]   ;;  %s7666_s21 = inlined_call_operand.vmem [shape: bf16[32,128], index: 21, kind: input, shape index: {}]   ;;  %s7667_s22 = inlined_call_operand.vmem [shape: f32[1,128], index: 22, kind: input, shape index: {}]   ;;  %s7668_s23 = inlined_call_operand.hbm [shape: f32[2,1,128], index: 23, kind: output, shape index: {}]  }
   0x1   :  { %7687 = sst [smem:[#allocation11_spill]] %s7645_s0 }
   0x2   :  { %7688 = sst [smem:[#allocation12_spill]] %s7646_s1 }
   0x3   :  { %7689 = sst [smem:[#allocation13_spill]] %s7647_s2 }
   0x4   :  { %7690 = sst [smem:[#allocation14_spill]] %s7648_s3 }
   0x5   :  { %7691 = sst [smem:[#allocation15_spill]] %s7649_s4 }
   0x6   :  { %7692 = sst [smem:[#allocation16_spill]] %s7650_s5 }
   0x7   :  { %7693 = sst [smem:[#allocation17_spill]] %s7651_s6 }
   0x8   :  { %7694 = sst [smem:[#allocation18_spill]] %s7652_s7 }
   0x9   :  { %7695 = sst [smem:[#allocation19_spill]] %s7653_s8 }
   0xa   :  { %7696 = sst [smem:[#allocation20_spill]] %s7654_s9 }
   0xb   :  { %7697 = sst [smem:[#allocation21_spill]] %s7668_s23 }
   0xc   :  { %28 = vsyncpa [#allocation3], 0 }
   0xd   :  { %30 = vsyncpa [#allocation3 + $0x1], 0  ;;  %s6749_s4 = smov 0   ;;  %s6751_s30 = smov 0  }
   0xe   :  { %s6753_s24 = smov 0   ;;  %s6755_s25 = smov 0  }
   0xf LB: > { %7698 = sst [smem:[#allocation5_spill]] %s6611_s4  ;;  %s6770_s5 = sadd.s32 4294967295, %s6623_s25   ;;  %s6623_s25 = sphi %s6755_s25, %s7723_s25   ;;  %s6619_s24 = sphi %s6753_s24, %s7725_s24   ;;  %s6615_s30 = sphi %s6751_s30, %s7727_s30   ;;  %s6611_s4 = sphi %s6749_s4, %s7726_s4  }
  0x10   : > { %7699 = sst [smem:[#allocation6_spill]] %s6619_s24  ;;  %s5255_s1 = sadd.s32 4294967294, %s6623_s25  }
  0x11   : > { %7700 = sst [smem:[#allocation7_spill]] %s6623_s25  ;;  %s6774_s26 = sadd.s32 1, %s6623_s25  }
  0x12   : > { %7701 = sst [smem:[#allocation8_spill]] %s6774_s26  ;;  %s531_s2 = sadd.s32 1, %s6619_s24 }
  0x13   : > { %s528_s6 = ssub.s32 %s6623_s25, %s6774_s26  ;;  %p541_p0 = scmp.ne.s32.totalorder %s6619_s24, %s6615_s30 }
  0x14   : > { %p529_p1 = scmp.eq.s32.totalorder %s528_s6, 0  ;;  %p542_p2 = scmp.eq.s32.totalorder %s6770_s5, 1 }
  0x15   : > { %p547_p3 = scmp.ne.s32.totalorder %s6615_s30, %s6611_s4  ;;  %p548_p4 = scmp.eq.s32.totalorder %s5255_s1, 1 }
  0x16   : > { %s6785_s27 = scalar_select %p529_p1, %s6619_s24, %s531_s2  }
  0x17   : > { %p6787_p5 = por %p542_p2, %p541_p0  ;;  %p6791_p6 = por %p548_p4, %p547_p3 }
  0x18   : > { %7702 = sst [smem:[#allocation9_spill]] %s6785_s27  ;;  %p5258_p7 = scmp.ge.s32.totalorder %s6623_s25, 1 }
  0x19   : > { %s7704_s28 = scalar_select %p6791_p6, 1, 0 }
  0x1a   : > { %p640_p8 = scmp.lt.s32.totalorder %s6623_s25, 3 }
  0x1b   : > { %7705 = sst [smem:[#allocation10_spill]] %s7704_s28 }
  0x1c   : > { %p641_p9 = pnand %p5258_p7, %p640_p8 }
  0x1d   : > { %s7706_s0 = sld [smem:[#allocation13_spill]] (!%p641_p9)  ;;  %p703_p10 = scmp.lt.s32.totalorder (!%p641_p9), %s6770_s5, 1 }
  0x1e   : > { %644 = sbr.rel (%p641_p9) target bundleno = 10380 (0x288c), region = 112  ;;  %s7707_s3 = sld [smem:[#allocation11_spill]] (!%p641_p9) }
  0x1f   : > { %s7708_s1 = sld [smem:[#allocation12_spill]] (!%p641_p9) }
  0x20   : > { %s7710_s9 = sld [smem:[#allocation20_spill]] (!%p641_p9) }
  0x21   : > { %s7711_s25 = sld [smem:[#allocation18_spill]] (!%p641_p9) }
  0x22   : > { %s7713_s24 = sld [smem:[#allocation14_spill]] (!%p641_p9) }
  0x23   : > { %v6353_v0 = vld [vmem:[%s7706_s0 + $0x18] sm:$0xff]   ;;  %v6354_v1 = vld [vmem:[%s7706_s0 + $0x10] sm:$0xff]   ;;  %s704_s6 = scalar_select %p703_p10, %s6770_s5, 1  ;;  %v6355_v2 = vld [vmem:[%s7706_s0 + $0x8] sm:$0xff]   ;;  %vm755_vm0 = vcmask 523264   ;;  %vm819_vm1 = vcmask 253952  }
  0x24   : > { %5842 = vmatprep.subr.bf16.mxu1 %v6353_v0  ;;  %v6356_v3 = vld [vmem:[%s7706_s0] sm:$0xff]   ;;  %vm812_vm2 = vcmask 261120   ;;  %s7715_s23 = sld [smem:[#allocation15_spill]]  ;;  %vm1206_vm3 = vcmask 1040384   ;;  %vm1097_vm4 = vcmask 64512   ;;  %vm1161_vm5 = vcmask 138240  }
  0x25   : > { %5843 = vmatpush3.bf16.msra.mxu1 %v6353_v0  ;;  %s6310_s26 = smul.u32 12, %s704_s6  ;;  %v722_v6 = vld [vmem:[%s7708_s1 + $0x10] sm:$0x1]  ;;  %v720_v8 = vld [vmem:[%s7708_s1] sm:$0xff]  ;;  %v721_v14 = vld [vmem:[%s7708_s1 + $0x8] sm:$0xff]  ;;  %s7709_s6 = sld [smem:[#allocation16_spill]] }
  0x26   : > { %5844 = vmatprep.subr.bf16.mxu1 %v6354_v1  ;;  %v6360_v35 = vld [vmem:[%s7710_s9 + $0x8] sm:$0xff]   ;;  %v6362_v37 = vld [vmem:[%s7710_s9] sm:$0xff]   ;;  %s7717_s8 = sld [smem:[#allocation19_spill]]  ;;  %vm1168_vm6 = vcmask 131072   ;;  %vm1653_vm7 = vcmask 1043456   ;;  %vm6627_vm8 = vmmov 0  }
  0x27   : > { %s707_s4 = scalar_lea.vmem %s7707_s3, %s6310_s26  ;;  %5870 = vmatprep.subr.bf16.mxu0 %v6360_v35  ;;  %s7712_s2 = smov %s7711_s25  ;;  %v6363_v38 = vld [vmem:[%s7711_s25 + $0x8] sm:$0xff]  }
  0x28   : > { %v6357_v4 = vld [vmem:[%s707_s4] sm:$0xff]   ;;  %v6358_v5 = vld [vmem:[%s707_s4 + $0x8] ss:$0 sps:$4 sm:$0x11]   ;;  %5871 = vmatpush3.bf16.msra.mxu0 %v6360_v35  ;;  %s7714_s27 = smov %s7713_s24  ;;  %s7716_s26 = sld [smem:[#allocation17_spill]] }
  0x29   : > { %5845 = vmatpush3.bf16.msra.mxu1 %v6354_v1  ;;  %5850 = vmatprep.mubr.msk.bf16.mxu1 %vm755_vm0, %v6357_v4  ;;  %v5268_v50 = vld [vmem:[%s7713_s24] ss:$0 sm:$0xff]  ;;  %s701_s0 = sand.u32 1, %s6615_s30   ;;  %s5618_s3 = sshll.u32 %s6770_s5, 4 }
  0x2a   : > { %5846 = vmatprep.subr.bf16.mxu1 %v6355_v2  ;;  %5872 = vmatprep.subr.bf16.mxu0 %v6362_v37  ;;  %v5269_v56 = vld [vmem:[%s7715_s23] ss:$0 sm:$0xff]  ;;  %s7718_s4 = sld [smem:[#allocation21_spill]]  ;;  %s5188_s1 = scalar_lea.sflag [#allocation3], %s701_s0 }
  0x2b   : > { %v6359_v34 = vld [vmem:[%s7709_s6 + $0x8] sm:$0xff]   ;;  %v6361_v36 = vld [vmem:[%s7709_s6] sm:$0xff]   ;;  %s6628_s5 = smov [#allocation2]  }
  0x2c   : > { %5873 = vmatpush3.bf16.msra.mxu0 %v6362_v37  ;;  %v6364_v0 = vld [vmem:[%s7712_s2] sm:$0xff]  }
  0x2d   : > { %5847 = vmatpush3.bf16.msra.mxu1 %v6355_v2  ;;  %v5280_v1 = vld [vmem:[%s7655_s10] ss:$0 sm:$0xff] }
  0x2e   : > { %5848 = vmatprep.subr.bf16.mxu1 %v6356_v3 }
  0x30   : > { %s7604_s25 = scalar_lea.hbm %s7718_s4, %s5618_s3 }
  0x31   : > { %5849 = vmatpush3.bf16.msra.mxu1 %v6356_v3 }
  0x32   : > { %5854 = vmatprep.subr.bf16.mxu1 %v6359_v34 }
  0x34   : > { %5851 = vmatmul.mubr.msk.bf16.vlgmr.msra.gmra.mxu1 %vm755_vm0, %v6358_v5  ;;  %v6625_v5 = vmov 0  }
  0x35   : > { %5855 = vmatpush3.bf16.msra.mxu1 %v6359_v34 }
  0x36   : > { %5856 = vmatprep.subr.bf16.mxu1 %v6361_v36 }
  0x39   : > { %5857 = vmatpush3.bf16.msra.mxu1 %v6361_v36  ;;  %v6365_v36 = vld [vmem:[%s7712_s2 + $0x18] sm:$0xff]  }
  0x3a   : > { %5862 = vmatprep.subr.bf16.mxu1 %v6363_v38 }
  0xf4   : > { %v5852_v7 = vpop.f32.mrf.mxu1 }
  0xf5   : > { %v6820_v9 = vadd.f32 %v5852_v7, %v722_v6  ;;  %v6884_v6 = vsel %vm1206_vm3, 65535, %v6625_v5 }
  0xf6   : > { %v796_v10 = vpop.f32.mrf.mxu1 }
  0xf7   : > { %v6822_v11 = vadd.f32 %v796_v10, %v720_v8  ;;  %v820_v12 = vsel %vm819_vm1, %v6820_v9, 0.0 }
  0xf8   : > { %821 = vadd.xlane.f32.xlu1 %v820_v12  ;;  %v5853_v13 = vpop.f32.mrf.mxu1 }
  0xf9   : > { %v813_v15 = vsel %vm812_vm2, %v6822_v11, 0.0 }
  0xfa   : > { %v799_v16 = vpop.f32.mrf.mxu1  ;;  %814 = vadd.xlane.f32.xlu0 %v813_v15  ;;  %v5270_v15 = vld [vmem:[%s7716_s26] ss:$0 sm:$0xff] }
  0xfb   : > { %v6831_v17 = vadd.f32 %v799_v16, %v721_v14 }
  0xfd   : > { %v816_v18 = vsel %vm812_vm2, %v6831_v17, 0.0 }
  0xfe   : > { %817 = vadd.xlane.f32.xlu0 %v816_v18 }
 0x181   : > { %v822_v19 = vpop.xlane.xlu1 %821 }
 0x182   : > { %v826_v20 = vmul.f32 0.03125, %v822_v19  ;;  %v5275_v19 = vld [vmem:[%s7717_s8] ss:$0 sm:$0xff] }
 0x183   : > { %v815_v21 = vpop.xlane.xlu0 %814 }
 0x184   : > { %v824_v22 = vmul.f32 0.03125, %v815_v21  ;;  %v829_v23 = vsub.f32 %v6820_v9, %v826_v20 }
 0x186   : > { %v827_v24 = vsub.f32 %v6822_v11, %v824_v22  ;;  %v832_v30 = vmul.f32 %v829_v23, %v829_v23 }
 0x187   : > { %v818_v25 = vpop.xlane.xlu0 %817 }
 0x188   : > { %v825_v26 = vmul.f32 0.03125, %v818_v25  ;;  %v830_v27 = vmul.f32 %v827_v24, %v827_v24  ;;  %v839_v32 = vsel %vm819_vm1, %v832_v30, 0.0 }
 0x18a   : > { %v828_v28 = vsub.f32 %v6831_v17, %v825_v26  ;;  %v833_v29 = vsel %vm812_vm2, %v830_v27, 0.0 }
 0x18b   : > { %834 = vadd.xlane.f32.xlu1 %v833_v29 }
 0x18c   : > { %v831_v31 = vmul.f32 %v828_v28, %v828_v28 }
 0x18e   : > { %v836_v33 = vsel %vm812_vm2, %v831_v31, 0.0 }
 0x18f   : > { %840 = vadd.xlane.f32.xlu1 %v839_v32  ;;  %837 = vadd.xlane.f32.xlu0 %v836_v33 }
 0x214   : > { %v835_v39 = vpop.xlane.xlu1 %834 }
 0x215   : > { %v842_v40 = vmul.f32 0.03125, %v835_v39 }
 0x217   : > { %v845_v41 = vadd.f32 1e-06, %v842_v40  ;;  %v6366_v40 = vld [vmem:[%s7712_s2 + $0x10] sm:$0xff]  }
 0x218   : > { %v841_v42 = vpop.xlane.xlu1 %840  ;;  %v838_v43 = vpop.xlane.xlu0 %837 }
 0x219   : > { %6429 = vrsqrt.f32 %v845_v41  ;;  %v844_v44 = vmul.f32 0.03125, %v841_v42  ;;  %v843_v45 = vmul.f32 0.03125, %v838_v43 }
 0x21b   : > { %v847_v46 = vadd.f32 1e-06, %v844_v44  ;;  %v846_v47 = vadd.f32 1e-06, %v843_v45 }
 0x21d   : > { %6431 = vrsqrt.f32 %v847_v46 }
 0x21e   : > { %6433 = vrsqrt.f32 %v846_v47 }
 0x226   : > { %v6430_v48 = vpop.eup %6429 }
 0x227   : > { %v851_v49 = vmul.f32 %v6430_v48, %v827_v24  ;;  %v5304_v48 = vld [vmem:[%s7717_s8 + $0x1] ss:$0 sm:$0xff] }
 0x229   : > { %v860_v54 = vmul.f32 %v5268_v50, %v851_v49 }
 0x22a   : > { %v6432_v51 = vpop.eup %6431 }
 0x22b   : > { %v6434_v52 = vpop.eup %6433  ;;  %v853_v53 = vmul.f32 %v6432_v51, %v829_v23  ;;  %v869_v60 = vadd.f32 %v5269_v56, %v860_v54 }
 0x22c   : > { %v852_v55 = vmul.f32 %v6434_v52, %v828_v28 }
 0x22d   : > { %v862_v57 = vmul.f32 %v5268_v50, %v853_v53 }
 0x22e   : > { %v861_v58 = vmul.f32 %v5268_v50, %v852_v55 }
 0x22f   : > { %v871_v59 = vadd.f32 %v5269_v56, %v862_v57 }
 0x230   : > { %v870_v61 = vadd.f32 %v5269_v56, %v861_v58 }
 0x231   : > { %v6862_v62 = vpack.c.bf16 %v871_v59, %v871_v59 }
 0x232   : > { %v6864_v63 = vpack.c.bf16 %v870_v61, %v869_v60 }
 0x234   : > { %5858 = vmatprep.mubr.msk.bf16.mxu1 %vm812_vm2, %v6864_v63  ;;  %5874 = vmatprep.mubr.msk.bf16.mxu0 %vm812_vm2, %v6864_v63 }
 0x235   : > { %5859 = vmatmul.mubr.msk.bf16.vlgmr.msra.gmra.mxu1 %vm812_vm2, %v6862_v62  ;;  %5875 = vmatmul.mubr.msk.bf16.vlgmr.msra.gmra.mxu0 %vm812_vm2, %v6862_v62 }
 0x236   : > { %5863 = vmatpush3.bf16.msra.mxu1 %v6363_v38  ;;  %5866 = vmatprep.mubr.msk.bf16.mxu1 %vm812_vm2, %v6864_v63 }
 0x237   : > { %5864 = vmatprep.subr.bf16.mxu1 %v6364_v0 }
 0x23a   : > { %5865 = vmatpush3.bf16.msra.mxu1 %v6364_v0 }
 0x23d   : > { %5867 = vmatmul.mubr.msk.bf16.vlgmr.msra.gmra.mxu1 %vm812_vm2, %v6862_v62 }
 0x2f5   : > { %v5860_v2 = vpop.f32.mrf.mxu1  ;;  %v5876_v3 = vpop.f32.mrf.mxu0 }
 0x2f6   : > { %v1088_v4 = vadd.f32 %v5876_v3, %v5280_v1  ;;  %v946_v38 = vadd.f32 %v5860_v2, %v5270_v15 }
 0x2f7   : > { %v937_v7 = vpop.f32.mrf.mxu1  ;;  %v1079_v8 = vpop.f32.mrf.mxu0 }
 0x2f8   : > { %v1199_v10 = vpack.c.bf16 %v1088_v4, %v1088_v4  ;;  %v938_v20 = vadd.f32 %v5270_v15, %v937_v7  ;;  %v1080_v21 = vadd.f32 %v5280_v1, %v1079_v8  ;;  %v1094_v39 = vpack.c.bf16 %v946_v38, %v946_v38 }
 0x2f9   : > { %v5861_v12 = vpop.f32.mrf.mxu1  ;;  %v5877_v13 = vpop.f32.mrf.mxu0 }
 0x2fa   : > { %v1210_v14 = vand.u32 %v6884_v6, %v1199_v10 }
 0x2fb   : > { %v940_v16 = vpop.f32.mrf.mxu1  ;;  %v1082_v18 = vpop.f32.mrf.mxu0 }
 0x2fc   : > { %v941_v22 = vadd.f32 %v5270_v15, %v940_v16  ;;  %v1083_v23 = vadd.f32 %v5280_v1, %v1082_v18  ;;  %5886 = vmatprep.subr.bf16.mxu0 %v1210_v14 }
 0x2fd   : > { %v5868_v24 = vpop.f32.mrf.mxu1  ;;  %5887 = vmatpush3.bf16.msra.mxu0 %v1210_v14 }
 0x2fe   : > { %v1093_v25 = vpack.c.bf16 %v941_v22, %v938_v20  ;;  %v1198_v26 = vpack.c.bf16 %v1083_v23, %v1080_v21  ;;  %v1017_v27 = vadd.f32 %v5868_v24, %v5275_v19  ;;  %v6367_v20 = vld [vmem:[%s7709_s6 + $0x18] sm:$0xff]  }
 0x2ff   : > { %v1008_v28 = vpop.f32.mrf.mxu1 }
 0x300   : > { %v1096_v29 = vpack.c.bf16 %v1017_v27, %v1017_v27  ;;  %5882 = vmatprep.mubr.msk.bf16.mxu1 %vm1097_vm4, %v1093_v25  ;;  %5888 = vmatprep.subr.bf16.mxu0 %v1198_v26  ;;  %v1009_v33 = vadd.f32 %v5275_v19, %v1008_v28 }
 0x301   : > { %v5869_v30 = vpop.f32.mrf.mxu1  ;;  %5889 = vmatpush3.bf16.msra.mxu0 %v1198_v26 }
 0x302   : > { %v1108_v31 = vsel %vm1097_vm4, %v1096_v29, 0  ;;  %6286 = vmatprep.subr.msk.bf16.mxu1 %vm1097_vm4, %v1096_v29  ;;  %5894 = vmatprep.subr.bf16.mxu0 %v6367_v20 }
 0x303   : > { %v1011_v32 = vpop.f32.mrf.mxu1  ;;  %5879 = vmatpush3.bf16.xpose.msra.mxu1 %v1108_v31 }
 0x304   : > { %v1012_v34 = vadd.f32 %v5275_v19, %v1011_v32  ;;  %v6368_v32 = vld [vmem:[%s7709_s6 + $0x10] sm:$0xff]  }
 0x306   : > { %v1095_v35 = vpack.c.bf16 %v1012_v34, %v1009_v33  ;;  %v6369_v33 = vld [vmem:[%s7710_s9 + $0x18] sm:$0xff]   ;;  %v6370_v34 = vld [vmem:[%s7710_s9 + $0x10] sm:$0xff]  }
 0x308   : > { %6287 = vmatprep.subr.msk.bf16.mxu1 %vm1097_vm4, %v1095_v35  ;;  %v1105_v37 = vsel %vm1097_vm4, %v1095_v35, 0  ;;  %v1262_v35 = vld [vmem:[%s7656_s11] sm:$0xf] }
 0x30b   : > { %5881 = vmatpush3.bf16.xpose.msra.mxu1 %v1105_v37 }
 0x30c   : > { %5902 = vmatprep.subr.bf16.mxu1 %v6365_v36 }
 0x312   : > { %5883 = vmatmul.mubr.msk.bf16.vlgmr.msra.gmra.mxu1 %vm1097_vm4, %v1094_v39 }
 0x313   : > { %5903 = vmatpush3.bf16.msra.mxu1 %v6365_v36  ;;  %5906 = vmatprep.mubr.msk.bf16.mxu1 %vm812_vm2, %v6864_v63 }
 0x314   : > { %5904 = vmatprep.subr.bf16.mxu1 %v6366_v40 }
 0x317   : > { %5905 = vmatpush3.bf16.msra.mxu1 %v6366_v40 }
 0x31a   : > { %5907 = vmatmul.mubr.msk.bf16.vlgmr.msra.gmra.mxu1 %vm812_vm2, %v6862_v62 }
 0x3d2   : > { %v5884_v41 = vpop.f32.mrf.mxu1 }
 0x3d3   : > { %v1160_v45 = vmul.f32 0.35355338, %v5884_v41 }
 0x3d4   : > { %v1144_v42 = vpop.f32.mrf.mxu1 }
 0x3d5   : > { %v1158_v43 = vmul.f32 0.35355338, %v1144_v42  ;;  %v1169_v52 = vsel %vm1168_vm6, %v1160_v45, -inf  ;;  %v5294_v42 = vld [vmem:[%s7716_s26 + $0x1] ss:$0 sm:$0xff] }
 0x3d6   : > { %v5885_v44 = vpop.f32.mrf.mxu1 }
 0x3d7   : > { %v1162_v46 = vsel %vm1161_vm5, %v1158_v43, -inf }
 0x3d8   : > { %1163 = vmax.xlane.f32.xlu0 %v1162_v46  ;;  %v1147_v47 = vpop.f32.mrf.mxu1  ;;  %v5314_v46 = vld [vmem:[%s7655_s10 + $0x1] ss:$0 sm:$0xff] }
 0x3d9   : > { %v1159_v49 = vmul.f32 0.35355338, %v1147_v47 }
 0x3da   : > { %v5908_v50 = vpop.f32.mrf.mxu1 }
 0x3db   : > { %v1404_v51 = vadd.f32 %v5908_v50, %v5304_v48  ;;  %v1165_v53 = vsel %vm1161_vm5, %v1159_v49, -inf }
 0x3dc   : > { %1170 = vmax.xlane.f32.xlu0 %v1169_v52  ;;  %v1395_v54 = vpop.f32.mrf.mxu1  ;;  %1166 = vmax.xlane.f32.xlu1 %v1165_v53 }
 0x3dd   : > { %v1485_v55 = vpack.c.bf16 %v1404_v51, %v1404_v51  ;;  %v1396_v59 = vadd.f32 %v5304_v48, %v1395_v54  ;;  %v1712_v54 = vsel %vm1653_vm7, %v1262_v35, 0 }
 0x3de   : > { %v5909_v56 = vpop.f32.mrf.mxu1 }
 0x3df   : > { %v1496_v57 = vsel %vm1097_vm4, %v1485_v55, 0  ;;  %6288 = vmatprep.subr.msk.bf16.mxu1 %vm1097_vm4, %v1485_v55  ;;  %v6371_v55 = vld [vmem:[%s7712_s2 + $0x28] sm:$0xff]  }
 0x3e0   : > { %v1398_v58 = vpop.f32.mrf.mxu1  ;;  %5919 = vmatpush3.bf16.xpose.msra.mxu1 %v1496_v57 }
 0x3e1   : > { %v1399_v60 = vadd.f32 %v5304_v48, %v1398_v58 }
 0x3e3   : > { %v1484_v61 = vpack.c.bf16 %v1399_v60, %v1396_v59 }
 0x3e5   : > { %6289 = vmatprep.subr.msk.bf16.mxu1 %vm1097_vm4, %v1484_v61  ;;  %v1493_v0 = vsel %vm1097_vm4, %v1484_v61, 0 }
 0x3e8   : > { %5921 = vmatpush3.bf16.xpose.msra.mxu1 %v1493_v0 }
 0x3e9   : > { %6291 = vmatprep.subr.msk.bf16.mxu1 %vm1653_vm7, %v1262_v35 }
 0x461   : > { %v1164_v1 = vpop.xlane.xlu0 %1163 }
 0x462   : > { %v1172_v2 = vsub.f32 %v1158_v43, %v1164_v1 }
 0x464   : > { %v1175_v3 = vmul.f32 1.442695, %v1172_v2 }
 0x465   : > { %v1171_v4 = vpop.xlane.xlu0 %1170  ;;  %v1167_v5 = vpop.xlane.xlu1 %1166 }
 0x466   : > { %6435 = vpow2.f32 %v1175_v3  ;;  %v1174_v7 = vsub.f32 %v1160_v45, %v1171_v4  ;;  %v1173_v8 = vsub.f32 %v1159_v49, %v1167_v5  ;;  %v6372_v3 = vld [vmem:[%s7712_s2 + $0x20] sm:$0xff]  }
 0x468   : > { %v1179_v10 = vmul.f32 1.442695, %v1174_v7  ;;  %v1177_v12 = vmul.f32 1.442695, %v1173_v8 }
 0x46a   : > { %6437 = vpow2.f32 %v1179_v10 }
 0x46b   : > { %6439 = vpow2.f32 %v1177_v12 }
 0x473   : > { %v6436_v13 = vpop.eup %6435 }
 0x474   : > { %v1181_v14 = vsel %vm1161_vm5, %v6436_v13, 0.0 }
 0x475   : > { %1182 = vadd.xlane.f32.xlu1 %v1181_v14 }
 0x477   : > { %v6438_v15 = vpop.eup %6437 }
 0x478   : > { %v6440_v16 = vpop.eup %6439  ;;  %v1187_v18 = vsel %vm1168_vm6, %v6438_v15, 0.0 }
 0x479   : > { %1188 = vadd.xlane.f32.xlu1 %v1187_v18  ;;  %v1184_v19 = vsel %vm1161_vm5, %v6440_v16, 0.0 }
 0x47a   : > { %1185 = vadd.xlane.f32.xlu0 %v1184_v19 }
 0x4fe   : > { %v1183_v21 = vpop.xlane.xlu1 %1182 }
 0x4ff   : > { %6441 = vrcp.f32 %v1183_v21 }
 0x502   : > { %v1189_v22 = vpop.xlane.xlu1 %1188 }
 0x503   : > { %v1186_v23 = vpop.xlane.xlu0 %1185  ;;  %6443 = vrcp.f32 %v1189_v22  ;;  %v5343_v22 = vld [vmem:[%s7717_s8 + $0x2] ss:$0 sm:$0xff] }
 0x504   : > { %6445 = vrcp.f32 %v1186_v23 }
 0x50c   : > { %v6442_v24 = vpop.eup %6441 }
 0x50d   : > { %v1193_v28 = vmul.f32 %v6442_v24, %v6436_v13 }
 0x510   : > { %v6444_v25 = vpop.eup %6443 }
 0x511   : > { %v6446_v26 = vpop.eup %6445  ;;  %v1195_v27 = vmul.f32 %v6444_v25, %v6438_v15 }
 0x512   : > { %v1194_v29 = vmul.f32 %v6446_v26, %v6440_v16 }
 0x513   : > { %v1197_v30 = vpack.c.bf16 %v1195_v27, %v1195_v27 }
 0x514   : > { %v1196_v31 = vpack.c.bf16 %v1194_v29, %v1193_v28 }
 0x516   : > { %5890 = vmatprep.mubr.msk.bf16.mxu0 %vm1161_vm5, %v1196_v31 }
 0x517   : > { %5891 = vmatmul.mubr.msk.bf16.vlgmr.msra.gmra.mxu0 %vm1161_vm5, %v1197_v30 }
 0x518   : > { %5895 = vmatpush3.bf16.msra.mxu0 %v6367_v20  ;;  %5898 = vmatprep.mubr.msk.bf16.mxu0 %vm812_vm2, %v6864_v63 }
 0x519   : > { %5896 = vmatprep.subr.bf16.mxu0 %v6368_v32 }
 0x51c   : > { %5897 = vmatpush3.bf16.msra.mxu0 %v6368_v32 }
 0x51d   : > { %5910 = vmatprep.subr.bf16.mxu0 %v6369_v33 }
 0x51f   : > { %5899 = vmatmul.mubr.msk.bf16.vlgmr.msra.gmra.mxu0 %vm812_vm2, %v6862_v62 }
 0x520   : > { %5911 = vmatpush3.bf16.msra.mxu0 %v6369_v33  ;;  %5914 = vmatprep.mubr.msk.bf16.mxu0 %vm812_vm2, %v6864_v63 }
 0x521   : > { %5912 = vmatprep.subr.bf16.mxu0 %v6370_v34 }
 0x524   : > { %5913 = vmatpush3.bf16.msra.mxu0 %v6370_v34 }
 0x527   : > { %5915 = vmatmul.mubr.msk.bf16.vlgmr.msra.gmra.mxu0 %vm812_vm2, %v6862_v62 }
 0x5d7   : > { %v5892_v36 = vpop.f32.mrf.mxu0 }
 0x5d8   : > { %v1261_v2 = vpack.c.bf16 %v5892_v36, %v5892_v36 }
 0x5d9   : > { %v1246_v37 = vpop.f32.mrf.mxu0 }
 0x5db   : > { %v5893_v38 = vpop.f32.mrf.mxu0 }
 0x5dd   : > { %v1249_v39 = vpop.f32.mrf.mxu0 }
 0x5de   : > { %v1260_v56 = vpack.c.bf16 %v1249_v39, %v1246_v37 }
 0x5df   : > { %v5900_v40 = vpop.f32.mrf.mxu0 }
 0x5e0   : > { %v1331_v44 = vadd.f32 %v5900_v40, %v5294_v42 }
 0x5e1   : > { %v1322_v41 = vpop.f32.mrf.mxu0 }
 0x5e2   : > { %v1323_v47 = vadd.f32 %v5294_v42, %v1322_v41  ;;  %v1483_v52 = vpack.c.bf16 %v1331_v44, %v1331_v44 }
 0x5e3   : > { %v5901_v43 = vpop.f32.mrf.mxu0 }
 0x5e5   : > { %v1325_v45 = vpop.f32.mrf.mxu0 }
 0x5e6   : > { %v1326_v48 = vadd.f32 %v5294_v42, %v1325_v45 }
 0x5e7   : > { %v5916_v49 = vpop.f32.mrf.mxu0 }
 0x5e8   : > { %v1482_v50 = vpack.c.bf16 %v1326_v48, %v1323_v47  ;;  %v1477_v51 = vadd.f32 %v5916_v49, %v5314_v46 }
 0x5e9   : > { %v1468_v53 = vpop.f32.mrf.mxu0 }
 0x5ea   : > { %v1585_v57 = vpack.c.bf16 %v1477_v51, %v1477_v51  ;;  %5922 = vmatprep.mubr.msk.bf16.mxu1 %vm1097_vm4, %v1482_v50  ;;  %v1469_v61 = vadd.f32 %v5314_v46, %v1468_v53 }
 0x5eb   : > { %v5917_v58 = vpop.f32.mrf.mxu0  ;;  %5923 = vmatmul.mubr.msk.bf16.vlgmr.msra.gmra.mxu1 %vm1097_vm4, %v1483_v52 }
 0x5ec   : > { %v1593_v59 = vand.u32 %v1585_v57, %v6884_v6  ;;  %5942 = vmatprep.mubr.msk.bf16.mxu1 %vm1097_vm4, %v1260_v56  ;;  %5941 = vmatpush3.bf16.msra.mxu1 %v1712_v54 }
 0x5ed   : > { %v1471_v60 = vpop.f32.mrf.mxu0  ;;  %5954 = vmatprep.subr.bf16.mxu1 %v6371_v55 }
 0x5ee   : > { %v1472_v0 = vadd.f32 %v5314_v46, %v1471_v60  ;;  %5926 = vmatprep.subr.bf16.mxu0 %v1593_v59  ;;  %v5323_v60 = vld [vmem:[%s7656_s11 + $0x4] sm:$0xf] }
 0x5ef   : > { %5927 = vmatpush3.bf16.msra.mxu0 %v1593_v59 }
 0x5f0   : > { %v1584_v1 = vpack.c.bf16 %v1472_v0, %v1469_v61  ;;  %v1655_v61 = vsel %vm1653_vm7, %v5323_v60, 0  ;;  %v6373_v0 = vld [vmem:[%s7709_s6 + $0x28] sm:$0xff]  }
 0x5f2   : > { %5928 = vmatprep.subr.bf16.mxu0 %v1584_v1 }
 0x5f3   : > { %5929 = vmatpush3.bf16.msra.mxu0 %v1584_v1  ;;  %5943 = vmatmul.mubr.msk.bf16.vlgmr.msra.gmra.mxu1 %vm1097_vm4, %v1261_v2 }
 0x5f4   : > { %5955 = vmatpush3.bf16.msra.mxu1 %v6371_v55  ;;  %5958 = vmatprep.mubr.msk.bf16.mxu1 %vm812_vm2, %v6864_v63 }
 0x5f5   : > { %5956 = vmatprep.subr.bf16.mxu1 %v6372_v3  ;;  %6290 = vmatprep.subr.msk.bf16.mxu0 %vm1653_vm7, %v5323_v60 }
 0x5f8   : > { %5957 = vmatpush3.bf16.msra.mxu1 %v6372_v3 }
 0x5fb   : > { %5959 = vmatmul.mubr.msk.bf16.vlgmr.msra.gmra.mxu1 %vm812_vm2, %v6862_v62 }
 0x6ab   : > { %v5924_v4 = vpop.f32.mrf.mxu1 }
 0x6ac   : > { %v1548_v10 = vmul.f32 0.35355338, %v5924_v4 }
 0x6ad   : > { %v1532_v5 = vpop.f32.mrf.mxu1 }
 0x6ae   : > { %v1546_v7 = vmul.f32 0.35355338, %v1532_v5  ;;  %v1555_v16 = vsel %vm1168_vm6, %v1548_v10, -inf }
 0x6af   : > { %v5925_v8 = vpop.f32.mrf.mxu1 }
 0x6b0   : > { %v1549_v12 = vsel %vm1161_vm5, %v1546_v7, -inf  ;;  %v6374_v8 = vld [vmem:[%s7709_s6 + $0x20] sm:$0xff]  }
 0x6b1   : > { %1550 = vmax.xlane.f32.xlu0 %v1549_v12  ;;  %v1535_v13 = vpop.f32.mrf.mxu1  ;;  %v6376_v12 = vld [vmem:[%s7710_s9 + $0x20] sm:$0xff]  }
 0x6b2   : > { %v1547_v14 = vmul.f32 0.35355338, %v1535_v13  ;;  %v6377_v13 = vld [vmem:[%s7709_s6 + $0x38] sm:$0xff]  }
 0x6b3   : > { %v6971_v15 = vpop.f32.mrf.mxu1 }
 0x6b4   : > { %v1552_v18 = vsel %vm1161_vm5, %v1547_v14, -inf }
 0x6b5   : > { %1556 = vmax.xlane.f32.xlu0 %v1555_v16  ;;  %1553 = vmax.xlane.f32.xlu1 %v1552_v18  ;;  %v6975_v19 = vpop.f32.mrf.mxu1 }
 0x6b7   : > { %v5945_v20 = vpop.f32.mrf.mxu1 }
 0x6b9   : > { %v6977_v21 = vpop.f32.mrf.mxu1 }
 0x6bb   : > { %v5960_v23 = vpop.f32.mrf.mxu1 }
 0x6bc   : > { %v1903_v24 = vadd.f32 %v5960_v23, %v5343_v22 }
 0x6bd   : > { %v1894_v25 = vpop.f32.mrf.mxu1 }
 0x6be   : > { %v1984_v26 = vpack.c.bf16 %v1903_v24, %v1903_v24  ;;  %v1895_v30 = vadd.f32 %v5343_v22, %v1894_v25  ;;  %v5333_v24 = vld [vmem:[%s7716_s26 + $0x2] ss:$0 sm:$0xff] }
 0x6bf   : > { %v5961_v27 = vpop.f32.mrf.mxu1 }
 0x6c0   : > { %v1995_v28 = vsel %vm1097_vm4, %v1984_v26, 0  ;;  %6292 = vmatprep.subr.msk.bf16.mxu1 %vm1097_vm4, %v1984_v26 }
 0x6c1   : > { %v1897_v29 = vpop.f32.mrf.mxu1  ;;  %5971 = vmatpush3.bf16.xpose.msra.mxu1 %v1995_v28  ;;  %v5353_v28 = vld [vmem:[%s7655_s10 + $0x2] ss:$0 sm:$0xff] }
 0x6c2   : > { %v1898_v31 = vadd.f32 %v5343_v22, %v1897_v29 }
 0x6c4   : > { %v1983_v32 = vpack.c.bf16 %v1898_v31, %v1895_v30 }
 0x6c6   : > { %6293 = vmatprep.subr.msk.bf16.mxu1 %vm1097_vm4, %v1983_v32  ;;  %v1992_v33 = vsel %vm1097_vm4, %v1983_v32, 0 }
 0x6c9   : > { %5973 = vmatpush3.bf16.xpose.msra.mxu1 %v1992_v33 }
 0x6ca   : > { %5992 = vmatprep.subr.bf16.mxu1 %v6377_v13 }
 0x73a   : > { %v1551_v34 = vpop.xlane.xlu0 %1550 }
 0x73b   : > { %v1558_v35 = vsub.f32 %v1546_v7, %v1551_v34 }
 0x73d   : > { %v1561_v36 = vmul.f32 1.442695, %v1558_v35 }
 0x73e   : > { %v1557_v37 = vpop.xlane.xlu0 %1556  ;;  %v1554_v38 = vpop.xlane.xlu1 %1553 }
 0x73f   : > { %6447 = vpow2.f32 %v1561_v36  ;;  %v1560_v39 = vsub.f32 %v1548_v10, %v1557_v37  ;;  %v1559_v40 = vsub.f32 %v1547_v14, %v1554_v38  ;;  %v6375_v10 = vld [vmem:[%s7710_s9 + $0x28] sm:$0xff]   ;;  %v6378_v36 = vld [vmem:[%s7709_s6 + $0x30] sm:$0xff]  }
 0x741   : > { %v1565_v41 = vmul.f32 1.442695, %v1560_v39  ;;  %v1563_v42 = vmul.f32 1.442695, %v1559_v40 }
 0x743   : > { %6449 = vpow2.f32 %v1565_v41  ;;  %v6379_v41 = vld [vmem:[%s7710_s9 + $0x38] sm:$0xff]  }
 0x744   : > { %6451 = vpow2.f32 %v1563_v42 }
 0x74c   : > { %v6448_v43 = vpop.eup %6447 }
 0x74d   : > { %v1567_v44 = vsel %vm1161_vm5, %v6448_v43, 0.0 }
 0x74e   : > { %1568 = vadd.xlane.f32.xlu1 %v1567_v44 }
 0x750   : > { %v6450_v45 = vpop.eup %6449 }
 0x751   : > { %v6452_v46 = vpop.eup %6451  ;;  %v1573_v47 = vsel %vm1168_vm6, %v6450_v45, 0.0 }
 0x752   : > { %1574 = vadd.xlane.f32.xlu1 %v1573_v47  ;;  %v1570_v48 = vsel %vm1161_vm5, %v6452_v46, 0.0 }
 0x753   : > { %1571 = vadd.xlane.f32.xlu0 %v1570_v48 }
 0x7d7   : > { %v1569_v49 = vpop.xlane.xlu1 %1568 }
 0x7d8   : > { %6453 = vrcp.f32 %v1569_v49 }
 0x7db   : > { %v1575_v50 = vpop.xlane.xlu1 %1574 }
 0x7dc   : > { %v1572_v51 = vpop.xlane.xlu0 %1571  ;;  %6455 = vrcp.f32 %v1575_v50 }
 0x7dd   : > { %6457 = vrcp.f32 %v1572_v51 }
 0x7e5   : > { %v6454_v52 = vpop.eup %6453 }
 0x7e6   : > { %v1579_v56 = vmul.f32 %v6454_v52, %v6448_v43 }
 0x7e9   : > { %v6456_v53 = vpop.eup %6455 }
 0x7ea   : > { %v6458_v54 = vpop.eup %6457  ;;  %v1581_v55 = vmul.f32 %v6456_v53, %v6450_v45  ;;  %v6380_v45 = vld [vmem:[%s7710_s9 + $0x30] sm:$0xff]   ;;  %v5370_v53 = vld [vmem:[%s7716_s26 + $0x3] ss:$0 sm:$0xff] }
 0x7eb   : > { %v1580_v57 = vmul.f32 %v6458_v54, %v6452_v46 }
 0x7ec   : > { %v1583_v58 = vpack.c.bf16 %v1581_v55, %v1581_v55 }
 0x7ed   : > { %v1582_v59 = vpack.c.bf16 %v1580_v57, %v1579_v56 }
 0x7ef   : > { %5930 = vmatprep.mubr.msk.bf16.mxu0 %vm1161_vm5, %v1582_v59 }
 0x7f0   : > { %5931 = vmatmul.mubr.msk.bf16.vlgmr.msra.gmra.mxu0 %vm1161_vm5, %v1583_v58 }
 0x7f1   : > { %5935 = vmatpush3.bf16.msra.mxu0 %v1655_v61 }
 0x7f2   : > { %5946 = vmatprep.subr.bf16.mxu0 %v6373_v0 }
 0x8b0   : > { %v5932_v1 = vpop.f32.mrf.mxu0 }
 0x8b1   : > { %v1644_v7 = vpack.c.bf16 %v5932_v1, %v5932_v1 }
 0x8b2   : > { %v1629_v2 = vpop.f32.mrf.mxu0 }
 0x8b4   : > { %v5933_v3 = vpop.f32.mrf.mxu0 }
 0x8b6   : > { %v1632_v4 = vpop.f32.mrf.mxu0 }
 0x8b7   : > { %v1643_v5 = vpack.c.bf16 %v1632_v4, %v1629_v2 }
 0x8b9   : > { %5936 = vmatprep.mubr.msk.bf16.mxu0 %vm1097_vm4, %v1643_v5 }
 0x8ba   : > { %5937 = vmatmul.mubr.msk.bf16.vlgmr.msra.gmra.mxu0 %vm1097_vm4, %v1644_v7 }
 0x8bb   : > { %5947 = vmatpush3.bf16.msra.mxu0 %v6373_v0  ;;  %5950 = vmatprep.mubr.msk.bf16.mxu0 %vm812_vm2, %v6864_v63  ;;  %v5390_v0 = vld [vmem:[%s7655_s10 + $0x3] ss:$0 sm:$0xff] }
 0x8bc   : > { %5948 = vmatprep.subr.bf16.mxu0 %v6374_v8 }
 0x8bf   : > { %5949 = vmatpush3.bf16.msra.mxu0 %v6374_v8 }
 0x8c0   : > { %5962 = vmatprep.subr.bf16.mxu0 %v6375_v10 }
 0x8c2   : > { %5951 = vmatmul.mubr.msk.bf16.vlgmr.msra.gmra.mxu0 %vm812_vm2, %v6862_v62 }
 0x8c3   : > { %5963 = vmatpush3.bf16.msra.mxu0 %v6375_v10  ;;  %5966 = vmatprep.mubr.msk.bf16.mxu0 %vm812_vm2, %v6864_v63 }
 0x8c4   : > { %5964 = vmatprep.subr.bf16.mxu0 %v6376_v12 }
 0x8c7   : > { %5965 = vmatpush3.bf16.msra.mxu0 %v6376_v12 }
 0x8ca   : > { %5967 = vmatmul.mubr.msk.bf16.vlgmr.msra.gmra.mxu0 %vm812_vm2, %v6862_v62 }
 0x97a   : > { %v7021_v14 = vpop.f32.mrf.mxu0 }
 0x97c   : > { %v7023_v16 = vpop.f32.mrf.mxu0 }
 0x97e   : > { %v5939_v18 = vpop.f32.mrf.mxu0 }
 0x980   : > { %v7025_v20 = vpop.f32.mrf.mxu0 }
 0x982   : > { %v5952_v22 = vpop.f32.mrf.mxu0 }
 0x983   : > { %v1830_v26 = vadd.f32 %v5952_v22, %v5333_v24 }
 0x984   : > { %v1821_v23 = vpop.f32.mrf.mxu0 }
 0x985   : > { %v1822_v29 = vadd.f32 %v5333_v24, %v1821_v23  ;;  %v1982_v34 = vpack.c.bf16 %v1830_v26, %v1830_v26 }
 0x986   : > { %v5953_v25 = vpop.f32.mrf.mxu0 }
 0x988   : > { %v1824_v27 = vpop.f32.mrf.mxu0 }
 0x989   : > { %v1825_v30 = vadd.f32 %v5333_v24, %v1824_v27 }
 0x98a   : > { %v5968_v31 = vpop.f32.mrf.mxu0 }
 0x98b   : > { %v1981_v32 = vpack.c.bf16 %v1825_v30, %v1822_v29  ;;  %v1976_v33 = vadd.f32 %v5968_v31, %v5353_v28 }
 0x98c   : > { %v1967_v35 = vpop.f32.mrf.mxu0 }
 0x98d   : > { %v2084_v37 = vpack.c.bf16 %v1976_v33, %v1976_v33  ;;  %5974 = vmatprep.mubr.msk.bf16.mxu1 %vm1097_vm4, %v1981_v32  ;;  %v1968_v42 = vadd.f32 %v5353_v28, %v1967_v35 }
 0x98e   : > { %v5969_v38 = vpop.f32.mrf.mxu0  ;;  %5975 = vmatmul.mubr.msk.bf16.vlgmr.msra.gmra.mxu1 %vm1097_vm4, %v1982_v34 }
 0x98f   : > { %v2092_v39 = vand.u32 %v2084_v37, %v6884_v6  ;;  %5993 = vmatpush3.bf16.msra.mxu1 %v6377_v13  ;;  %5996 = vmatprep.mubr.msk.bf16.mxu1 %vm812_vm2, %v6864_v63 }
 0x990   : > { %v1970_v40 = vpop.f32.mrf.mxu0  ;;  %5994 = vmatprep.subr.bf16.mxu1 %v6378_v36 }
 0x991   : > { %v1971_v43 = vadd.f32 %v5353_v28, %v1970_v40  ;;  %5978 = vmatprep.subr.bf16.mxu0 %v2092_v39 }
 0x992   : > { %5979 = vmatpush3.bf16.msra.mxu0 %v2092_v39 }
 0x993   : > { %v2083_v44 = vpack.c.bf16 %v1971_v43, %v1968_v42  ;;  %5995 = vmatpush3.bf16.msra.mxu1 %v6378_v36 }
 0x994   : > { %6008 = vmatprep.subr.bf16.mxu1 %v6379_v41 }
 0x995   : > { %5980 = vmatprep.subr.bf16.mxu0 %v2083_v44 }
 0x996   : > { %5981 = vmatpush3.bf16.msra.mxu0 %v2083_v44  ;;  %5997 = vmatmul.mubr.msk.bf16.vlgmr.msra.gmra.mxu1 %vm812_vm2, %v6862_v62 }
 0x997   : > { %6009 = vmatpush3.bf16.msra.mxu1 %v6379_v41  ;;  %6012 = vmatprep.mubr.msk.bf16.mxu1 %vm812_vm2, %v6864_v63 }
 0x998   : > { %6010 = vmatprep.subr.bf16.mxu1 %v6380_v45 }
 0x99b   : > { %6011 = vmatpush3.bf16.msra.mxu1 %v6380_v45 }
 0x99e   : > { %6013 = vmatmul.mubr.msk.bf16.vlgmr.msra.gmra.mxu1 %vm812_vm2, %v6862_v62 }
 0xa4e   : > { %v5976_v46 = vpop.f32.mrf.mxu1 }
 0xa4f   : > { %v2047_v50 = vmul.f32 0.35355338, %v5976_v46 }
 0xa50   : > { %v2031_v47 = vpop.f32.mrf.mxu1 }
 0xa51   : > { %v2045_v48 = vmul.f32 0.35355338, %v2031_v47  ;;  %v2054_v57 = vsel %vm1168_vm6, %v2047_v50, -inf }
 0xa52   : > { %v5977_v49 = vpop.f32.mrf.mxu1 }
 0xa53   : > { %v2048_v51 = vsel %vm1161_vm5, %v2045_v48, -inf }
 0xa54   : > { %2049 = vmax.xlane.f32.xlu0 %v2048_v51  ;;  %v2034_v52 = vpop.f32.mrf.mxu1 }
 0xa55   : > { %v2046_v54 = vmul.f32 0.35355338, %v2034_v52  ;;  %v6381_v52 = vld [vmem:[%s7712_s2 + $0x38] sm:$0xff]  }
 0xa56   : > { %v5998_v55 = vpop.f32.mrf.mxu1 }
 0xa57   : > { %v7057_v56 = vadd.f32 %v5998_v55, %v5370_v53  ;;  %v2051_v58 = vsel %vm1161_vm5, %v2046_v54, -inf }
 0xa58   : > { %2055 = vmax.xlane.f32.xlu0 %v2054_v57  ;;  %v2265_v59 = vpop.f32.mrf.mxu1  ;;  %2052 = vmax.xlane.f32.xlu1 %v2051_v58 }
 0xa59   : > { %v7064_v1 = vadd.f32 %v5370_v53, %v2265_v59 }
 0xa5a   : > { %v5999_v60 = vpop.f32.mrf.mxu1 }
 0xa5b   : > { %v6382_v60 = vld [vmem:[%s7712_s2 + $0x30] sm:$0xff]  }
 0xa5c   : > { %v2268_v61 = vpop.f32.mrf.mxu1 }
 0xa5d   : > { %v7066_v2 = vadd.f32 %v5370_v53, %v2268_v61  ;;  %v1757_v61 = vadd.f32 %v6971_v15, %v7021_v14 }
 0xa5e   : > { %v6014_v3 = vpop.f32.mrf.mxu1 }
 0xa5f   : > { %v2425_v4 = vpack.c.bf16 %v7066_v2, %v7064_v1  ;;  %v2420_v5 = vadd.f32 %v6014_v3, %v5390_v0  ;;  %v1749_v3 = vadd.f32 %v6975_v19, %v7023_v16  ;;  %v5380_v1 = vld [vmem:[%s7717_s8 + $0x3] ss:$0 sm:$0xff] }
 0xa60   : > { %v2411_v7 = vpop.f32.mrf.mxu1 }
 0xa61   : > { %v2528_v8 = vpack.c.bf16 %v2420_v5, %v2420_v5  ;;  %v2412_v18 = vadd.f32 %v5390_v0, %v2411_v7 }
 0xa62   : > { %v6015_v10 = vpop.f32.mrf.mxu1 }
 0xa63   : > { %v2536_v12 = vand.u32 %v2528_v8, %v6884_v6 }
 0xa64   : > { %v2414_v13 = vpop.f32.mrf.mxu1 }
 0xa65   : > { %v2415_v22 = vadd.f32 %v5390_v0, %v2414_v13  ;;  %6024 = vmatprep.subr.bf16.mxu1 %v2536_v12 }
 0xa66   : > { %6025 = vmatpush3.bf16.msra.mxu1 %v2536_v12 }
 0xa67   : > { %v2527_v23 = vpack.c.bf16 %v2415_v22, %v2412_v18 }
 0xa69   : > { %6026 = vmatprep.subr.bf16.mxu1 %v2527_v23 }
 0xa6a   : > { %6027 = vmatpush3.bf16.msra.mxu1 %v2527_v23  ;;  %v2426_v23 = vpack.c.bf16 %v7057_v56, %v7057_v56 }
 0xadd   : > { %v2050_v24 = vpop.xlane.xlu0 %2049 }
 0xade   : > { %v2057_v25 = vsub.f32 %v2045_v48, %v2050_v24 }
 0xae0   : > { %v2060_v26 = vmul.f32 1.442695, %v2057_v25 }
 0xae1   : > { %v2056_v27 = vpop.xlane.xlu0 %2055  ;;  %v2053_v28 = vpop.xlane.xlu1 %2052 }
 0xae2   : > { %6459 = vpow2.f32 %v2060_v26  ;;  %v2059_v29 = vsub.f32 %v2047_v50, %v2056_v27  ;;  %v2058_v30 = vsub.f32 %v2046_v54, %v2053_v28  ;;  %v5362_v50 = vld [vmem:[%s7656_s11 + $0x8] sm:$0xf] }
 0xae3   : > { %6294 = vmatprep.subr.msk.bf16.mxu0 %vm1653_vm7, %v5362_v50  ;;  %v2153_v51 = vsel %vm1653_vm7, %v5362_v50, 0 }
 0xae4   : > { %v2064_v31 = vmul.f32 1.442695, %v2059_v29  ;;  %v2062_v32 = vmul.f32 1.442695, %v2058_v30 }
 0xae6   : > { %6461 = vpow2.f32 %v2064_v31 }
 0xae7   : > { %6463 = vpow2.f32 %v2062_v32 }
 0xaef   : > { %v6460_v33 = vpop.eup %6459 }
 0xaf0   : > { %v2066_v34 = vsel %vm1161_vm5, %v6460_v33, 0.0 }
 0xaf1   : > { %2067 = vadd.xlane.f32.xlu1 %v2066_v34 }
 0xaf3   : > { %v6462_v35 = vpop.eup %6461 }
 0xaf4   : > { %v6464_v36 = vpop.eup %6463  ;;  %v2072_v37 = vsel %vm1168_vm6, %v6462_v35, 0.0 }
 0xaf5   : > { %2073 = vadd.xlane.f32.xlu1 %v2072_v37  ;;  %v2069_v38 = vsel %vm1161_vm5, %v6464_v36, 0.0 }
 0xaf6   : > { %2070 = vadd.xlane.f32.xlu0 %v2069_v38 }
 0xb7a   : > { %v2068_v39 = vpop.xlane.xlu1 %2067 }
 0xb7b   : > { %6465 = vrcp.f32 %v2068_v39 }
 0xb7e   : > { %v2074_v40 = vpop.xlane.xlu1 %2073 }
 0xb7f   : > { %v2071_v41 = vpop.xlane.xlu0 %2070  ;;  %6467 = vrcp.f32 %v2074_v40 }
 0xb80   : > { %6469 = vrcp.f32 %v2071_v41 }
 0xb88   : > { %v6466_v42 = vpop.eup %6465 }
 0xb89   : > { %v2078_v46 = vmul.f32 %v6466_v42, %v6460_v33 }
 0xb8c   : > { %v6468_v43 = vpop.eup %6467 }
 0xb8d   : > { %v6470_v44 = vpop.eup %6469  ;;  %v2080_v45 = vmul.f32 %v6468_v43, %v6462_v35 }
 0xb8e   : > { %v2079_v47 = vmul.f32 %v6470_v44, %v6464_v36 }
 0xb8f   : > { %v2082_v48 = vpack.c.bf16 %v2080_v45, %v2080_v45 }
 0xb90   : > { %v2081_v49 = vpack.c.bf16 %v2079_v47, %v2078_v46 }
 0xb92   : > { %5982 = vmatprep.mubr.msk.bf16.mxu0 %vm1161_vm5, %v2081_v49 }
 0xb93   : > { %5983 = vmatmul.mubr.msk.bf16.vlgmr.msra.gmra.mxu0 %vm1161_vm5, %v2082_v48 }
 0xb94   : > { %5987 = vmatpush3.bf16.msra.mxu0 %v2153_v51 }
 0xb95   : > { %6000 = vmatprep.subr.bf16.mxu0 %v6381_v52 }
 0xc53   : > { %v5984_v53 = vpop.f32.mrf.mxu0 }
 0xc54   : > { %v2143_v59 = vpack.c.bf16 %v5984_v53, %v5984_v53 }
 0xc55   : > { %v2128_v54 = vpop.f32.mrf.mxu0 }
 0xc57   : > { %v5985_v55 = vpop.f32.mrf.mxu0 }
 0xc59   : > { %v2131_v57 = vpop.f32.mrf.mxu0 }
 0xc5a   : > { %v2142_v58 = vpack.c.bf16 %v2131_v57, %v2128_v54 }
 0xc5c   : > { %5988 = vmatprep.mubr.msk.bf16.mxu0 %vm1097_vm4, %v2142_v58 }
 0xc5d   : > { %5989 = vmatmul.mubr.msk.bf16.vlgmr.msra.gmra.mxu0 %vm1097_vm4, %v2143_v59 }
 0xc5e   : > { %6001 = vmatpush3.bf16.msra.mxu0 %v6381_v52  ;;  %6004 = vmatprep.mubr.msk.bf16.mxu0 %vm812_vm2, %v6864_v63 }
 0xc5f   : > { %6002 = vmatprep.subr.bf16.mxu0 %v6382_v60 }
 0xc62   : > { %6003 = vmatpush3.bf16.msra.mxu0 %v6382_v60  ;;  %v5399_v60 = vld [vmem:[%s7656_s11 + $0xc] sm:$0xf] }
 0xc63   : > { %6297 = vmatprep.subr.msk.bf16.mxu1 %vm1653_vm7, %v5399_v60 }
 0xc65   : > { %6005 = vmatmul.mubr.msk.bf16.vlgmr.msra.gmra.mxu0 %vm812_vm2, %v6862_v62  ;;  %v1752_v62 = vadd.f32 %v6977_v21, %v7025_v20 }
 0xc66   : > { %6020 = vmatprep.mubr.msk.bf16.mxu0 %vm1097_vm4, %v2425_v4 }
 0xd1d   : > { %v5990_v0 = vpop.f32.mrf.mxu0 }
 0xd1e   : > { %v7101_v5 = vadd.f32 %v5990_v0, %v1757_v61  ;;  %v2597_v61 = vsel %vm1653_vm7, %v5399_v60, 0 }
 0xd1f   : > { %v2189_v63 = vpop.f32.mrf.mxu0 }
 0xd20   : > { %v7103_v7 = vadd.f32 %v2189_v63, %v1749_v3 }
 0xd21   : > { %v5991_v8 = vpop.f32.mrf.mxu0 }
 0xd23   : > { %v2192_v10 = vpop.f32.mrf.mxu0 }
 0xd24   : > { %v7110_v2 = vadd.f32 %v2192_v10, %v1752_v62 }
 0xd25   : > { %v6006_v15 = vpop.f32.mrf.mxu0 }
 0xd26   : > { %v2347_v14 = vadd.f32 %v6006_v15, %v5380_v1 }
 0xd27   : > { %v2338_v4 = vpop.f32.mrf.mxu0 }
 0xd28   : > { %v2428_v19 = vpack.c.bf16 %v2347_v14, %v2347_v14  ;;  %v2339_v18 = vadd.f32 %v5380_v1, %v2338_v4 }
 0xd29   : > { %v6007_v16 = vpop.f32.mrf.mxu0 }
 0xd2a   : > { %v2439_v12 = vsel %vm1097_vm4, %v2428_v19, 0  ;;  %6295 = vmatprep.subr.msk.bf16.mxu0 %vm1097_vm4, %v2428_v19 }
 0xd2b   : > { %v2341_v13 = vpop.f32.mrf.mxu0  ;;  %6017 = vmatpush3.bf16.xpose.msra.mxu0 %v2439_v12 }
 0xd2c   : > { %v2342_v21 = vadd.f32 %v5380_v1, %v2341_v13  ;;  %v5402_v13 = vld [vmem:[%s7657_s12] ss:$0 sm:$0xff] }
 0xd2e   : > { %v2427_v20 = vpack.c.bf16 %v2342_v21, %v2339_v18 }
 0xd30   : > { %6296 = vmatprep.subr.msk.bf16.mxu0 %vm1097_vm4, %v2427_v20  ;;  %v2436_v22 = vsel %vm1097_vm4, %v2427_v20, 0 }
 0xd33   : > { %6019 = vmatpush3.bf16.xpose.msra.mxu0 %v2436_v22 }
 0xd3a   : > { %6021 = vmatmul.mubr.msk.bf16.vlgmr.msra.gmra.mxu0 %vm1097_vm4, %v2426_v23 }
 0xdfa   : > { %v6022_v24 = vpop.f32.mrf.mxu0 }
 0xdfb   : > { %v2491_v28 = vmul.f32 0.35355338, %v6022_v24 }
 0xdfc   : > { %v2475_v25 = vpop.f32.mrf.mxu0 }
 0xdfd   : > { %v2489_v26 = vmul.f32 0.35355338, %v2475_v25  ;;  %v2498_v32 = vsel %vm1168_vm6, %v2491_v28, -inf }
 0xdfe   : > { %v6023_v27 = vpop.f32.mrf.mxu0 }
 0xdff   : > { %v2492_v29 = vsel %vm1161_vm5, %v2489_v26, -inf }
 0xe00   : > { %2493 = vmax.xlane.f32.xlu0 %v2492_v29  ;;  %v2478_v30 = vpop.f32.mrf.mxu0 }
 0xe01   : > { %v2490_v31 = vmul.f32 0.35355338, %v2478_v30 }
 0xe03   : > { %v2495_v33 = vsel %vm1161_vm5, %v2490_v31, -inf }
 0xe04   : > { %2499 = vmax.xlane.f32.xlu0 %v2498_v32  ;;  %2496 = vmax.xlane.f32.xlu1 %v2495_v33 }
 0xe89   : > { %v2494_v34 = vpop.xlane.xlu0 %2493 }
 0xe8a   : > { %v2501_v56 = vsub.f32 %v2489_v26, %v2494_v34 }
 0xe8c   : > { %v2504_v35 = vmul.f32 1.442695, %v2501_v56 }
 0xe8d   : > { %v2500_v36 = vpop.xlane.xlu0 %2499  ;;  %v2497_v37 = vpop.xlane.xlu1 %2496 }
 0xe8e   : > { %6471 = vpow2.f32 %v2504_v35  ;;  %v2503_v38 = vsub.f32 %v2491_v28, %v2500_v36  ;;  %v2502_v39 = vsub.f32 %v2490_v31, %v2497_v37  ;;  %v6383_v36 = vld [vmem:[%s7660_s15 + $0x8] sm:$0xff]   ;;  %v6384_v37 = vld [vmem:[%s7660_s15] sm:$0xff]  }
 0xe8f   : > { %6038 = vmatprep.subr.bf16.mxu0 %v6383_v36 }
 0xe90   : > { %v2508_v40 = vmul.f32 1.442695, %v2503_v38  ;;  %v2506_v41 = vmul.f32 1.442695, %v2502_v39  ;;  %6039 = vmatpush3.bf16.msra.mxu0 %v6383_v36 }
 0xe91   : > { %6040 = vmatprep.subr.bf16.mxu0 %v6384_v37 }
 0xe92   : > { %6473 = vpow2.f32 %v2508_v40 }
 0xe93   : > { %6475 = vpow2.f32 %v2506_v41 }
 0xe94   : > { %6041 = vmatpush3.bf16.msra.mxu0 %v6384_v37 }
 0xe9b   : > { %v6472_v42 = vpop.eup %6471 }
 0xe9c   : > { %v2510_v43 = vsel %vm1161_vm5, %v6472_v42, 0.0 }
 0xe9d   : > { %2511 = vadd.xlane.f32.xlu1 %v2510_v43 }
 0xe9f   : > { %v6474_v44 = vpop.eup %6473 }
 0xea0   : > { %v6476_v45 = vpop.eup %6475  ;;  %v2516_v46 = vsel %vm1168_vm6, %v6474_v44, 0.0 }
 0xea1   : > { %2517 = vadd.xlane.f32.xlu1 %v2516_v46  ;;  %v2513_v47 = vsel %vm1161_vm5, %v6476_v45, 0.0 }
 0xea2   : > { %2514 = vadd.xlane.f32.xlu0 %v2513_v47 }
 0xf26   : > { %v2512_v48 = vpop.xlane.xlu1 %2511 }
 0xf27   : > { %6477 = vrcp.f32 %v2512_v48 }
 0xf2a   : > { %v2518_v49 = vpop.xlane.xlu1 %2517 }
 0xf2b   : > { %v2515_v50 = vpop.xlane.xlu0 %2514  ;;  %6479 = vrcp.f32 %v2518_v49  ;;  %v5403_v49 = vld [vmem:[%s7658_s13] ss:$0 sm:$0xff] }
 0xf2c   : > { %6481 = vrcp.f32 %v2515_v50 }
 0xf34   : > { %v6478_v51 = vpop.eup %6477 }
 0xf35   : > { %v2522_v55 = vmul.f32 %v6478_v51, %v6472_v42 }
 0xf38   : > { %v6480_v52 = vpop.eup %6479 }
 0xf39   : > { %v6482_v53 = vpop.eup %6481  ;;  %v2524_v54 = vmul.f32 %v6480_v52, %v6474_v44 }
 0xf3a   : > { %v2523_v57 = vmul.f32 %v6482_v53, %v6476_v45 }
 0xf3b   : > { %v2526_v58 = vpack.c.bf16 %v2524_v54, %v2524_v54 }
 0xf3c   : > { %v2525_v59 = vpack.c.bf16 %v2523_v57, %v2522_v55  ;;  %v5404_v55 = vld [vmem:[%s7659_s14] ss:$0 sm:$0xff] }
 0xf3e   : > { %6028 = vmatprep.mubr.msk.bf16.mxu1 %vm1161_vm5, %v2525_v59 }
 0xf3f   : > { %6029 = vmatmul.mubr.msk.bf16.vlgmr.msra.gmra.mxu1 %vm1161_vm5, %v2526_v58 }
 0xf40   : > { %6033 = vmatpush3.bf16.msra.mxu1 %v2597_v61 }
 0xfff   : > { %v6030_v0 = vpop.f32.mrf.mxu1 }
0x1000   : > { %v2587_v10 = vpack.c.bf16 %v6030_v0, %v6030_v0 }
0x1001   : > { %v2572_v3 = vpop.f32.mrf.mxu1 }
0x1003   : > { %v6031_v63 = vpop.f32.mrf.mxu1 }
0x1004   : > { %v6385_v63 = vld [vmem:[%s7662_s17 + $0x38] sm:$0xff]  }
0x1005   : > { %v2575_v8 = vpop.f32.mrf.mxu1  ;;  %6046 = vmatprep.subr.bf16.mxu1 %v6385_v63 }
0x1006   : > { %v2586_v62 = vpack.c.bf16 %v2575_v8, %v2572_v3  ;;  %v6386_v8 = vld [vmem:[%s7662_s17 + $0x30] sm:$0xff]  }
0x1008   : > { %6034 = vmatprep.mubr.msk.bf16.mxu1 %vm1097_vm4, %v2586_v62  ;;  %v6387_v62 = vld [vmem:[%s7662_s17 + $0x28] sm:$0xff]  }
0x1009   : > { %6035 = vmatmul.mubr.msk.bf16.vlgmr.msra.gmra.mxu1 %vm1097_vm4, %v2587_v10  ;;  %v6388_v10 = vld [vmem:[%s7662_s17 + $0x20] sm:$0xff]  }
0x100a   : > { %6047 = vmatpush3.bf16.msra.mxu1 %v6385_v63 }
0x100b   : > { %6048 = vmatprep.subr.bf16.mxu1 %v6386_v8 }
0x100e   : > { %6049 = vmatpush3.bf16.msra.mxu1 %v6386_v8 }
0x100f   : > { %6050 = vmatprep.subr.bf16.mxu1 %v6387_v62 }
0x1012   : > { %6051 = vmatpush3.bf16.msra.mxu1 %v6387_v62 }
0x1013   : > { %6052 = vmatprep.subr.bf16.mxu1 %v6388_v10 }
0x1016   : > { %6053 = vmatpush3.bf16.msra.mxu1 %v6388_v10 }
0x10c9   : > { %v6036_v1 = vpop.f32.mrf.mxu1 }
0x10ca   : > { %v2649_v15 = vadd.f32 %v6036_v1, %v7101_v5  ;;  %v6389_v1 = vld [vmem:[%s7662_s17 + $0x18] sm:$0xff]  }
0x10cb   : > { %v2633_v14 = vpop.f32.mrf.mxu1  ;;  %6054 = vmatprep.subr.bf16.mxu1 %v6389_v1 }
0x10cc   : > { %v2647_v4 = vadd.f32 %v2633_v14, %v7103_v7  ;;  %v2652_v16 = vadd.f32 %v2649_v15, %v6820_v9  ;;  %v6390_v15 = vld [vmem:[%s7662_s17 + $0x10] sm:$0xff]   ;;  %6055 = vmatpush3.bf16.msra.mxu1 %v6389_v1  ;;  %v6391_v14 = vld [vmem:[%s7662_s17 + $0x8] sm:$0xff]  }
0x10cd   : > { %v6037_v19 = vpop.f32.mrf.mxu1  ;;  %6056 = vmatprep.subr.bf16.mxu1 %v6390_v15 }
0x10ce   : > { %v2650_v12 = vadd.f32 %v2647_v4, %v6822_v11  ;;  %v7144_v22 = vadd.f32 %v5402_v13, %v2652_v16  ;;  %v6392_v4 = vld [vmem:[%s7662_s17] sm:$0xff]  }
0x10cf   : > { %v2636_v18 = vpop.f32.mrf.mxu1  ;;  %v5405_v19 = vld [vmem:[%s7661_s16] ss:$0 sm:$0xff] }
0x10d0   : > { %v7141_v21 = vadd.f32 %v5402_v13, %v2650_v12  ;;  %v2648_v20 = vadd.f32 %v2636_v18, %v7110_v2  ;;  %v2671_v23 = vsel %vm819_vm1, %v7144_v22, 0.0  ;;  %6057 = vmatpush3.bf16.msra.mxu1 %v6390_v15 }
0x10d1   : > { %6058 = vmatprep.subr.bf16.mxu1 %v6391_v14 }
0x10d2   : > { %v2651_v5 = vadd.f32 %v2648_v20, %v6831_v17  ;;  %v2665_v7 = vsel %vm812_vm2, %v7141_v21, 0.0 }
0x10d3   : > { %2666 = vadd.xlane.f32.xlu0 %v2665_v7 }
0x10d4   : > { %v7149_v9 = vadd.f32 %v5402_v13, %v2651_v5  ;;  %6059 = vmatpush3.bf16.msra.mxu1 %v6391_v14 }
0x10d5   : > { %6060 = vmatprep.subr.bf16.mxu1 %v6392_v4 }
0x10d6   : > { %v2668_v11 = vsel %vm812_vm2, %v7149_v9, 0.0 }
0x10d7   : > { %2669 = vadd.xlane.f32.xlu1 %v2668_v11  ;;  %2672 = vadd.xlane.f32.xlu0 %v2671_v23 }
0x10d8   : > { %6061 = vmatpush3.bf16.msra.mxu1 %v6392_v4 }
0x115c   : > { %v2667_v24 = vpop.xlane.xlu0 %2666 }
0x115d   : > { %v2674_v2 = vmul.f32 0.03125, %v2667_v24 }
0x115f   : > { %v2677_v25 = vsub.f32 %v7141_v21, %v2674_v2 }
0x1160   : > { %v2670_v26 = vpop.xlane.xlu1 %2669  ;;  %v2673_v17 = vpop.xlane.xlu0 %2672 }
0x1161   : > { %v2675_v27 = vmul.f32 0.03125, %v2670_v26  ;;  %v2676_v28 = vmul.f32 0.03125, %v2673_v17  ;;  %v2680_v29 = vmul.f32 %v2677_v25, %v2677_v25 }
0x1163   : > { %v2678_v30 = vsub.f32 %v7149_v9, %v2675_v27  ;;  %v2679_v31 = vsub.f32 %v7144_v22, %v2676_v28  ;;  %v2683_v32 = vsel %vm812_vm2, %v2680_v29, 0.0 }
0x1164   : > { %2684 = vadd.xlane.f32.xlu1 %v2683_v32 }
0x1165   : > { %v2681_v33 = vmul.f32 %v2678_v30, %v2678_v30  ;;  %v2682_v34 = vmul.f32 %v2679_v31, %v2679_v31 }
0x1167   : > { %v2686_v56 = vsel %vm812_vm2, %v2681_v33, 0.0  ;;  %v2689_v35 = vsel %vm819_vm1, %v2682_v34, 0.0 }
0x1168   : > { %2687 = vadd.xlane.f32.xlu0 %v2686_v56  ;;  %2690 = vadd.xlane.f32.xlu1 %v2689_v35 }
0x11ed   : > { %v2685_v38 = vpop.xlane.xlu1 %2684 }
0x11ee   : > { %v2692_v39 = vmul.f32 0.03125, %v2685_v38 }
0x11f0   : > { %v2695_v40 = vadd.f32 1e-06, %v2692_v39 }
0x11f1   : > { %v2691_v41 = vpop.xlane.xlu1 %2690  ;;  %v2688_v42 = vpop.xlane.xlu0 %2687 }
0x11f2   : > { %6483 = vrsqrt.f32 %v2695_v40  ;;  %v2694_v43 = vmul.f32 0.03125, %v2691_v41  ;;  %v2693_v44 = vmul.f32 0.03125, %v2688_v42 }
0x11f4   : > { %v2697_v45 = vadd.f32 1e-06, %v2694_v43  ;;  %v2696_v46 = vadd.f32 1e-06, %v2693_v44 }
0x11f6   : > { %6485 = vrsqrt.f32 %v2697_v45 }
0x11f7   : > { %6487 = vrsqrt.f32 %v2696_v46 }
0x11ff   : > { %v6484_v47 = vpop.eup %6483 }
0x1200   : > { %v2701_v48 = vmul.f32 %v6484_v47, %v2677_v25 }
0x1202   : > { %v2710_v54 = vmul.f32 %v5403_v49, %v2701_v48 }
0x1203   : > { %v6486_v50 = vpop.eup %6485 }
0x1204   : > { %v6488_v51 = vpop.eup %6487  ;;  %v2703_v52 = vmul.f32 %v6486_v50, %v2679_v31  ;;  %v2719_v60 = vadd.f32 %v5404_v55, %v2710_v54 }
0x1205   : > { %v2702_v53 = vmul.f32 %v6488_v51, %v2678_v30 }
0x1206   : > { %v2712_v57 = vmul.f32 %v5403_v49, %v2703_v52 }
0x1207   : > { %v2711_v58 = vmul.f32 %v5403_v49, %v2702_v53  ;;  %v5410_v49 = vld [vmem:[%s7663_s18] ss:$0 sm:$0xff] }
0x1208   : > { %v2721_v59 = vadd.f32 %v5404_v55, %v2712_v57 }
0x1209   : > { %v2720_v61 = vadd.f32 %v5404_v55, %v2711_v58 }
0x120a   : > { %v2723_v0 = vpack.c.bf16 %v2721_v59, %v2721_v59 }
0x120b   : > { %v2722_v3 = vpack.c.bf16 %v2720_v61, %v2719_v60 }
0x120d   : > { %6042 = vmatprep.mubr.msk.bf16.mxu0 %vm812_vm2, %v2722_v3 }
0x120e   : > { %6043 = vmatmul.mubr.msk.bf16.vlgmr.msra.gmra.mxu0 %vm812_vm2, %v2723_v0 }
0x12ce   : > { %v6044_v16 = vpop.f32.mrf.mxu0 }
0x12cf   : > { %v2796_v12 = vadd.f32 %v6044_v16, %v5405_v19 }
0x12d0   : > { %v2787_v13 = vpop.f32.mrf.mxu0 }
0x12d1   : > { %v2803_v18 = vmul.f32 %v2796_v12, %v2796_v12  ;;  %v2788_v20 = vadd.f32 %v5405_v19, %v2787_v13  ;;  %v6393_v13 = vld [vmem:[%s7709_s6 + $0x48] sm:$0xff]  }
0x12d2   : > { %v6045_v5 = vpop.f32.mrf.mxu0  ;;  %6066 = vmatprep.subr.bf16.mxu0 %v6393_v13 }
0x12d3   : > { %v2806_v7 = vmul.f32 %v2803_v18, %v2796_v12  ;;  %v2801_v11 = vmul.f32 %v2788_v20, %v2788_v20  ;;  %6067 = vmatpush3.bf16.msra.mxu0 %v6393_v13  ;;  %v6394_v18 = vld [vmem:[%s7709_s6 + $0x40] sm:$0xff]  }
0x12d4   : > { %v2790_v23 = vpop.f32.mrf.mxu0  ;;  %6068 = vmatprep.subr.bf16.mxu0 %v6394_v18 }
0x12d5   : > { %v2809_v24 = vmul.f32 0.044715, %v2806_v7  ;;  %v2804_v2 = vmul.f32 %v2801_v11, %v2788_v20  ;;  %v2791_v25 = vadd.f32 %v5405_v19, %v2790_v23 }
0x12d7   : > { %v2812_v26 = vadd.f32 %v2809_v24, %v2796_v12  ;;  %v2807_v17 = vmul.f32 0.044715, %v2804_v2  ;;  %v2802_v27 = vmul.f32 %v2791_v25, %v2791_v25  ;;  %6069 = vmatpush3.bf16.msra.mxu0 %v6394_v18 }
0x12d9   : > { %v2815_v28 = vmul.f32 0.7978846, %v2812_v26  ;;  %v2810_v29 = vadd.f32 %v2807_v17, %v2788_v20  ;;  %v2805_v30 = vmul.f32 %v2802_v27, %v2791_v25 }
0x12db   : > { %6489 = vtanh.f32 %v2815_v28  ;;  %v2813_v31 = vmul.f32 0.7978846, %v2810_v29  ;;  %v2808_v32 = vmul.f32 0.044715, %v2805_v30  ;;  %v5421_v29 = vld [vmem:[%s7714_s27 + $0x1] ss:$0 sm:$0xff] }
0x12dd   : > { %6491 = vtanh.f32 %v2813_v31  ;;  %v2811_v33 = vadd.f32 %v2808_v32, %v2791_v25 }
0x12df   : > { %v2814_v34 = vmul.f32 0.7978846, %v2811_v33 }
0x12e1   : > { %6493 = vtanh.f32 %v2814_v34 }
0x12e8   : > { %v6490_v56 = vpop.eup %6489 }
0x12e9   : > { %v2821_v36 = vadd.f32 1.0, %v6490_v56  ;;  %v5422_v56 = vld [vmem:[%s7715_s23 + $0x1] ss:$0 sm:$0xff] }
0x12ea   : > { %v6492_v35 = vpop.eup %6491 }
0x12eb   : > { %v2819_v37 = vadd.f32 1.0, %v6492_v35  ;;  %v2824_v39 = vmul.f32 0.5, %v2821_v36 }
0x12ed   : > { %v2822_v41 = vmul.f32 0.5, %v2819_v37  ;;  %v2827_v43 = vmul.f32 %v2824_v39, %v2796_v12 }
0x12ee   : > { %v6494_v38 = vpop.eup %6493 }
0x12ef   : > { %v2820_v40 = vadd.f32 1.0, %v6494_v38  ;;  %v2825_v44 = vmul.f32 %v2822_v41, %v2788_v20  ;;  %v2829_v47 = vpack.c.bf16 %v2827_v43, %v2827_v43  ;;  %v6395_v20 = vld [vmem:[%s7712_s2 + $0x48] sm:$0xff]  }
0x12f0   : > { %6074 = vmatprep.subr.bf16.mxu0 %v6395_v20  ;;  %v6397_v43 = vld [vmem:[%s7710_s9 + $0x48] sm:$0xff]  }
0x12f1   : > { %v2823_v42 = vmul.f32 0.5, %v2820_v40 }
0x12f3   : > { %v2826_v45 = vmul.f32 %v2823_v42, %v2791_v25  ;;  %v6396_v42 = vld [vmem:[%s7712_s2 + $0x40] sm:$0xff]  }
0x12f5   : > { %v2828_v46 = vpack.c.bf16 %v2826_v45, %v2825_v44  ;;  %v6398_v44 = vld [vmem:[%s7710_s9 + $0x40] sm:$0xff]  }
0x12f7   : > { %6062 = vmatprep.mubr.bf16.mxu1 %v2828_v46 }
0x12f8   : > { %6063 = vmatmul.mubr.bf16.vlgmr.msra.gmra.mxu1 %v2829_v47 }
0x13b8   : > { %v6064_v48 = vpop.f32.mrf.mxu1 }
0x13b9   : > { %v2944_v51 = vadd.f32 %v6064_v48, %v5410_v49  ;;  %v5428_v48 = vld [vmem:[%s7716_s26 + $0x4] ss:$0 sm:$0xff] }
0x13ba   : > { %v2935_v50 = vpop.f32.mrf.mxu1 }
0x13bb   : > { %v2936_v52 = vadd.f32 %v5410_v49, %v2935_v50  ;;  %v7209_v57 = vadd.f32 %v2944_v51, %v7144_v22  ;;  %v5438_v50 = vld [vmem:[%s7717_s8 + $0x4] ss:$0 sm:$0xff] }
0x13bc   : > { %v6065_v53 = vpop.f32.mrf.mxu1 }
0x13bd   : > { %v7206_v54 = vadd.f32 %v2936_v52, %v7141_v21  ;;  %v2962_v0 = vsel %vm819_vm1, %v7209_v57, 0.0 }
0x13be   : > { %v2938_v55 = vpop.f32.mrf.mxu1 }
0x13bf   : > { %v2939_v58 = vadd.f32 %v5410_v49, %v2938_v55  ;;  %v2956_v59 = vsel %vm812_vm2, %v7206_v54, 0.0 }
0x13c0   : > { %2957 = vadd.xlane.f32.xlu0 %v2956_v59 }
0x13c1   : > { %v7214_v60 = vadd.f32 %v2939_v58, %v7149_v9 }
0x13c3   : > { %v2959_v61 = vsel %vm812_vm2, %v7214_v60, 0.0 }
0x13c4   : > { %2960 = vadd.xlane.f32.xlu1 %v2959_v61  ;;  %2963 = vadd.xlane.f32.xlu0 %v2962_v0 }
0x1449   : > { %v2958_v21 = vpop.xlane.xlu0 %2957 }
0x144a   : > { %v2965_v3 = vmul.f32 0.03125, %v2958_v21 }
0x144c   : > { %v2968_v22 = vsub.f32 %v7206_v54, %v2965_v3 }
0x144d   : > { %v2961_v63 = vpop.xlane.xlu1 %2960  ;;  %v2964_v8 = vpop.xlane.xlu0 %2963 }
0x144e   : > { %v2966_v62 = vmul.f32 0.03125, %v2961_v63  ;;  %v2967_v10 = vmul.f32 0.03125, %v2964_v8  ;;  %v2971_v1 = vmul.f32 %v2968_v22, %v2968_v22 }
0x1450   : > { %v2969_v9 = vsub.f32 %v7214_v60, %v2966_v62  ;;  %v2970_v15 = vsub.f32 %v7209_v57, %v2967_v10  ;;  %v2974_v14 = vsel %vm812_vm2, %v2971_v1, 0.0 }
0x1451   : > { %2975 = vadd.xlane.f32.xlu1 %v2974_v14  ;;  %v6399_v14 = vld [vmem:[%s7712_s2 + $0x58] sm:$0xff]  }
0x1452   : > { %v2972_v4 = vmul.f32 %v2969_v9, %v2969_v9  ;;  %v2973_v19 = vmul.f32 %v2970_v15, %v2970_v15 }
0x1454   : > { %v2977_v16 = vsel %vm812_vm2, %v2972_v4, 0.0  ;;  %v2980_v12 = vsel %vm819_vm1, %v2973_v19, 0.0 }
0x1455   : > { %2978 = vadd.xlane.f32.xlu0 %v2977_v16  ;;  %2981 = vadd.xlane.f32.xlu1 %v2980_v12 }
0x14da   : > { %v2976_v5 = vpop.xlane.xlu1 %2975 }
0x14db   : > { %v2983_v7 = vmul.f32 0.03125, %v2976_v5 }
0x14dd   : > { %v2986_v11 = vadd.f32 1e-06, %v2983_v7 }
0x14de   : > { %v2982_v23 = vpop.xlane.xlu1 %2981  ;;  %v2979_v24 = vpop.xlane.xlu0 %2978 }
0x14df   : > { %6495 = vrsqrt.f32 %v2986_v11  ;;  %v2985_v2 = vmul.f32 0.03125, %v2982_v23  ;;  %v2984_v25 = vmul.f32 0.03125, %v2979_v24  ;;  %v6400_v11 = vld [vmem:[%s7712_s2 + $0x50] sm:$0xff]  }
0x14e1   : > { %v2988_v26 = vadd.f32 1e-06, %v2985_v2  ;;  %v2987_v17 = vadd.f32 1e-06, %v2984_v25 }
0x14e3   : > { %6497 = vrsqrt.f32 %v2988_v26 }
0x14e4   : > { %6499 = vrsqrt.f32 %v2987_v17 }
0x14ec   : > { %v6496_v27 = vpop.eup %6495 }
0x14ed   : > { %v2992_v28 = vmul.f32 %v6496_v27, %v2968_v22  ;;  %v5448_v22 = vld [vmem:[%s7655_s10 + $0x4] ss:$0 sm:$0xff] }
0x14ef   : > { %v3001_v33 = vmul.f32 %v5421_v29, %v2992_v28  ;;  %v5473_v28 = vld [vmem:[%s7717_s8 + $0x5] ss:$0 sm:$0xff] }
0x14f0   : > { %v6498_v30 = vpop.eup %6497 }
0x14f1   : > { %v6500_v31 = vpop.eup %6499  ;;  %v2994_v32 = vmul.f32 %v6498_v30, %v2970_v15  ;;  %v3010_v38 = vadd.f32 %v5422_v56, %v3001_v33 }
0x14f2   : > { %v2993_v34 = vmul.f32 %v6500_v31, %v2969_v9 }
0x14f3   : > { %v3003_v35 = vmul.f32 %v5421_v29, %v2994_v32 }
0x14f4   : > { %v3002_v36 = vmul.f32 %v5421_v29, %v2993_v34 }
0x14f5   : > { %v3012_v37 = vadd.f32 %v5422_v56, %v3003_v35 }
0x14f6   : > { %v3011_v39 = vadd.f32 %v5422_v56, %v3002_v36 }
0x14f7   : > { %v7241_v40 = vpack.c.bf16 %v3012_v37, %v3012_v37 }
0x14f8   : > { %v7243_v41 = vpack.c.bf16 %v3011_v39, %v3010_v38 }
0x14fa   : > { %6070 = vmatprep.mubr.msk.bf16.mxu0 %vm812_vm2, %v7243_v41 }
0x14fb   : > { %6071 = vmatmul.mubr.msk.bf16.vlgmr.msra.gmra.mxu0 %vm812_vm2, %v7241_v40 }
0x14fc   : > { %6075 = vmatpush3.bf16.msra.mxu0 %v6395_v20  ;;  %6078 = vmatprep.mubr.msk.bf16.mxu0 %vm812_vm2, %v7243_v41 }
0x14fd   : > { %6076 = vmatprep.subr.bf16.mxu0 %v6396_v42 }
0x1500   : > { %6077 = vmatpush3.bf16.msra.mxu0 %v6396_v42 }
0x1501   : > { %6082 = vmatprep.subr.bf16.mxu0 %v6397_v43 }
0x1503   : > { %6079 = vmatmul.mubr.msk.bf16.vlgmr.msra.gmra.mxu0 %vm812_vm2, %v7241_v40 }
0x1504   : > { %6083 = vmatpush3.bf16.msra.mxu0 %v6397_v43  ;;  %6086 = vmatprep.mubr.msk.bf16.mxu0 %vm812_vm2, %v7243_v41 }
0x1505   : > { %6084 = vmatprep.subr.bf16.mxu0 %v6398_v44 }
0x1508   : > { %6085 = vmatpush3.bf16.msra.mxu0 %v6398_v44 }
0x150b   : > { %6087 = vmatmul.mubr.msk.bf16.vlgmr.msra.gmra.mxu0 %vm812_vm2, %v7241_v40 }
0x15bb   : > { %v6072_v45 = vpop.f32.mrf.mxu0 }
0x15bc   : > { %v3089_v13 = vadd.f32 %v6072_v45, %v5428_v48 }
0x15bd   : > { %v3080_v46 = vpop.f32.mrf.mxu0 }
0x15be   : > { %v3081_v51 = vadd.f32 %v5428_v48, %v3080_v46  ;;  %v3241_v7 = vpack.c.bf16 %v3089_v13, %v3089_v13  ;;  %v5457_v13 = vld [vmem:[%s7656_s11 + $0x10] sm:$0xf] }
0x15bf   : > { %v6073_v47 = vpop.f32.mrf.mxu0 }
0x15c1   : > { %v3083_v49 = vpop.f32.mrf.mxu0 }
0x15c2   : > { %v3084_v52 = vadd.f32 %v5428_v48, %v3083_v49 }
0x15c3   : > { %v6080_v53 = vpop.f32.mrf.mxu0 }
0x15c4   : > { %v3240_v55 = vpack.c.bf16 %v3084_v52, %v3081_v51  ;;  %v3162_v58 = vadd.f32 %v6080_v53, %v5438_v50 }
0x15c5   : > { %v3153_v59 = vpop.f32.mrf.mxu0 }
0x15c6   : > { %v3243_v61 = vpack.c.bf16 %v3162_v58, %v3162_v58  ;;  %6094 = vmatprep.mubr.msk.bf16.mxu0 %vm1097_vm4, %v3240_v55  ;;  %v3154_v63 = vadd.f32 %v5438_v50, %v3153_v59 }
0x15c7   : > { %v6081_v0 = vpop.f32.mrf.mxu0 }
0x15c8   : > { %v3254_v21 = vsel %vm1097_vm4, %v3243_v61, 0  ;;  %6298 = vmatprep.subr.msk.bf16.mxu0 %vm1097_vm4, %v3243_v61 }
0x15c9   : > { %v3156_v3 = vpop.f32.mrf.mxu0  ;;  %6091 = vmatpush3.bf16.xpose.msra.mxu0 %v3254_v21  ;;  %v6401_v21 = vld [vmem:[%s7709_s6 + $0x58] sm:$0xff]  }
0x15ca   : > { %v3157_v8 = vadd.f32 %v5438_v50, %v3156_v3 }
0x15cb   : > { %v6088_v62 = vpop.f32.mrf.mxu0 }
0x15cc   : > { %v3242_v10 = vpack.c.bf16 %v3157_v8, %v3154_v63  ;;  %v3235_v1 = vadd.f32 %v6088_v62, %v5448_v22 }
0x15cd   : > { %v3226_v9 = vpop.f32.mrf.mxu0 }
0x15ce   : > { %v3343_v15 = vpack.c.bf16 %v3235_v1, %v3235_v1  ;;  %6299 = vmatprep.subr.msk.bf16.mxu0 %vm1097_vm4, %v3242_v10  ;;  %v3251_v16 = vsel %vm1097_vm4, %v3242_v10, 0  ;;  %v3227_v18 = vadd.f32 %v5448_v22, %v3226_v9 }
0x15cf   : > { %v6089_v4 = vpop.f32.mrf.mxu0 }
0x15d0   : > { %v3351_v19 = vand.u32 %v3343_v15, %v6884_v6 }
0x15d1   : > { %v3229_v12 = vpop.f32.mrf.mxu0  ;;  %6093 = vmatpush3.bf16.xpose.msra.mxu0 %v3251_v16  ;;  %v6403_v16 = vld [vmem:[%s7710_s9 + $0x58] sm:$0xff]  }
0x15d2   : > { %v3230_v20 = vadd.f32 %v5448_v22, %v3229_v12  ;;  %6098 = vmatprep.subr.bf16.mxu1 %v3351_v19  ;;  %6114 = vmatprep.subr.bf16.mxu0 %v6399_v14  ;;  %v6404_v12 = vld [vmem:[%s7710_s9 + $0x50] sm:$0xff]  }
0x15d3   : > { %6099 = vmatpush3.bf16.msra.mxu1 %v3351_v19  ;;  %v6402_v19 = vld [vmem:[%s7709_s6 + $0x50] sm:$0xff]  }
0x15d4   : > { %v3342_v5 = vpack.c.bf16 %v3230_v20, %v3227_v18 }
0x15d6   : > { %6100 = vmatprep.subr.bf16.mxu1 %v3342_v5 }
0x15d7   : > { %6101 = vmatpush3.bf16.msra.mxu1 %v3342_v5 }
0x15d8   : > { %6095 = vmatmul.mubr.msk.bf16.vlgmr.msra.gmra.mxu0 %vm1097_vm4, %v3241_v7  ;;  %6106 = vmatprep.subr.bf16.mxu1 %v6401_v21 }
0x15d9   : > { %6115 = vmatpush3.bf16.msra.mxu0 %v6399_v14  ;;  %6118 = vmatprep.mubr.msk.bf16.mxu0 %vm812_vm2, %v7243_v41 }
0x15da   : > { %6116 = vmatprep.subr.bf16.mxu0 %v6400_v11 }
0x15dd   : > { %6117 = vmatpush3.bf16.msra.mxu0 %v6400_v11 }
0x15e0   : > { %6119 = vmatmul.mubr.msk.bf16.vlgmr.msra.gmra.mxu0 %vm812_vm2, %v7241_v40 }
0x1698   : > { %v6096_v23 = vpop.f32.mrf.mxu0 }
0x1699   : > { %v3306_v26 = vmul.f32 0.35355338, %v6096_v23 }
0x169a   : > { %v3290_v24 = vpop.f32.mrf.mxu0 }
0x169b   : > { %v3304_v2 = vmul.f32 0.35355338, %v3290_v24  ;;  %v3313_v32 = vsel %vm1168_vm6, %v3306_v26, -inf  ;;  %v5463_v24 = vld [vmem:[%s7716_s26 + $0x5] ss:$0 sm:$0xff] }
0x169c   : > { %v6097_v25 = vpop.f32.mrf.mxu0 }
0x169d   : > { %v3307_v17 = vsel %vm1161_vm5, %v3304_v2, -inf }
0x169e   : > { %3308 = vmax.xlane.f32.xlu0 %v3307_v17  ;;  %v3293_v27 = vpop.f32.mrf.mxu0  ;;  %v5483_v17 = vld [vmem:[%s7655_s10 + $0x5] ss:$0 sm:$0xff] }
0x169f   : > { %v3305_v29 = vmul.f32 0.35355338, %v3293_v27 }
0x16a0   : > { %v6120_v30 = vpop.f32.mrf.mxu0 }
0x16a1   : > { %v3546_v31 = vadd.f32 %v6120_v30, %v5473_v28  ;;  %v3310_v33 = vsel %vm1161_vm5, %v3305_v29, -inf }
0x16a2   : > { %3314 = vmax.xlane.f32.xlu0 %v3313_v32  ;;  %v3537_v34 = vpop.f32.mrf.mxu0  ;;  %3311 = vmax.xlane.f32.xlu1 %v3310_v33 }
0x16a3   : > { %v3627_v56 = vpack.c.bf16 %v3546_v31, %v3546_v31  ;;  %v3538_v38 = vadd.f32 %v5473_v28, %v3537_v34  ;;  %v3853_v34 = vsel %vm1653_vm7, %v5457_v13, 0 }
0x16a4   : > { %v6121_v35 = vpop.f32.mrf.mxu0 }
0x16a5   : > { %v3638_v36 = vsel %vm1097_vm4, %v3627_v56, 0  ;;  %6300 = vmatprep.subr.msk.bf16.mxu0 %vm1097_vm4, %v3627_v56  ;;  %v6405_v56 = vld [vmem:[%s7712_s2 + $0x68] sm:$0xff]  }
0x16a6   : > { %v3540_v37 = vpop.f32.mrf.mxu0  ;;  %6131 = vmatpush3.bf16.xpose.msra.mxu0 %v3638_v36 }
0x16a7   : > { %v3541_v39 = vadd.f32 %v5473_v28, %v3540_v37 }
0x16a9   : > { %v3626_v42 = vpack.c.bf16 %v3541_v39, %v3538_v38 }
0x16ab   : > { %6301 = vmatprep.subr.msk.bf16.mxu0 %vm1097_vm4, %v3626_v42  ;;  %v3635_v43 = vsel %vm1097_vm4, %v3626_v42, 0 }
0x16ae   : > { %6133 = vmatpush3.bf16.xpose.msra.mxu0 %v3635_v43 }
0x16af   : > { %6303 = vmatprep.subr.msk.bf16.mxu0 %vm1653_vm7, %v5457_v13 }
0x1727   : > { %v3309_v44 = vpop.xlane.xlu0 %3308 }
0x1728   : > { %v3316_v45 = vsub.f32 %v3304_v2, %v3309_v44 }
0x172a   : > { %v3319_v46 = vmul.f32 1.442695, %v3316_v45 }
0x172b   : > { %v3315_v47 = vpop.xlane.xlu0 %3314  ;;  %v3312_v48 = vpop.xlane.xlu1 %3311 }
0x172c   : > { %6501 = vpow2.f32 %v3319_v46  ;;  %v3318_v49 = vsub.f32 %v3306_v26, %v3315_v47  ;;  %v3317_v50 = vsub.f32 %v3305_v29, %v3312_v48  ;;  %v6406_v46 = vld [vmem:[%s7712_s2 + $0x60] sm:$0xff]  }
0x172e   : > { %v3323_v51 = vmul.f32 1.442695, %v3318_v49  ;;  %v3321_v52 = vmul.f32 1.442695, %v3317_v50 }
0x1730   : > { %6503 = vpow2.f32 %v3323_v51 }
0x1731   : > { %6505 = vpow2.f32 %v3321_v52 }
0x1739   : > { %v6502_v53 = vpop.eup %6501 }
0x173a   : > { %v3325_v55 = vsel %vm1161_vm5, %v6502_v53, 0.0 }
0x173b   : > { %3326 = vadd.xlane.f32.xlu1 %v3325_v55 }
0x173d   : > { %v6504_v58 = vpop.eup %6503 }
0x173e   : > { %v6506_v59 = vpop.eup %6505  ;;  %v3331_v61 = vsel %vm1168_vm6, %v6504_v58, 0.0 }
0x173f   : > { %3332 = vadd.xlane.f32.xlu1 %v3331_v61  ;;  %v3328_v0 = vsel %vm1161_vm5, %v6506_v59, 0.0 }
0x1740   : > { %3329 = vadd.xlane.f32.xlu0 %v3328_v0 }
0x17c4   : > { %v3327_v3 = vpop.xlane.xlu1 %3326 }
0x17c5   : > { %6507 = vrcp.f32 %v3327_v3 }
0x17c8   : > { %v3333_v22 = vpop.xlane.xlu1 %3332 }
0x17c9   : > { %v3330_v63 = vpop.xlane.xlu0 %3329  ;;  %6509 = vrcp.f32 %v3333_v22  ;;  %v5512_v22 = vld [vmem:[%s7717_s8 + $0x6] ss:$0 sm:$0xff] }
0x17ca   : > { %6511 = vrcp.f32 %v3330_v63 }
0x17d2   : > { %v6508_v8 = vpop.eup %6507 }
0x17d3   : > { %v3337_v9 = vmul.f32 %v6508_v8, %v6502_v53 }
0x17d6   : > { %v6510_v62 = vpop.eup %6509 }
0x17d7   : > { %v6512_v10 = vpop.eup %6511  ;;  %v3339_v1 = vmul.f32 %v6510_v62, %v6504_v58 }
0x17d8   : > { %v3338_v15 = vmul.f32 %v6512_v10, %v6506_v59 }
0x17d9   : > { %v3341_v14 = vpack.c.bf16 %v3339_v1, %v3339_v1 }
0x17da   : > { %v3340_v4 = vpack.c.bf16 %v3338_v15, %v3337_v9 }
0x17dc   : > { %6102 = vmatprep.mubr.msk.bf16.mxu1 %vm1161_vm5, %v3340_v4 }
0x17dd   : > { %6103 = vmatmul.mubr.msk.bf16.vlgmr.msra.gmra.mxu1 %vm1161_vm5, %v3341_v14 }
0x17de   : > { %6107 = vmatpush3.bf16.msra.mxu1 %v6401_v21  ;;  %6110 = vmatprep.mubr.msk.bf16.mxu1 %vm812_vm2, %v7243_v41 }
0x17df   : > { %6108 = vmatprep.subr.bf16.mxu1 %v6402_v19 }
0x17e2   : > { %6109 = vmatpush3.bf16.msra.mxu1 %v6402_v19 }
0x17e3   : > { %6122 = vmatprep.subr.bf16.mxu1 %v6403_v16 }
0x17e5   : > { %6111 = vmatmul.mubr.msk.bf16.vlgmr.msra.gmra.mxu1 %vm812_vm2, %v7241_v40 }
0x17e6   : > { %6123 = vmatpush3.bf16.msra.mxu1 %v6403_v16  ;;  %6126 = vmatprep.mubr.msk.bf16.mxu1 %vm812_vm2, %v7243_v41 }
0x17e7   : > { %6124 = vmatprep.subr.bf16.mxu1 %v6404_v12 }
0x17ea   : > { %6125 = vmatpush3.bf16.msra.mxu1 %v6404_v12 }
0x17ed   : > { %6127 = vmatmul.mubr.msk.bf16.vlgmr.msra.gmra.mxu1 %vm812_vm2, %v7241_v40 }
0x189d   : > { %v6104_v18 = vpop.f32.mrf.mxu1 }
0x189e   : > { %v3402_v45 = vpack.c.bf16 %v6104_v18, %v6104_v18 }
0x189f   : > { %v3387_v20 = vpop.f32.mrf.mxu1 }
0x18a1   : > { %v6105_v5 = vpop.f32.mrf.mxu1 }
0x18a3   : > { %v3390_v7 = vpop.f32.mrf.mxu1 }
0x18a4   : > { %v3401_v35 = vpack.c.bf16 %v3390_v7, %v3387_v20 }
0x18a5   : > { %v6112_v11 = vpop.f32.mrf.mxu1 }
0x18a6   : > { %v3473_v25 = vadd.f32 %v6112_v11, %v5463_v24 }
0x18a7   : > { %v3464_v23 = vpop.f32.mrf.mxu1 }
0x18a8   : > { %v3465_v27 = vadd.f32 %v5463_v24, %v3464_v23  ;;  %v3625_v32 = vpack.c.bf16 %v3473_v25, %v3473_v25 }
0x18a9   : > { %v6113_v2 = vpop.f32.mrf.mxu1 }
0x18ab   : > { %v3467_v26 = vpop.f32.mrf.mxu1 }
0x18ac   : > { %v3468_v28 = vadd.f32 %v5463_v24, %v3467_v26 }
0x18ad   : > { %v6128_v29 = vpop.f32.mrf.mxu1 }
0x18ae   : > { %v3624_v30 = vpack.c.bf16 %v3468_v28, %v3465_v27  ;;  %v3619_v31 = vadd.f32 %v6128_v29, %v5483_v17 }
0x18af   : > { %v3610_v33 = vpop.f32.mrf.mxu1 }
0x18b0   : > { %v3727_v36 = vpack.c.bf16 %v3619_v31, %v3619_v31  ;;  %6134 = vmatprep.mubr.msk.bf16.mxu0 %vm1097_vm4, %v3624_v30  ;;  %v3611_v42 = vadd.f32 %v5483_v17, %v3610_v33 }
0x18b1   : > { %v6129_v37 = vpop.f32.mrf.mxu1  ;;  %6135 = vmatmul.mubr.msk.bf16.vlgmr.msra.gmra.mxu0 %vm1097_vm4, %v3625_v32 }
0x18b2   : > { %v3735_v38 = vand.u32 %v3727_v36, %v6884_v6  ;;  %6154 = vmatprep.mubr.msk.bf16.mxu0 %vm1097_vm4, %v3401_v35  ;;  %6153 = vmatpush3.bf16.msra.mxu0 %v3853_v34 }
0x18b3   : > { %v3613_v39 = vpop.f32.mrf.mxu1  ;;  %6166 = vmatprep.subr.bf16.mxu0 %v6405_v56 }
0x18b4   : > { %v3614_v43 = vadd.f32 %v5483_v17, %v3613_v39  ;;  %6138 = vmatprep.subr.bf16.mxu1 %v3735_v38  ;;  %v5492_v39 = vld [vmem:[%s7656_s11 + $0x14] sm:$0xf] }
0x18b5   : > { %6139 = vmatpush3.bf16.msra.mxu1 %v3735_v38 }
0x18b6   : > { %v3726_v44 = vpack.c.bf16 %v3614_v43, %v3611_v42  ;;  %v3796_v42 = vsel %vm1653_vm7, %v5492_v39, 0  ;;  %v6407_v43 = vld [vmem:[%s7709_s6 + $0x68] sm:$0xff]  }
0x18b8   : > { %6140 = vmatprep.subr.bf16.mxu1 %v3726_v44 }
0x18b9   : > { %6141 = vmatpush3.bf16.msra.mxu1 %v3726_v44  ;;  %6155 = vmatmul.mubr.msk.bf16.vlgmr.msra.gmra.mxu0 %vm1097_vm4, %v3402_v45 }
0x18ba   : > { %6167 = vmatpush3.bf16.msra.mxu0 %v6405_v56  ;;  %6170 = vmatprep.mubr.msk.bf16.mxu0 %vm812_vm2, %v7243_v41 }
0x18bb   : > { %6168 = vmatprep.subr.bf16.mxu0 %v6406_v46  ;;  %6302 = vmatprep.subr.msk.bf16.mxu1 %vm1653_vm7, %v5492_v39 }
0x18be   : > { %6169 = vmatpush3.bf16.msra.mxu0 %v6406_v46 }
0x18c1   : > { %6171 = vmatmul.mubr.msk.bf16.vlgmr.msra.gmra.mxu0 %vm812_vm2, %v7241_v40 }
0x1971   : > { %v6136_v47 = vpop.f32.mrf.mxu0 }
0x1972   : > { %v3690_v51 = vmul.f32 0.35355338, %v6136_v47 }
0x1973   : > { %v3674_v48 = vpop.f32.mrf.mxu0 }
0x1974   : > { %v3688_v49 = vmul.f32 0.35355338, %v3674_v48  ;;  %v3697_v59 = vsel %vm1168_vm6, %v3690_v51, -inf }
0x1975   : > { %v6137_v50 = vpop.f32.mrf.mxu0 }
0x1976   : > { %v3691_v52 = vsel %vm1161_vm5, %v3688_v49, -inf  ;;  %v6408_v50 = vld [vmem:[%s7709_s6 + $0x60] sm:$0xff]  }
0x1977   : > { %3692 = vmax.xlane.f32.xlu0 %v3691_v52  ;;  %v3677_v53 = vpop.f32.mrf.mxu0  ;;  %v6410_v52 = vld [vmem:[%s7710_s9 + $0x60] sm:$0xff]  }
0x1978   : > { %v3689_v55 = vmul.f32 0.35355338, %v3677_v53  ;;  %v6411_v53 = vld [vmem:[%s7709_s6 + $0x78] sm:$0xff]  }
0x1979   : > { %v7354_v58 = vpop.f32.mrf.mxu0 }
0x197a   : > { %v3694_v61 = vsel %vm1161_vm5, %v3689_v55, -inf }
0x197b   : > { %3698 = vmax.xlane.f32.xlu0 %v3697_v59  ;;  %3695 = vmax.xlane.f32.xlu1 %v3694_v61  ;;  %v7358_v0 = vpop.f32.mrf.mxu0 }
0x197d   : > { %v6157_v21 = vpop.f32.mrf.mxu0 }
0x197f   : > { %v7360_v3 = vpop.f32.mrf.mxu0 }
0x1981   : > { %v6172_v63 = vpop.f32.mrf.mxu0 }
0x1982   : > { %v4044_v8 = vadd.f32 %v6172_v63, %v5512_v22 }
0x1983   : > { %v4035_v62 = vpop.f32.mrf.mxu0 }
0x1984   : > { %v4125_v10 = vpack.c.bf16 %v4044_v8, %v4044_v8  ;;  %v4036_v14 = vadd.f32 %v5512_v22, %v4035_v62  ;;  %v5502_v8 = vld [vmem:[%s7716_s26 + $0x6] ss:$0 sm:$0xff] }
0x1985   : > { %v6173_v1 = vpop.f32.mrf.mxu0 }
0x1986   : > { %v4136_v9 = vsel %vm1097_vm4, %v4125_v10, 0  ;;  %6304 = vmatprep.subr.msk.bf16.mxu0 %vm1097_vm4, %v4125_v10 }
0x1987   : > { %v4038_v15 = vpop.f32.mrf.mxu0  ;;  %6183 = vmatpush3.bf16.xpose.msra.mxu0 %v4136_v9  ;;  %v5522_v9 = vld [vmem:[%s7655_s10 + $0x6] ss:$0 sm:$0xff] }
0x1988   : > { %v4039_v4 = vadd.f32 %v5512_v22, %v4038_v15 }
0x198a   : > { %v4124_v19 = vpack.c.bf16 %v4039_v4, %v4036_v14 }
0x198c   : > { %6305 = vmatprep.subr.msk.bf16.mxu0 %vm1097_vm4, %v4124_v19  ;;  %v4133_v16 = vsel %vm1097_vm4, %v4124_v19, 0 }
0x198f   : > { %6185 = vmatpush3.bf16.xpose.msra.mxu0 %v4133_v16 }
0x1990   : > { %6204 = vmatprep.subr.bf16.mxu0 %v6411_v53 }
0x1a00   : > { %v3693_v12 = vpop.xlane.xlu0 %3692 }
0x1a01   : > { %v3700_v13 = vsub.f32 %v3688_v49, %v3693_v12 }
0x1a03   : > { %v3703_v18 = vmul.f32 1.442695, %v3700_v13 }
0x1a04   : > { %v3699_v20 = vpop.xlane.xlu0 %3698  ;;  %v3696_v5 = vpop.xlane.xlu1 %3695 }
0x1a05   : > { %6513 = vpow2.f32 %v3703_v18  ;;  %v3702_v7 = vsub.f32 %v3690_v51, %v3699_v20  ;;  %v3701_v11 = vsub.f32 %v3689_v55, %v3696_v5  ;;  %v6409_v51 = vld [vmem:[%s7710_s9 + $0x68] sm:$0xff]   ;;  %v6412_v18 = vld [vmem:[%s7709_s6 + $0x70] sm:$0xff]  }
0x1a07   : > { %v3707_v23 = vmul.f32 1.442695, %v3702_v7  ;;  %v3705_v24 = vmul.f32 1.442695, %v3701_v11 }
0x1a09   : > { %6515 = vpow2.f32 %v3707_v23  ;;  %v6413_v23 = vld [vmem:[%s7710_s9 + $0x78] sm:$0xff]  }
0x1a0a   : > { %6517 = vpow2.f32 %v3705_v24 }
0x1a12   : > { %v6514_v2 = vpop.eup %6513 }
0x1a13   : > { %v3709_v25 = vsel %vm1161_vm5, %v6514_v2, 0.0 }
0x1a14   : > { %3710 = vadd.xlane.f32.xlu1 %v3709_v25 }
0x1a16   : > { %v6516_v26 = vpop.eup %6515 }
0x1a17   : > { %v6518_v17 = vpop.eup %6517  ;;  %v3715_v27 = vsel %vm1168_vm6, %v6516_v26, 0.0 }
0x1a18   : > { %3716 = vadd.xlane.f32.xlu1 %v3715_v27  ;;  %v3712_v28 = vsel %vm1161_vm5, %v6518_v17, 0.0 }
0x1a19   : > { %3713 = vadd.xlane.f32.xlu0 %v3712_v28 }
0x1a9d   : > { %v3711_v29 = vpop.xlane.xlu1 %3710 }
0x1a9e   : > { %6519 = vrcp.f32 %v3711_v29 }
0x1aa1   : > { %v3717_v30 = vpop.xlane.xlu1 %3716 }
0x1aa2   : > { %v3714_v31 = vpop.xlane.xlu0 %3713  ;;  %6521 = vrcp.f32 %v3717_v30 }
0x1aa3   : > { %6523 = vrcp.f32 %v3714_v31 }
0x1aab   : > { %v6520_v32 = vpop.eup %6519 }
0x1aac   : > { %v3721_v35 = vmul.f32 %v6520_v32, %v6514_v2 }
0x1aaf   : > { %v6522_v33 = vpop.eup %6521 }
0x1ab0   : > { %v6524_v34 = vpop.eup %6523  ;;  %v3723_v56 = vmul.f32 %v6522_v33, %v6516_v26  ;;  %v6414_v26 = vld [vmem:[%s7710_s9 + $0x70] sm:$0xff]   ;;  %v5539_v33 = vld [vmem:[%s7716_s26 + $0x7] ss:$0 sm:$0xff]  ;;  %s6567_s9 = sshll.u32 %s6628_s5, 4  ;;  %s6568_s9 = int_to_ptr.vmem [resolvable:$false] %s6567_s9 }
0x1ab1   : > { %v3722_v36 = vmul.f32 %v6524_v34, %v6518_v17  ;;  %s6569_s6 = scalar_lea.vmem %s6568_s9, 32 }
0x1ab2   : > { %v3725_v37 = vpack.c.bf16 %v3723_v56, %v3723_v56 }
0x1ab3   : > { %v3724_v38 = vpack.c.bf16 %v3722_v36, %v3721_v35 }
0x1ab5   : > { %6142 = vmatprep.mubr.msk.bf16.mxu1 %vm1161_vm5, %v3724_v38 }
0x1ab6   : > { %6143 = vmatmul.mubr.msk.bf16.vlgmr.msra.gmra.mxu1 %vm1161_vm5, %v3725_v37 }
0x1ab7   : > { %6147 = vmatpush3.bf16.msra.mxu1 %v3796_v42 }
0x1ab8   : > { %6158 = vmatprep.subr.bf16.mxu1 %v6407_v43 }
0x1b76   : > { %v6144_v44 = vpop.f32.mrf.mxu1 }
0x1b77   : > { %v3786_v49 = vpack.c.bf16 %v6144_v44, %v6144_v44 }
0x1b78   : > { %v3771_v45 = vpop.f32.mrf.mxu1 }
0x1b7a   : > { %v6145_v46 = vpop.f32.mrf.mxu1 }
0x1b7c   : > { %v3774_v47 = vpop.f32.mrf.mxu1 }
0x1b7d   : > { %v3785_v48 = vpack.c.bf16 %v3774_v47, %v3771_v45 }
0x1b7f   : > { %6148 = vmatprep.mubr.msk.bf16.mxu1 %vm1097_vm4, %v3785_v48 }
0x1b80   : > { %6149 = vmatmul.mubr.msk.bf16.vlgmr.msra.gmra.mxu1 %vm1097_vm4, %v3786_v49 }
0x1b81   : > { %6159 = vmatpush3.bf16.msra.mxu1 %v6407_v43  ;;  %6162 = vmatprep.mubr.msk.bf16.mxu1 %vm812_vm2, %v7243_v41  ;;  %v5559_v43 = vld [vmem:[%s7655_s10 + $0x7] ss:$0 sm:$0xff] }
0x1b82   : > { %6160 = vmatprep.subr.bf16.mxu1 %v6408_v50 }
0x1b85   : > { %6161 = vmatpush3.bf16.msra.mxu1 %v6408_v50 }
0x1b86   : > { %6174 = vmatprep.subr.bf16.mxu1 %v6409_v51 }
0x1b88   : > { %6163 = vmatmul.mubr.msk.bf16.vlgmr.msra.gmra.mxu1 %vm812_vm2, %v7241_v40 }
0x1b89   : > { %6175 = vmatpush3.bf16.msra.mxu1 %v6409_v51  ;;  %6178 = vmatprep.mubr.msk.bf16.mxu1 %vm812_vm2, %v7243_v41 }
0x1b8a   : > { %6176 = vmatprep.subr.bf16.mxu1 %v6410_v52 }
0x1b8d   : > { %6177 = vmatpush3.bf16.msra.mxu1 %v6410_v52 }
0x1b90   : > { %6179 = vmatmul.mubr.msk.bf16.vlgmr.msra.gmra.mxu1 %vm812_vm2, %v7241_v40 }
0x1c40   : > { %v7404_v55 = vpop.f32.mrf.mxu1 }
0x1c42   : > { %v7406_v59 = vpop.f32.mrf.mxu1 }
0x1c44   : > { %v6151_v61 = vpop.f32.mrf.mxu1 }
0x1c46   : > { %v7408_v21 = vpop.f32.mrf.mxu1 }
0x1c48   : > { %v6164_v22 = vpop.f32.mrf.mxu1 }
0x1c49   : > { %v3971_v10 = vadd.f32 %v6164_v22, %v5502_v8 }
0x1c4a   : > { %v3962_v63 = vpop.f32.mrf.mxu1 }
0x1c4b   : > { %v3963_v15 = vadd.f32 %v5502_v8, %v3962_v63  ;;  %v4123_v12 = vpack.c.bf16 %v3971_v10, %v3971_v10 }
0x1c4c   : > { %v6165_v62 = vpop.f32.mrf.mxu1 }
0x1c4e   : > { %v3965_v1 = vpop.f32.mrf.mxu1 }
0x1c4f   : > { %v3966_v14 = vadd.f32 %v5502_v8, %v3965_v1 }
0x1c50   : > { %v6180_v4 = vpop.f32.mrf.mxu1 }
0x1c51   : > { %v4122_v19 = vpack.c.bf16 %v3966_v14, %v3963_v15  ;;  %v4117_v16 = vadd.f32 %v6180_v4, %v5522_v9 }
0x1c52   : > { %v4108_v13 = vpop.f32.mrf.mxu1 }
0x1c53   : > { %v4225_v20 = vpack.c.bf16 %v4117_v16, %v4117_v16  ;;  %6186 = vmatprep.mubr.msk.bf16.mxu0 %vm1097_vm4, %v4122_v19  ;;  %v4109_v24 = vadd.f32 %v5522_v9, %v4108_v13 }
0x1c54   : > { %v6181_v5 = vpop.f32.mrf.mxu1  ;;  %6187 = vmatmul.mubr.msk.bf16.vlgmr.msra.gmra.mxu0 %vm1097_vm4, %v4123_v12 }
0x1c55   : > { %v4233_v7 = vand.u32 %v4225_v20, %v6884_v6  ;;  %6205 = vmatpush3.bf16.msra.mxu0 %v6411_v53  ;;  %6208 = vmatprep.mubr.msk.bf16.mxu0 %vm812_vm2, %v7243_v41 }
0x1c56   : > { %v4111_v11 = vpop.f32.mrf.mxu1  ;;  %6206 = vmatprep.subr.bf16.mxu0 %v6412_v18 }
0x1c57   : > { %v4112_v2 = vadd.f32 %v5522_v9, %v4111_v11  ;;  %6190 = vmatprep.subr.bf16.mxu1 %v4233_v7 }
0x1c58   : > { %6191 = vmatpush3.bf16.msra.mxu1 %v4233_v7 }
0x1c59   : > { %v4224_v25 = vpack.c.bf16 %v4112_v2, %v4109_v24  ;;  %6207 = vmatpush3.bf16.msra.mxu0 %v6412_v18 }
0x1c5a   : > { %6220 = vmatprep.subr.bf16.mxu0 %v6413_v23 }
0x1c5b   : > { %6192 = vmatprep.subr.bf16.mxu1 %v4224_v25 }
0x1c5c   : > { %6193 = vmatpush3.bf16.msra.mxu1 %v4224_v25  ;;  %6209 = vmatmul.mubr.msk.bf16.vlgmr.msra.gmra.mxu0 %vm812_vm2, %v7241_v40 }
0x1c5d   : > { %6221 = vmatpush3.bf16.msra.mxu0 %v6413_v23  ;;  %6224 = vmatprep.mubr.msk.bf16.mxu0 %vm812_vm2, %v7243_v41 }
0x1c5e   : > { %6222 = vmatprep.subr.bf16.mxu0 %v6414_v26 }
0x1c61   : > { %6223 = vmatpush3.bf16.msra.mxu0 %v6414_v26 }
0x1c64   : > { %6225 = vmatmul.mubr.msk.bf16.vlgmr.msra.gmra.mxu0 %vm812_vm2, %v7241_v40 }
0x1d14   : > { %v6188_v17 = vpop.f32.mrf.mxu0 }
0x1d15   : > { %v4188_v30 = vmul.f32 0.35355338, %v6188_v17 }
0x1d16   : > { %v4172_v27 = vpop.f32.mrf.mxu0 }
0x1d17   : > { %v4186_v28 = vmul.f32 0.35355338, %v4172_v27  ;;  %v4195_v36 = vsel %vm1168_vm6, %v4188_v30, -inf }
0x1d18   : > { %v6189_v29 = vpop.f32.mrf.mxu0 }
0x1d19   : > { %v4189_v31 = vsel %vm1161_vm5, %v4186_v28, -inf  ;;  %v5531_v29 = vld [vmem:[%s7656_s11 + $0x18] sm:$0xf] }
0x1d1a   : > { %4190 = vmax.xlane.f32.xlu0 %v4189_v31  ;;  %v4175_v32 = vpop.f32.mrf.mxu0  ;;  %6306 = vmatprep.subr.msk.bf16.mxu1 %vm1653_vm7, %v5531_v29  ;;  %v6415_v31 = vld [vmem:[%s7712_s2 + $0x78] sm:$0xff]  }
0x1d1b   : > { %v4187_v34 = vmul.f32 0.35355338, %v4175_v32 }
0x1d1c   : > { %v6210_v56 = vpop.f32.mrf.mxu0 }
0x1d1d   : > { %v7440_v35 = vadd.f32 %v6210_v56, %v5539_v33  ;;  %v4192_v37 = vsel %vm1161_vm5, %v4187_v34, -inf }
0x1d1e   : > { %4196 = vmax.xlane.f32.xlu0 %v4195_v36  ;;  %v4406_v38 = vpop.f32.mrf.mxu0  ;;  %4193 = vmax.xlane.f32.xlu1 %v4192_v37 }
0x1d1f   : > { %v7447_v44 = vadd.f32 %v5539_v33, %v4406_v38  ;;  %v6416_v38 = vld [vmem:[%s7712_s2 + $0x70] sm:$0xff]   ;;  %s702_s2 = scalar_lea.vmem [#allocation2], %s701_s0 }
0x1d20   : > { %v6211_v39 = vpop.f32.mrf.mxu0  ;;  %s5200_s24 = sshll.u32 %s702_s2, 4  ;;  %s7606_s24 = int_to_ptr.vmem [resolvable:$true] %s5200_s24 }
0x1d21   : > { %v3898_v39 = vadd.f32 %v7354_v58, %v7404_v55  ;;  %s6563_s29 = scalar_lea.vmem %s7606_s24, 16  ;;  %p6570_p0 = scmp.lt.s32.totalorder %s7606_s24, %s6568_s9 }
0x1d22   : > { %v4409_v42 = vpop.f32.mrf.mxu0  ;;  %p6564_p11 = scmp.ne.s32.totalorder %s7606_s24, %s6563_s29  ;;  %p6571_p1 = scmp.lt.s32.totalorder %s6569_s6, %s6563_s29 }
0x1d23   : > { %v7449_v45 = vadd.f32 %v5539_v33, %v4409_v42 }
0x1d24   : > { %v6226_v46 = vpop.f32.mrf.mxu0  ;;  %p6565_p12 = pnand %p6564_p11, %p6787_p5  ;;  %p6572_p2 = por %p6571_p1, %p6570_p0 }
0x1d25   : > { %v4566_v47 = vpack.c.bf16 %v7449_v45, %v7447_v44  ;;  %v4561_v48 = vadd.f32 %v6226_v46, %v5559_v43  ;;  %v5549_v44 = vld [vmem:[%s7717_s8 + $0x7] ss:$0 sm:$0xff]  ;;  %s7719_s8 = smov %s7718_s4 }
0x1d26   : > { %v4552_v49 = vpop.f32.mrf.mxu0  ;;  %p6566_p13 = pneg %p6565_p12 }
0x1d27   : > { %v4669_v50 = vpack.c.bf16 %v4561_v48, %v4561_v48  ;;  %v4553_v61 = vadd.f32 %v5559_v43, %v4552_v49 }
0x1d28   : > { %v6227_v51 = vpop.f32.mrf.mxu0  ;;  %p6573_p3 = pnand %p6572_p2, %p6566_p13 }
0x1d29   : > { %v4677_v52 = vand.u32 %v4669_v50, %v6884_v6 }
0x1d2a   : > { %v4555_v53 = vpop.f32.mrf.mxu0 }
0x1d2b   : > { %v4556_v22 = vadd.f32 %v5559_v43, %v4555_v53  ;;  %6236 = vmatprep.subr.bf16.mxu0 %v4677_v52  ;;  %v3890_v43 = vadd.f32 %v7358_v0, %v7406_v59 }
0x1d2c   : > { %6237 = vmatpush3.bf16.msra.mxu0 %v4677_v52 }
0x1d2d   : > { %v4668_v63 = vpack.c.bf16 %v4556_v22, %v4553_v61  ;;  %v4567_v22 = vpack.c.bf16 %v7440_v35, %v7440_v35 }
0x1d2f   : > { %6238 = vmatprep.subr.bf16.mxu0 %v4668_v63 }
0x1d30   : > { %6239 = vmatpush3.bf16.msra.mxu0 %v4668_v63 }
0x1da3   : > { %v4191_v8 = vpop.xlane.xlu0 %4190 }
0x1da4   : > { %v4198_v62 = vsub.f32 %v4186_v28, %v4191_v8 }
0x1da6   : > { %v4201_v10 = vmul.f32 1.442695, %v4198_v62 }
0x1da7   : > { %v4197_v1 = vpop.xlane.xlu0 %4196  ;;  %v4194_v9 = vpop.xlane.xlu1 %4193 }
0x1da8   : > { %6525 = vpow2.f32 %v4201_v10  ;;  %v4200_v15 = vsub.f32 %v4188_v30, %v4197_v1  ;;  %v4199_v14 = vsub.f32 %v4187_v34, %v4194_v9  ;;  %v4294_v30 = vsel %vm1653_vm7, %v5531_v29, 0 }
0x1daa   : > { %v4205_v4 = vmul.f32 1.442695, %v4200_v15  ;;  %v4203_v19 = vmul.f32 1.442695, %v4199_v14 }
0x1dac   : > { %6527 = vpow2.f32 %v4205_v4 }
0x1dad   : > { %6529 = vpow2.f32 %v4203_v19 }
0x1db5   : > { %v6526_v6 = vpop.eup %6525 }
0x1db6   : > { %v4207_v16 = vsel %vm1161_vm5, %v6526_v6, 0.0 }
0x1db7   : > { %4208 = vadd.xlane.f32.xlu1 %v4207_v16 }
0x1db9   : > { %v6528_v12 = vpop.eup %6527 }
0x1dba   : > { %v6530_v13 = vpop.eup %6529  ;;  %v4213_v18 = vsel %vm1168_vm6, %v6528_v12, 0.0 }
0x1dbb   : > { %4214 = vadd.xlane.f32.xlu1 %v4213_v18  ;;  %v4210_v20 = vsel %vm1161_vm5, %v6530_v13, 0.0 }
0x1dbc   : > { %4211 = vadd.xlane.f32.xlu0 %v4210_v20 }
0x1e40   : > { %v4209_v5 = vpop.xlane.xlu1 %4208 }
0x1e41   : > { %6531 = vrcp.f32 %v4209_v5 }
0x1e44   : > { %v4215_v7 = vpop.xlane.xlu1 %4214 }
0x1e45   : > { %v4212_v11 = vpop.xlane.xlu0 %4211  ;;  %6533 = vrcp.f32 %v4215_v7 }
0x1e46   : > { %6535 = vrcp.f32 %v4212_v11 }
0x1e4e   : > { %v6532_v23 = vpop.eup %6531 }
0x1e4f   : > { %v4219_v26 = vmul.f32 %v6532_v23, %v6526_v6 }
0x1e52   : > { %v6534_v24 = vpop.eup %6533 }
0x1e53   : > { %v6536_v2 = vpop.eup %6535  ;;  %v4221_v25 = vmul.f32 %v6534_v24, %v6528_v12 }
0x1e54   : > { %v4220_v17 = vmul.f32 %v6536_v2, %v6530_v13 }
0x1e55   : > { %v4223_v27 = vpack.c.bf16 %v4221_v25, %v4221_v25 }
0x1e56   : > { %v4222_v28 = vpack.c.bf16 %v4220_v17, %v4219_v26 }
0x1e58   : > { %6194 = vmatprep.mubr.msk.bf16.mxu1 %vm1161_vm5, %v4222_v28 }
0x1e59   : > { %6195 = vmatmul.mubr.msk.bf16.vlgmr.msra.gmra.mxu1 %vm1161_vm5, %v4223_v27 }
0x1e5a   : > { %6199 = vmatpush3.bf16.msra.mxu1 %v4294_v30 }
0x1e5b   : > { %6212 = vmatprep.subr.bf16.mxu1 %v6415_v31 }
0x1f19   : > { %v6196_v32 = vpop.f32.mrf.mxu1 }
0x1f1a   : > { %v4284_v37 = vpack.c.bf16 %v6196_v32, %v6196_v32 }
0x1f1b   : > { %v4269_v33 = vpop.f32.mrf.mxu1 }
0x1f1d   : > { %v6197_v34 = vpop.f32.mrf.mxu1 }
0x1f1f   : > { %v4272_v56 = vpop.f32.mrf.mxu1 }
0x1f20   : > { %v4283_v36 = vpack.c.bf16 %v4272_v56, %v4269_v33 }
0x1f22   : > { %6200 = vmatprep.mubr.msk.bf16.mxu1 %vm1097_vm4, %v4283_v36 }
0x1f23   : > { %6201 = vmatmul.mubr.msk.bf16.vlgmr.msra.gmra.mxu1 %vm1097_vm4, %v4284_v37  ;;  %v5568_v37 = vld [vmem:[%s7656_s11 + $0x1c] sm:$0xf] }
0x1f24   : > { %6213 = vmatpush3.bf16.msra.mxu1 %v6415_v31  ;;  %6216 = vmatprep.mubr.msk.bf16.mxu1 %vm812_vm2, %v7243_v41 }
0x1f25   : > { %6214 = vmatprep.subr.bf16.mxu1 %v6416_v38  ;;  %6309 = vmatprep.subr.msk.bf16.mxu0 %vm1653_vm7, %v5568_v37 }
0x1f28   : > { %6215 = vmatpush3.bf16.msra.mxu1 %v6416_v38  ;;  %v4738_v38 = vsel %vm1653_vm7, %v5568_v37, 0 }
0x1f2b   : > { %6217 = vmatmul.mubr.msk.bf16.vlgmr.msra.gmra.mxu1 %vm812_vm2, %v7241_v40  ;;  %v3893_v40 = vadd.f32 %v7360_v3, %v7408_v21 }
0x1f2c   : > { %6232 = vmatprep.mubr.msk.bf16.mxu1 %vm1097_vm4, %v4566_v47 }
0x1fe3   : > { %v6202_v42 = vpop.f32.mrf.mxu1 }
0x1fe4   : > { %v7484_v46 = vadd.f32 %v6202_v42, %v3898_v39 }
0x1fe5   : > { %v4330_v41 = vpop.f32.mrf.mxu1 }
0x1fe6   : > { %v7486_v48 = vadd.f32 %v4330_v41, %v3890_v43 }
0x1fe7   : > { %v6203_v49 = vpop.f32.mrf.mxu1 }
0x1fe9   : > { %v4333_v50 = vpop.f32.mrf.mxu1 }
0x1fea   : > { %v7493_v45 = vadd.f32 %v4333_v50, %v3893_v40 }
0x1feb   : > { %v6218_v58 = vpop.f32.mrf.mxu1 }
0x1fec   : > { %v4488_v55 = vadd.f32 %v6218_v58, %v5549_v44 }
0x1fed   : > { %v4479_v47 = vpop.f32.mrf.mxu1 }
0x1fee   : > { %v4569_v0 = vpack.c.bf16 %v4488_v55, %v4488_v55  ;;  %v4480_v53 = vadd.f32 %v5549_v44, %v4479_v47 }
0x1fef   : > { %v6219_v59 = vpop.f32.mrf.mxu1 }
0x1ff0   : > { %v4580_v51 = vsel %vm1097_vm4, %v4569_v0, 0  ;;  %6307 = vmatprep.subr.msk.bf16.mxu1 %vm1097_vm4, %v4569_v0 }
0x1ff1   : > { %v4482_v52 = vpop.f32.mrf.mxu1  ;;  %6229 = vmatpush3.bf16.xpose.msra.mxu1 %v4580_v51  ;;  %v5572_v51 = vld [vmem:[%s7657_s12 + $0x1] ss:$0 sm:$0xff] }
0x1ff2   : > { %v4483_v3 = vadd.f32 %v5549_v44, %v4482_v52 }
0x1ff4   : > { %v4568_v21 = vpack.c.bf16 %v4483_v3, %v4480_v53 }
0x1ff6   : > { %6308 = vmatprep.subr.msk.bf16.mxu1 %vm1097_vm4, %v4568_v21  ;;  %v4577_v61 = vsel %vm1097_vm4, %v4568_v21, 0 }
0x1ff9   : > { %6231 = vmatpush3.bf16.xpose.msra.mxu1 %v4577_v61 }
0x2000   : > { %6233 = vmatmul.mubr.msk.bf16.vlgmr.msra.gmra.mxu1 %vm1097_vm4, %v4567_v22 }
0x20c0   : > { %v6234_v63 = vpop.f32.mrf.mxu1 }
0x20c1   : > { %v4632_v1 = vmul.f32 0.35355338, %v6234_v63 }
0x20c2   : > { %v4616_v8 = vpop.f32.mrf.mxu1 }
0x20c3   : > { %v4630_v62 = vmul.f32 0.35355338, %v4616_v8  ;;  %v4639_v4 = vsel %vm1168_vm6, %v4632_v1, -inf }
0x20c4   : > { %v6235_v10 = vpop.f32.mrf.mxu1 }
0x20c5   : > { %v4633_v9 = vsel %vm1161_vm5, %v4630_v62, -inf }
0x20c6   : > { %4634 = vmax.xlane.f32.xlu0 %v4633_v9  ;;  %v4619_v15 = vpop.f32.mrf.mxu1 }
0x20c7   : > { %v4631_v14 = vmul.f32 0.35355338, %v4619_v15 }
0x20c9   : > { %v4636_v19 = vsel %vm1161_vm5, %v4631_v14, -inf }
0x20ca   : > { %4640 = vmax.xlane.f32.xlu0 %v4639_v4  ;;  %4637 = vmax.xlane.f32.xlu1 %v4636_v19 }
0x214f   : > { %v4635_v6 = vpop.xlane.xlu0 %4634 }
0x2150   : > { %v4642_v35 = vsub.f32 %v4630_v62, %v4635_v6 }
0x2152   : > { %v4645_v16 = vmul.f32 1.442695, %v4642_v35 }
0x2153   : > { %v4641_v12 = vpop.xlane.xlu0 %4640  ;;  %v4638_v13 = vpop.xlane.xlu1 %4637 }
0x2154   : > { %6537 = vpow2.f32 %v4645_v16  ;;  %v4644_v18 = vsub.f32 %v4632_v1, %v4641_v12  ;;  %v4643_v20 = vsub.f32 %v4631_v14, %v4638_v13  ;;  %v6417_v16 = vld [vmem:[%s7660_s15 + $0x18] sm:$0xff]   ;;  %v6418_v12 = vld [vmem:[%s7660_s15 + $0x10] sm:$0xff]  }
0x2155   : > { %6250 = vmatprep.subr.bf16.mxu1 %v6417_v16 }
0x2156   : > { %v4649_v5 = vmul.f32 1.442695, %v4644_v18  ;;  %v4647_v7 = vmul.f32 1.442695, %v4643_v20  ;;  %6251 = vmatpush3.bf16.msra.mxu1 %v6417_v16 }
0x2157   : > { %6252 = vmatprep.subr.bf16.mxu1 %v6418_v12 }
0x2158   : > { %6539 = vpow2.f32 %v4649_v5 }
0x2159   : > { %6541 = vpow2.f32 %v4647_v7 }
0x215a   : > { %6253 = vmatpush3.bf16.msra.mxu1 %v6418_v12 }
0x2161   : > { %v6538_v11 = vpop.eup %6537 }
0x2162   : > { %v4651_v23 = vsel %vm1161_vm5, %v6538_v11, 0.0 }
0x2163   : > { %4652 = vadd.xlane.f32.xlu1 %v4651_v23 }
0x2165   : > { %v6540_v24 = vpop.eup %6539 }
0x2166   : > { %v6542_v2 = vpop.eup %6541  ;;  %v4657_v25 = vsel %vm1168_vm6, %v6540_v24, 0.0 }
0x2167   : > { %4658 = vadd.xlane.f32.xlu1 %v4657_v25  ;;  %v4654_v26 = vsel %vm1161_vm5, %v6542_v2, 0.0 }
0x2168   : > { %4655 = vadd.xlane.f32.xlu0 %v4654_v26 }
0x21ec   : > { %v4653_v17 = vpop.xlane.xlu1 %4652 }
0x21ed   : > { %6543 = vrcp.f32 %v4653_v17  ;;  %v5575_v17 = vld [vmem:[%s7658_s13 + $0x1] ss:$0 sm:$0xff] }
0x21f0   : > { %v4659_v27 = vpop.xlane.xlu1 %4658 }
0x21f1   : > { %v4656_v28 = vpop.xlane.xlu0 %4655  ;;  %6545 = vrcp.f32 %v4659_v27 }
0x21f2   : > { %6547 = vrcp.f32 %v4656_v28 }
0x21fa   : > { %v6544_v29 = vpop.eup %6543 }
0x21fb   : > { %v4663_v33 = vmul.f32 %v6544_v29, %v6538_v11 }
0x21fe   : > { %v6546_v30 = vpop.eup %6545 }
0x21ff   : > { %v6548_v31 = vpop.eup %6547  ;;  %v4665_v32 = vmul.f32 %v6546_v30, %v6540_v24 }
0x2200   : > { %v4664_v34 = vmul.f32 %v6548_v31, %v6542_v2 }
0x2201   : > { %v4667_v56 = vpack.c.bf16 %v4665_v32, %v4665_v32  ;;  %v5576_v32 = vld [vmem:[%s7659_s14 + $0x1] ss:$0 sm:$0xff] }
0x2202   : > { %v4666_v36 = vpack.c.bf16 %v4664_v34, %v4663_v33 }
0x2204   : > { %6240 = vmatprep.mubr.msk.bf16.mxu0 %vm1161_vm5, %v4666_v36 }
0x2205   : > { %6241 = vmatmul.mubr.msk.bf16.vlgmr.msra.gmra.mxu0 %vm1161_vm5, %v4667_v56 }
0x2206   : > { %6245 = vmatpush3.bf16.msra.mxu0 %v4738_v38 }
0x22c5   : > { %v6242_v39 = vpop.f32.mrf.mxu0 }
0x22c6   : > { %v4728_v40 = vpack.c.bf16 %v6242_v39, %v6242_v39 }
0x22c7   : > { %v4713_v42 = vpop.f32.mrf.mxu0 }
0x22c9   : > { %v6243_v43 = vpop.f32.mrf.mxu0 }
0x22ca   : > { %v6420_v43 = vld [vmem:[%s7662_s17 + $0x70] sm:$0xff]  }
0x22cb   : > { %v4716_v41 = vpop.f32.mrf.mxu0 }
0x22cc   : > { %v4727_v49 = vpack.c.bf16 %v4716_v41, %v4713_v42  ;;  %v6419_v42 = vld [vmem:[%s7662_s17 + $0x78] sm:$0xff]   ;;  %v6421_v41 = vld [vmem:[%s7662_s17 + $0x68] sm:$0xff]  }
0x22cd   : > { %6258 = vmatprep.subr.bf16.mxu0 %v6419_v42 }
0x22ce   : > { %6246 = vmatprep.mubr.msk.bf16.mxu0 %vm1097_vm4, %v4727_v49  ;;  %v6422_v49 = vld [vmem:[%s7662_s17 + $0x60] sm:$0xff]  }
0x22cf   : > { %6247 = vmatmul.mubr.msk.bf16.vlgmr.msra.gmra.mxu0 %vm1097_vm4, %v4728_v40  ;;  %v6423_v40 = vld [vmem:[%s7662_s17 + $0x58] sm:$0xff]  }
0x22d0   : > { %6259 = vmatpush3.bf16.msra.mxu0 %v6419_v42 }
0x22d1   : > { %6260 = vmatprep.subr.bf16.mxu0 %v6420_v43 }
0x22d4   : > { %6261 = vmatpush3.bf16.msra.mxu0 %v6420_v43  ;;  %v5613_v43 = vld [vmem:[%s7664_s19] ss:$0 sm:$0xff] }
0x22d5   : > { %6262 = vmatprep.subr.bf16.mxu0 %v6421_v41 }
0x22d8   : > { %6263 = vmatpush3.bf16.msra.mxu0 %v6421_v41 }
0x22d9   : > { %6264 = vmatprep.subr.bf16.mxu0 %v6422_v49 }
0x22dc   : > { %6265 = vmatpush3.bf16.msra.mxu0 %v6422_v49  ;;  %v5614_v49 = vld [vmem:[%s7665_s20] ss:$0 sm:$0xff] }
0x22dd   : > { %6266 = vmatprep.subr.bf16.mxu0 %v6423_v40 }
0x22e0   : > { %6267 = vmatpush3.bf16.msra.mxu0 %v6423_v40 }
0x238f   : > { %v6248_v50 = vpop.f32.mrf.mxu0 }
0x2390   : > { %v4790_v44 = vadd.f32 %v6248_v50, %v7484_v46  ;;  %v6424_v50 = vld [vmem:[%s7662_s17 + $0x50] sm:$0xff]  }
0x2391   : > { %v4774_v58 = vpop.f32.mrf.mxu0  ;;  %6268 = vmatprep.subr.bf16.mxu0 %v6424_v50 }
0x2392   : > { %v4788_v55 = vadd.f32 %v4774_v58, %v7486_v48  ;;  %v4793_v0 = vadd.f32 %v4790_v44, %v7209_v57  ;;  %v6425_v44 = vld [vmem:[%s7662_s17 + $0x48] sm:$0xff]   ;;  %6269 = vmatpush3.bf16.msra.mxu0 %v6424_v50  ;;  %v6426_v58 = vld [vmem:[%s7662_s17 + $0x40] sm:$0xff]  }
0x2393   : > { %v6249_v47 = vpop.f32.mrf.mxu0  ;;  %6270 = vmatprep.subr.bf16.mxu0 %v6425_v44 }
0x2394   : > { %v4791_v59 = vadd.f32 %v4788_v55, %v7206_v54  ;;  %v4804_v48 = vadd.f32 %v5572_v51, %v4793_v0  ;;  %v5582_v55 = vld [vmem:[%s7661_s16 + $0x1] ss:$0 sm:$0xff] }
0x2395   : > { %v4777_v52 = vpop.f32.mrf.mxu0 }
0x2396   : > { %v7524_v53 = vadd.f32 %v5572_v51, %v4791_v59  ;;  %v4789_v3 = vadd.f32 %v4777_v52, %v7493_v45  ;;  %v4815_v54 = vsel %vm819_vm1, %v4804_v48, 0.0  ;;  %6271 = vmatpush3.bf16.msra.mxu0 %v6425_v44 }
0x2397   : > { %6272 = vmatprep.subr.bf16.mxu0 %v6426_v58 }
0x2398   : > { %v4792_v21 = vadd.f32 %v4789_v3, %v7214_v60  ;;  %v4809_v46 = vsel %vm812_vm2, %v7524_v53, 0.0 }
0x2399   : > { %4810 = vadd.xlane.f32.xlu0 %v4809_v46 }
0x239a   : > { %v4803_v61 = vadd.f32 %v5572_v51, %v4792_v21  ;;  %6273 = vmatpush3.bf16.msra.mxu0 %v6426_v58  ;;  %v5130_v58 = vld [vmem:[%s7667_s22] sm:$0x1] }
0x239c   : > { %v4812_v57 = vsel %vm812_vm2, %v4803_v61, 0.0 }
0x239d   : > { %4813 = vadd.xlane.f32.xlu1 %v4812_v57  ;;  %4816 = vadd.xlane.f32.xlu0 %v4815_v54 }
0x2422   : > { %v4811_v22 = vpop.xlane.xlu0 %4810 }
0x2423   : > { %v4818_v63 = vmul.f32 0.03125, %v4811_v22 }
0x2425   : > { %v4821_v8 = vsub.f32 %v7524_v53, %v4818_v63 }
0x2426   : > { %v4814_v62 = vpop.xlane.xlu1 %4813  ;;  %v4817_v45 = vpop.xlane.xlu0 %4816 }
0x2427   : > { %v4819_v10 = vmul.f32 0.03125, %v4814_v62  ;;  %v4820_v60 = vmul.f32 0.03125, %v4817_v45  ;;  %v4824_v1 = vmul.f32 %v4821_v8, %v4821_v8 }
0x2429   : > { %v4822_v9 = vsub.f32 %v4803_v61, %v4819_v10  ;;  %v4823_v15 = vsub.f32 %v4804_v48, %v4820_v60  ;;  %v4827_v14 = vsel %vm812_vm2, %v4824_v1, 0.0 }
0x242a   : > { %4828 = vadd.xlane.f32.xlu1 %v4827_v14 }
0x242b   : > { %v4825_v4 = vmul.f32 %v4822_v9, %v4822_v9  ;;  %v4826_v19 = vmul.f32 %v4823_v15, %v4823_v15 }
0x242d   : > { %v4830_v6 = vsel %vm812_vm2, %v4825_v4, 0.0  ;;  %v4833_v35 = vsel %vm819_vm1, %v4826_v19, 0.0 }
0x242e   : > { %4831 = vadd.xlane.f32.xlu0 %v4830_v6  ;;  %4834 = vadd.xlane.f32.xlu1 %v4833_v35 }
0x24b3   : > { %v4829_v13 = vpop.xlane.xlu1 %4828 }
0x24b4   : > { %v4836_v18 = vmul.f32 0.03125, %v4829_v13 }
0x24b6   : > { %v4839_v20 = vadd.f32 1e-06, %v4836_v18 }
0x24b7   : > { %v4835_v5 = vpop.xlane.xlu1 %4834  ;;  %v4832_v7 = vpop.xlane.xlu0 %4831 }
0x24b8   : > { %6549 = vrsqrt.f32 %v4839_v20  ;;  %v4838_v11 = vmul.f32 0.03125, %v4835_v5  ;;  %v4837_v23 = vmul.f32 0.03125, %v4832_v7 }
0x24ba   : > { %v4841_v24 = vadd.f32 1e-06, %v4838_v11  ;;  %v4840_v2 = vadd.f32 1e-06, %v4837_v23 }
0x24bc   : > { %6551 = vrsqrt.f32 %v4841_v24 }
0x24bd   : > { %6553 = vrsqrt.f32 %v4840_v2  ;;  %v5604_v2 = vld [vmem:[%s7663_s18 + $0x1] ss:$0 sm:$0xff] }
0x24c5   : > { %v6550_v25 = vpop.eup %6549 }
0x24c6   : > { %v4845_v26 = vmul.f32 %v6550_v25, %v4821_v8 }
0x24c8   : > { %v4854_v31 = vmul.f32 %v5575_v17, %v4845_v26 }
0x24c9   : > { %v6552_v27 = vpop.eup %6551 }
0x24ca   : > { %v6554_v28 = vpop.eup %6553  ;;  %v4847_v29 = vmul.f32 %v6552_v27, %v4823_v15  ;;  %v4863_v36 = vadd.f32 %v5576_v32, %v4854_v31 }
0x24cb   : > { %v4846_v30 = vmul.f32 %v6554_v28, %v4822_v9 }
0x24cc   : > { %v4856_v33 = vmul.f32 %v5575_v17, %v4847_v29 }
0x24cd   : > { %v4855_v34 = vmul.f32 %v5575_v17, %v4846_v30 }
0x24ce   : > { %v4865_v56 = vadd.f32 %v5576_v32, %v4856_v33 }
0x24cf   : > { %v4864_v37 = vadd.f32 %v5576_v32, %v4855_v34 }
0x24d0   : > { %v4867_v38 = vpack.c.bf16 %v4865_v56, %v4865_v56  ;;  %v6427_v56 = vld [vmem:[%s7666_s21 + $0x8] sm:$0xff]  }
0x24d1   : > { %v4866_v39 = vpack.c.bf16 %v4864_v37, %v4863_v36  ;;  %v6626_v36 = vmov 0.0  }
0x24d2   : > { %6278 = vmatprep.subr.bf16.mxu1 %v6626_v36 }
0x24d3   : > { %6254 = vmatprep.mubr.msk.bf16.mxu1 %vm812_vm2, %v4866_v39 }
0x24d4   : > { %6255 = vmatmul.mubr.msk.bf16.vlgmr.msra.gmra.mxu1 %vm812_vm2, %v4867_v38 }
0x24d5   : > { %6279 = vmatpush3.bf16.msra.mxu1 %v6427_v56  ;;  %6282 = vmatprep.mubr.msk.bf16.mxu1 %vm6627_vm8, %v6626_v36 }
0x24d6   : > { %6280 = vmatprep.subr.bf16.mxu1 %v6626_v36 }
0x2594   : > { %v6256_v47 = vpop.f32.mrf.mxu1 }
0x2595   : > { %v4942_v0 = vadd.f32 %v6256_v47, %v5582_v55 }
0x2596   : > { %v4933_v59 = vpop.f32.mrf.mxu1 }
0x2597   : > { %v4949_v51 = vmul.f32 %v4942_v0, %v4942_v0  ;;  %v4934_v52 = vadd.f32 %v5582_v55, %v4933_v59 }
0x2598   : > { %v6257_v3 = vpop.f32.mrf.mxu1 }
0x2599   : > { %v4952_v21 = vmul.f32 %v4949_v51, %v4942_v0  ;;  %v4947_v46 = vmul.f32 %v4934_v52, %v4934_v52 }
0x259a   : > { %v4936_v48 = vpop.f32.mrf.mxu1 }
0x259b   : > { %v4955_v61 = vmul.f32 0.044715, %v4952_v21  ;;  %v4950_v57 = vmul.f32 %v4947_v46, %v4934_v52  ;;  %v4937_v54 = vadd.f32 %v5582_v55, %v4936_v48 }
0x259d   : > { %v4958_v22 = vadd.f32 %v4955_v61, %v4942_v0  ;;  %v4953_v63 = vmul.f32 0.044715, %v4950_v57  ;;  %v4948_v8 = vmul.f32 %v4937_v54, %v4937_v54 }
0x259f   : > { %v4961_v62 = vmul.f32 0.7978846, %v4958_v22  ;;  %v4956_v45 = vadd.f32 %v4953_v63, %v4934_v52  ;;  %v4951_v10 = vmul.f32 %v4948_v8, %v4937_v54 }
0x25a1   : > { %6555 = vtanh.f32 %v4961_v62  ;;  %v4959_v60 = vmul.f32 0.7978846, %v4956_v45  ;;  %v4954_v1 = vmul.f32 0.044715, %v4951_v10 }
0x25a3   : > { %6557 = vtanh.f32 %v4959_v60  ;;  %v4957_v9 = vadd.f32 %v4954_v1, %v4937_v54 }
0x25a5   : > { %v4960_v15 = vmul.f32 0.7978846, %v4957_v9 }
0x25a7   : > { %6559 = vtanh.f32 %v4960_v15 }
0x25ae   : > { %v6556_v14 = vpop.eup %6555 }
0x25af   : > { %v4967_v19 = vadd.f32 1.0, %v6556_v14 }
0x25b0   : > { %v6558_v4 = vpop.eup %6557 }
0x25b1   : > { %v4965_v6 = vadd.f32 1.0, %v6558_v4  ;;  %v4970_v16 = vmul.f32 0.5, %v4967_v19 }
0x25b3   : > { %v4968_v13 = vmul.f32 0.5, %v4965_v6  ;;  %v4973_v20 = vmul.f32 %v4970_v16, %v4942_v0 }
0x25b4   : > { %v6560_v35 = vpop.eup %6559 }
0x25b5   : > { %v4966_v12 = vadd.f32 1.0, %v6560_v35  ;;  %v4971_v5 = vmul.f32 %v4968_v13, %v4934_v52  ;;  %v4975_v23 = vpack.c.bf16 %v4973_v20, %v4973_v20 }
0x25b7   : > { %v4969_v18 = vmul.f32 0.5, %v4966_v12 }
0x25b9   : > { %v4972_v7 = vmul.f32 %v4969_v18, %v4937_v54 }
0x25bb   : > { %v4974_v11 = vpack.c.bf16 %v4972_v7, %v4971_v5 }
0x25bd   : > { %6274 = vmatprep.mubr.bf16.mxu0 %v4974_v11 }
0x25be   : > { %6275 = vmatmul.mubr.bf16.vlgmr.msra.gmra.mxu0 %v4975_v23 }
0x267e   : > { %v6276_v24 = vpop.f32.mrf.mxu0 }
0x2680   : > { %v5083_v25 = vpop.f32.mrf.mxu0 }
0x2681   : > { %v5084_v26 = vadd.f32 %v5604_v2, %v5083_v25 }
0x2682   : > { %v6277_v17 = vpop.f32.mrf.mxu0 }
0x2683   : > { %v5095_v27 = vadd.f32 %v5084_v26, %v7524_v53  ;;  %v6428_v53 = vld [vmem:[%s7666_s21] sm:$0xff]  }
0x2684   : > { %v5086_v28 = vpop.f32.mrf.mxu0  ;;  %6281 = vmatpush3.bf16.msra.mxu1 %v6428_v53 }
0x2685   : > { %v5098_v29 = vsel %vm812_vm2, %v5095_v27, 0.0 }
0x2686   : > { %5099 = vadd.xlane.f32.xlu0 %v5098_v29 }
0x270f   : > { %v5100_v30 = vpop.xlane.xlu0 %5099 }
0x2710   : > { %v5101_v31 = vmul.f32 0.03125, %v5100_v30 }
0x2712   : > { %v5102_v32 = vsub.f32 %v5095_v27, %v5101_v31 }
0x2714   : > { %v5103_v33 = vmul.f32 %v5102_v32, %v5102_v32 }
0x2716   : > { %v5104_v34 = vsel %vm812_vm2, %v5103_v33, 0.0 }
0x2717   : > { %5105 = vadd.xlane.f32.xlu1 %v5104_v34 }
0x27a0   : > { %v5106_v37 = vpop.xlane.xlu1 %5105 }
0x27a1   : > { %v5107_v38 = vmul.f32 0.03125, %v5106_v37 }
0x27a3   : > { %v5108_v39 = vadd.f32 1e-06, %v5107_v38 }
0x27a5   : > { %6561 = vrsqrt.f32 %v5108_v39 }
0x27b2   : > { %v6562_v42 = vpop.eup %6561 }
0x27b3   : > { %v5110_v41 = vmul.f32 %v6562_v42, %v5102_v32 }
0x27b5   : > { %v5117_v40 = vmul.f32 %v5613_v43, %v5110_v41 }
0x27b7   : > { %v5124_v50 = vadd.f32 %v5614_v49, %v5117_v40 }
0x27b9   : > { %v5125_v44 = vpack.c.bf16 %v5124_v50, %v5124_v50 }
0x27bb   : > { %6283 = vmatmul.mubr.msk.bf16.vlgmr.msra.gmra.mxu1 %vm812_vm2, %v5125_v44 }
0x287b   : > { %v5180_v55 = vpop.f32.mrf.mxu1 }
0x287c   : > { %v5181_v47 = vadd.f32 %v5180_v55, %v5130_v58 }
0x287d   : > { %v6284_v0 = vpop.f32.mrf.mxu1 }
0x287e   : > { %5186 = vst [vmem:[%s702_s2] sm:$0x1] %v5181_v47 }
0x287f   : > { %v5183_v59 = vpop.f32.mrf.mxu1 }
0x2880   : > { %6576 = shalt.err (!%p6573_p3)
}
0x2881   : > { %s6577_s2 = scalar_lea.hbm %s7604_s25, 16  ;;  %s6581_s28 = scalar_lea.hbm %s7719_s8, 32 }
0x2882   : > { %p6578_p4 = scmp.ne.s32.totalorder %s7604_s25, %s6577_s2  ;;  %p6582_p9 = scmp.lt.s32.totalorder %s7604_s25, %s7719_s8 }
0x2883   : > { %p6583_p10 = scmp.lt.s32.totalorder %s6581_s28, %s6577_s2 }
0x2884   : > { %p6579_p7 = pnand %p6578_p4, %p6787_p5 }
0x2885   : > { %p6584_p11 = por %p6583_p10, %p6582_p9 }
0x2886   : > { %p6580_p8 = pneg %p6579_p7 }
0x2888   : > { %p6585_p12 = pnand %p6584_p11, %p6580_p8 }
0x288a   : > { %6588 = shalt.err (!%p6585_p12)
}
0x288b   : > { %6311 = dma.vmem_to_hbm [thread:$0]  (%p6787_p5), %s7606_s24, 16, %s7604_s25, %s5188_s1   ;;  %v6285_v51 = vpop.f32.mrf.mxu1 }
0x288c PF: > { %s7720_s9 = sld [smem:[#allocation7_spill]] }
0x288d   : > { %s7721_s29 = sld [smem:[#allocation5_spill]] }
0x2892   : > { %p6317_p13 = scmp.ge.s32.totalorder %s7720_s9, 2 }
0x2893   : > { %s5212_s0 = sand.u32 1, %s7721_s29  }
0x2894   : > { %p6314_p0 = pnand %p6317_p13, %p6791_p6  ;;  %s5213_s3 = scalar_lea.sflag [#allocation3], %s5212_s0 }
0x2896   : > { %p6315_p1 = pneg %p6314_p0 }
0x2898   : > { %6606 = dma.done.wait (%p6315_p1), %s5213_s3, 16  }
0x2899   : > { %6608 = vsyncadd (%p6315_p1), %s5213_s3, 4294967280  ;;  %s7723_s25 = sld [smem:[#allocation8_spill]]  ;;  %s7726_s4 = smov %s6615_s30 }
0x289a   : > { %s7724_s2 = sld [smem:[#allocation6_spill]] }
0x289b   : > { %s7725_s24 = sld [smem:[#allocation9_spill]] }
0x289f   : > { %p33_p2 = scmp.ge.s32.totalorder %s7723_s25, 4  }
0x28a0   : > { %s7727_s30 = smov %s7724_s2 }
0x28a1   :  { %35 = sbr.rel (!%p33_p2) target bundleno = 15 (0xf), region = 205 }
0x28a6   :  { %5217 = vsyncpa [#allocation3], 1 }
0x28a7   :  { %5219 = vsyncpa [#allocation3 + $0x1], 1 }

</bundles_post_ra>
